<compile_context>
chip_gen: v6e
topology: v6e:2x2x1
jax: 0.10.0
libtpu: 0.0.40
codegen_flags: <defaults>
</compile_context>

<pallas_src>
import numpy as np
import jax
import jax.numpy as jnp
from jax import lax
from jax.experimental import pallas as pl
from jax.experimental.pallas import tpu as pltpu


# ----------------------------- Pallas kernel --------------------------------
def shuffle_unit_kernel(xp_ref, xres_ref, w1_ref, sh1_ref, wdw_ref, sh2_ref,
                        w2_ref, sh3_ref, o_ref):
    """Fused ShuffleUnit(stride=1) for one block of batch elements.

    xp_ref  : (NB, Hp, Wpp, Cp) spatially padded input, compute dtype (bf16/f32)
    xres_ref: (NB, H,  Wo,  Cp) unpadded input for the residual, f32 (aligned read)
    w1_ref  : (Cp, Cp) grouped 1x1 conv1 (block-diag), shuffle perm + BN1 scale folded
    wdw_ref : (9, Cp)  depthwise 3x3 taps (row = ki*3 + kj), BN2 scale folded
    w2_ref  : (Cp, Cp) grouped 1x1 conv2 (block-diag), BN3 scale folded
    sh*_ref : (1, Cp)  folded bias+BN shifts
    o_ref   : (NB, H, Wo, Cp)
    """
    nb, hp, wpp, cp = xp_ref.shape
    h, wo = o_ref.shape[1], o_ref.shape[2]

    # ---- grouped 1x1 conv1 (+ channel shuffle + BN1 folded) + ReLU ----
    # Wpp is a multiple of the sublane tile, so this reshape is layout-preserving.
    xf = xp_ref[...].reshape(nb * hp * wpp, cp)
    y = jnp.dot(xf, w1_ref[...], preferred_element_type=jnp.float32)
    y = jnp.maximum(y + sh1_ref[0], 0.0)
    y = y.reshape(nb, hp, wpp, cp)

    # ---- depthwise 3x3 conv (stride 1) + BN2 folded ----
    # Materialize the three W-shifted views once; ki offsets are on an outer
    # (tile-granular) axis and are free. Seed acc with the (0, 0) tap.
    y_sh = [y[:, :, kj:kj + wo, :] for kj in range(3)]
    acc = y_sh[0][:, 0:h] * wdw_ref[0]
    for ki in range(3):
        for kj in range(3):
            if ki == 0 and kj == 0:
                continue
            acc = acc + y_sh[kj][:, ki:ki + h] * wdw_ref[ki * 3 + kj]
    z = acc + sh2_ref[0]

    # ---- grouped 1x1 conv2 + BN3 folded ----
    zf = z.reshape(nb * h * wo, cp).astype(w2_ref.dtype)   # Wo % 8 == 0 -> no relayout
    u = jnp.dot(zf, w2_ref[...], preferred_element_type=jnp.float32)
    u = (u + sh3_ref[0]).reshape(nb, h, wo, cp)

    # ---- residual add (stride == 1) + ReLU ----
    o_ref[...] = jnp.maximum(u + xres_ref[...], 0.0)


# ------------------------------ glue helpers ---------------------------------
def _round_up(x, m):
    return (x + m - 1) // m * m


def _fold_bn(gamma, beta, mean, var, eps=1e-5):
    scale = gamma / jnp.sqrt(var + eps)
    shift = beta - mean * scale
    return scale, shift


def _block_diag_from_grouped(w, groups):
    """torch-style grouped 1x1 weight (Cout, Cin_g) -> dense (Cin, Cout)."""
    Cout, Cin_g = w.shape
    Cout_g = Cout // groups
    Cin = Cin_g * groups
    full = jnp.zeros((Cin, Cout), jnp.float32)
    for g in range(groups):
        full = full.at[g * Cin_g:(g + 1) * Cin_g,
                       g * Cout_g:(g + 1) * Cout_g].set(
            w[g * Cout_g:(g + 1) * Cout_g, :].T)
    return full


def _pick_block_n(n, max_block_n=8):
    """Largest divisor of n <= min(max_block_n, n // 2): amortizes per-step
    overhead while keeping grid extent >= 2 (both v7x TensorCores busy)."""
    target = max(1, min(max_block_n, n // 2)) if n >= 2 else 1
    for nb in range(target, 0, -1):
        if n % nb == 0:
            return nb
    return 1


def shuffle_unit_pallas(x_nchw, p, groups, eps=1e-5,
                        compute_dtype=jnp.bfloat16, max_block_n=8):
    """ShuffleUnit forward (stride == 1). Input/output are NCHW like PyTorch."""
    N, C, H, W = x_nchw.shape
    Cb = C                                    # stride == 1 -> bottleneck == in_channels
    Cp = _round_up(C, 128)                    # lane-dense channel count
    Wo = _round_up(W, 8)                      # sublane-aligned output width
    Wpp = _round_up(Wo + 2, 16)               # padded input width (bf16 sublane tile = 16)
    Hp = H + 2
    nb = _pick_block_n(N, max_block_n)

    # channel-shuffle permutation: new channel m*G+g <- old channel g*(C/G)+m
    perm = np.arange(Cb).reshape(groups, Cb // groups).T.reshape(-1)

    s1, t1 = _fold_bn(p['g1'], p['be1'], p['m1'], p['v1'], eps)
    s2, t2 = _fold_bn(p['g2'], p['be2'], p['m2'], p['v2'], eps)
    s3, t3 = _fold_bn(p['g3'], p['be3'], p['m3'], p['v3'], eps)

    # conv1: block-diag grouped weight with the shuffle perm + BN1 scale folded in.
    w1 = _block_diag_from_grouped(p['w1'], groups)[:, perm] * s1[perm][None, :]
    sh1 = p['b1'][perm] * s1[perm] + t1[perm]
    # depthwise: BN2 scale folded into the taps.
    wdw = jnp.transpose(p['wdw'], (1, 2, 0)) * s2[None, None, :]        # (3, 3, Cb)
    sh2 = p['bdw'] * s2 + t2
    # conv2: block-diag grouped weight with BN3 scale folded in.
    w2 = _block_diag_from_grouped(p['w2'], groups) * s3[None, :]
    sh3 = p['b2'] * s3 + t3
    # TODO(synk): for large channel counts on v5e, split the grouped 1x1s into
    #             per-group matmuls instead of the dense block-diagonal form.

    # Zero-pad everything to the lane-dense channel count Cp (padded channels are
    # exact zeros end-to-end and are sliced off after the kernel).
    f32 = jnp.float32
    w1_p = jnp.zeros((Cp, Cp), f32).at[:C, :Cb].set(w1).astype(compute_dtype)
    w2_p = jnp.zeros((Cp, Cp), f32).at[:Cb, :Cb].set(w2).astype(compute_dtype)
    wdw_p = jnp.zeros((9, Cp), f32).at[:, :Cb].set(wdw.reshape(9, Cb))
    sh1_p = jnp.zeros((1, Cp), f32).at[0, :Cb].set(sh1)
    sh2_p = jnp.zeros((1, Cp), f32).at[0, :Cb].set(sh2)
    sh3_p = jnp.zeros((1, Cp), f32).at[0, :Cb].set(sh3)

    # Input layouts (NHWC, channel-padded). conv1's padding=1 is realized spatially;
    # the extra right-pad columns only feed unused/garbage output columns (sliced off).
    # TODO(synk): if the surrounding graph is NHWC these transposes/pads disappear.
    x = jnp.transpose(x_nchw, (0, 2, 3, 1)).astype(f32)                 # (N, H, W, C)
    xres = jnp.pad(x, ((0, 0), (0, 0), (0, Wo - W), (0, Cp - C)))       # residual, f32
    xp = jnp.pad(x, ((0, 0), (1, 1), (1, Wpp - W - 1), (0, Cp - C))
                 ).astype(compute_dtype)                                # (N, Hp, Wpp, Cp)

    out = pl.pallas_call(
        shuffle_unit_kernel,
        out_shape=jax.ShapeDtypeStruct((N, H, Wo, Cp), f32),
        grid=(N // nb,),
        in_specs=[
            pl.BlockSpec((nb, Hp, Wpp, Cp), lambda n: (n, 0, 0, 0)),
            pl.BlockSpec((nb, H, Wo, Cp), lambda n: (n, 0, 0, 0)),
            # Weight / shift blocks never change across the grid (re-DMA is skipped).
            # TODO(synk): on v7x with large Cp, use pipeline_mode=pl.Buffered(1) or a
            #             one-shot DMA into scratch to halve their VMEM footprint.
            pl.BlockSpec((Cp, Cp), lambda n: (0, 0)),
            pl.BlockSpec((1, Cp), lambda n: (0, 0)),
            pl.BlockSpec((9, Cp), lambda n: (0, 0)),
            pl.BlockSpec((1, Cp), lambda n: (0, 0)),
            pl.BlockSpec((Cp, Cp), lambda n: (0, 0)),
            pl.BlockSpec((1, Cp), lambda n: (0, 0)),
        ],
        out_specs=pl.BlockSpec((nb, H, Wo, Cp), lambda n: (n, 0, 0, 0)),
        compiler_params=pltpu.CompilerParams(
            dimension_semantics=("parallel",),
            vmem_limit_bytes=32 * 1024 * 1024),
    )(xp, xres, w1_p, sh1_p, wdw_p, sh2_p, w2_p, sh3_p)

    out = out[:, :, :W, :C]                                             # drop padding
    return jnp.transpose(out, (0, 3, 1, 2))                             # back to NCHW


# -------------------------- pure-JAX reference -------------------------------
def shuffle_unit_reference(x_nchw, p, groups, eps=1e-5):
    dn = ('NHWC', 'HWIO', 'NHWC')
    x = jnp.transpose(x_nchw, (0, 2, 3, 1)).astype(jnp.float32)
    Cb = x.shape[-1]

    w1_hwio = p['w1'].T[None, None]                                # (1,1,Cin_g,Cb)
    y = lax.conv_general_dilated(x, w1_hwio, (1, 1), ((1, 1), (1, 1)),
                                 dimension_numbers=dn,
                                 feature_group_count=groups) + p['b1']
    y = (y - p['m1']) / jnp.sqrt(p['v1'] + eps) * p['g1'] + p['be1']
    y = jnp.maximum(y, 0.0)
    n_, h_, w_, c_ = y.shape
    y = y.reshape(n_, h_, w_, groups, c_ // groups)
    y = jnp.swapaxes(y, 3, 4).reshape(n_, h_, w_, c_)              # ChannelShuffle

    wdw_hwio = jnp.transpose(p['wdw'], (1, 2, 0))[:, :, None, :]   # (3,3,1,Cb)
    z = lax.conv_general_dilated(y, wdw_hwio, (1, 1), 'VALID',
                                 dimension_numbers=dn,
                                 feature_group_count=Cb) + p['bdw']
    z = (z - p['m2']) / jnp.sqrt(p['v2'] + eps) * p['g2'] + p['be2']

    w2_hwio = p['w2'].T[None, None]
    u = lax.conv_general_dilated(z, w2_hwio, (1, 1), 'VALID',
                                 dimension_numbers=dn,
                                 feature_group_count=groups) + p['b2']
    u = (u - p['m3']) / jnp.sqrt(p['v3'] + eps) * p['g3'] + p['be3']

    out = jnp.maximum(u + x, 0.0)
    return jnp.transpose(out, (0, 3, 1, 2))


# ------------------------------ parameters -----------------------------------
def make_params(key, in_channels, groups):
    Cb = in_channels                     # stride == 1 -> bottleneck == in
    Cgin = in_channels // groups
    Cg = Cb // groups
    ks = jax.random.split(key, 9)

    def bn(k):
        k1, k2, k3, k4 = jax.random.split(k, 4)
        return (1.0 + 0.1 * jax.random.normal(k1, (Cb,), jnp.float32),
                0.1 * jax.random.normal(k2, (Cb,), jnp.float32),
                0.1 * jax.random.normal(k3, (Cb,), jnp.float32),
                0.5 + 0.5 * jnp.abs(jax.random.normal(k4, (Cb,), jnp.float32)))

    g1, be1, m1, v1 = bn(ks[0])
    g2, be2, m2, v2 = bn(ks[1])
    g3, be3, m3, v3 = bn(ks[2])
    return dict(
        w1=0.3 * jax.random.normal(ks[3], (Cb, Cgin), jnp.float32),
        b1=0.1 * jax.random.normal(ks[4], (Cb,), jnp.float32),
        wdw=0.3 * jax.random.normal(ks[5], (Cb, 3, 3), jnp.float32),
        bdw=0.1 * jax.random.normal(ks[6], (Cb,), jnp.float32),
        w2=0.3 * jax.random.normal(ks[7], (Cb, Cg), jnp.float32),
        b2=0.1 * jax.random.normal(ks[8], (Cb,), jnp.float32),
        g1=g1, be1=be1, m1=m1, v1=v1,
        g2=g2, be2=be2, m2=m2, v2=v2,
        g3=g3, be3=be3, m3=m3, v3=v3,
    )


if __name__ == "__main__":
    key = jax.random.PRNGKey(0)
    kx, kp = jax.random.split(key)

    N, C, H, W = 2, 4, 16, 16            # PyTorch NCHW input shape
    groups = 2                           # ShuffleUnit(in=4, out=4, stride=1, groups=2)

    x = jax.random.normal(kx, (N, C, H, W), jnp.float32)
    params = make_params(kp, C, groups)

    ref = jax.block_until_ready(shuffle_unit_reference(x, params, groups))

    # f32 compute path: tight check of the layout / BN-folding / shuffle logic.
    out_f32 = jax.block_until_ready(
        shuffle_unit_pallas(x, params, groups, compute_dtype=jnp.float32))
    if not np.allclose(np.asarray(out_f32), np.asarray(ref), atol=1e-3, rtol=1e-3):
        raise AssertionError("Pallas ShuffleUnit (f32) does not match JAX reference")

    # bf16 matmul path (the performance configuration) — looser tolerance since the
    # 1x1 matmul inputs are rounded to bfloat16.
    out_bf16 = jax.block_until_ready(
        shuffle_unit_pallas(x, params, groups, compute_dtype=jnp.bfloat16))
    if not np.allclose(np.asarray(out_bf16), np.asarray(ref), atol=1e-1, rtol=5e-2):
        raise AssertionError("Pallas ShuffleUnit (bf16) does not match JAX reference")

    print("KERNEL_OK")
</pallas_src>

<mosaic_0001>
module attributes {stable_mosaic.version = 11 : i64} {
  func.func @shuffle_unit_kernel(%arg0: i32, %arg1: memref<1x18x32x128xf32, #tpu.memory_space<vmem>>, %arg2: memref<1x16x16x128xf32, #tpu.memory_space<vmem>>, %arg3: memref<128x128xf32, #tpu.memory_space<vmem>>, %arg4: memref<1x128xf32, #tpu.memory_space<vmem>>, %arg5: memref<9x128xf32, #tpu.memory_space<vmem>>, %arg6: memref<1x128xf32, #tpu.memory_space<vmem>>, %arg7: memref<128x128xf32, #tpu.memory_space<vmem>>, %arg8: memref<1x128xf32, #tpu.memory_space<vmem>>, %arg9: memref<1x16x16x128xf32, #tpu.memory_space<vmem>>) attributes {dimension_semantics = [#tpu.dimension_semantics<parallel>], iteration_bounds = array<i64: 2>, scalar_prefetch = 0 : i64, scratch_operands = 0 : i64, tpu.core_type = #tpu.core_type<tc>, window_params = [{transform_indices = @transform_0, window_bounds = array<i64: 1, 18, 32, 128>}, {transform_indices = @transform_1, window_bounds = array<i64: 1, 16, 16, 128>}, {pipeline_mode = #tpu.pipeline_mode<synchronous>, transform_indices = @transform_2, window_bounds = array<i64: 128, 128>}, {pipeline_mode = #tpu.pipeline_mode<synchronous>, transform_indices = @transform_3, window_bounds = array<i64: 1, 128>}, {pipeline_mode = #tpu.pipeline_mode<synchronous>, transform_indices = @transform_4, window_bounds = array<i64: 9, 128>}, {pipeline_mode = #tpu.pipeline_mode<synchronous>, transform_indices = @transform_5, window_bounds = array<i64: 1, 128>}, {pipeline_mode = #tpu.pipeline_mode<synchronous>, transform_indices = @transform_6, window_bounds = array<i64: 128, 128>}, {pipeline_mode = #tpu.pipeline_mode<synchronous>, transform_indices = @transform_7, window_bounds = array<i64: 1, 128>}, {transform_indices = @transform_8, window_bounds = array<i64: 1, 16, 16, 128>}]} {
    %c0 = arith.constant 0 : index
    %c0_0 = arith.constant 0 : index
    %c0_1 = arith.constant 0 : index
    %c0_2 = arith.constant 0 : index
    %0 = vector.load %arg1[%c0, %c0_0, %c0_1, %c0_2] : memref<1x18x32x128xf32, #tpu.memory_space<vmem>>, vector<1x18x32x128xf32>
    %1 = vector.shape_cast %0 : vector<1x18x32x128xf32> to vector<576x128xf32>
    %c0_3 = arith.constant 0 : index
    %c0_4 = arith.constant 0 : index
    %2 = vector.load %arg3[%c0_3, %c0_4] : memref<128x128xf32, #tpu.memory_space<vmem>>, vector<128x128xf32>
    %cst = arith.constant dense<0.000000e+00> : vector<576x128xf32>
    %3 = tpu.matmul %1, %2, %cst {dimension_numbers = #tpu.dot_dimension_numbers<[1], [0], [0], [1], [0, 0, 1, 1], [], []>} : vector<576x128xf32>, vector<128x128xf32>, vector<576x128xf32> -> vector<576x128xf32>
    %c0_5 = arith.constant 0 : index
    %c0_6 = arith.constant 0 : index
    %4 = vector.load %arg4[%c0_5, %c0_6] : memref<1x128xf32, #tpu.memory_space<vmem>>, vector<1x128xf32>
    %5 = vector.shape_cast %4 : vector<1x128xf32> to vector<128xf32>
    %6 = vector.shape_cast %5 : vector<128xf32> to vector<1x128xf32>
    %7 = vector.broadcast %6 : vector<1x128xf32> to vector<576x128xf32>
    %8 = arith.addf %3, %7 : vector<576x128xf32>
    %cst_7 = arith.constant 0.000000e+00 : f32
    %9 = vector.broadcast %cst_7 : f32 to vector<576x128xf32>
    %10 = arith.maximumf %8, %9 : vector<576x128xf32>
    %11 = vector.shape_cast %10 : vector<576x128xf32> to vector<1x18x32x128xf32>
    %12 = vector.extract_strided_slice %11 {offsets = [0, 0, 0, 0], sizes = [1, 18, 16, 128], strides = [1, 1, 1, 1]} : vector<1x18x32x128xf32> to vector<1x18x16x128xf32>
    %13 = vector.extract_strided_slice %11 {offsets = [0, 0, 1, 0], sizes = [1, 18, 16, 128], strides = [1, 1, 1, 1]} : vector<1x18x32x128xf32> to vector<1x18x16x128xf32>
    %14 = vector.extract_strided_slice %11 {offsets = [0, 0, 2, 0], sizes = [1, 18, 16, 128], strides = [1, 1, 1, 1]} : vector<1x18x32x128xf32> to vector<1x18x16x128xf32>
    %15 = vector.extract_strided_slice %12 {offsets = [0, 0, 0, 0], sizes = [1, 16, 16, 128], strides = [1, 1, 1, 1]} : vector<1x18x16x128xf32> to vector<1x16x16x128xf32>
    %c0_8 = arith.constant 0 : index
    %c0_9 = arith.constant 0 : index
    %16 = vector.load %arg5[%c0_8, %c0_9] : memref<9x128xf32, #tpu.memory_space<vmem>>, vector<1x128xf32>
    %17 = vector.shape_cast %16 : vector<1x128xf32> to vector<128xf32>
    %18 = vector.shape_cast %17 : vector<128xf32> to vector<1x1x1x128xf32>
    %19 = vector.broadcast %18 : vector<1x1x1x128xf32> to vector<1x16x16x128xf32>
    %20 = arith.mulf %15, %19 : vector<1x16x16x128xf32>
    %21 = vector.extract_strided_slice %13 {offsets = [0, 0, 0, 0], sizes = [1, 16, 16, 128], strides = [1, 1, 1, 1]} : vector<1x18x16x128xf32> to vector<1x16x16x128xf32>
    %c1 = arith.constant 1 : index
    %c0_10 = arith.constant 0 : index
    %22 = vector.load %arg5[%c1, %c0_10] : memref<9x128xf32, #tpu.memory_space<vmem>>, vector<1x128xf32>
    %23 = vector.shape_cast %22 : vector<1x128xf32> to vector<128xf32>
    %24 = vector.shape_cast %23 : vector<128xf32> to vector<1x1x1x128xf32>
    %25 = vector.broadcast %24 : vector<1x1x1x128xf32> to vector<1x16x16x128xf32>
    %26 = arith.mulf %21, %25 : vector<1x16x16x128xf32>
    %27 = arith.addf %20, %26 : vector<1x16x16x128xf32>
    %28 = vector.extract_strided_slice %14 {offsets = [0, 0, 0, 0], sizes = [1, 16, 16, 128], strides = [1, 1, 1, 1]} : vector<1x18x16x128xf32> to vector<1x16x16x128xf32>
    %c2 = arith.constant 2 : index
    %c0_11 = arith.constant 0 : index
    %29 = vector.load %arg5[%c2, %c0_11] : memref<9x128xf32, #tpu.memory_space<vmem>>, vector<1x128xf32>
    %30 = vector.shape_cast %29 : vector<1x128xf32> to vector<128xf32>
    %31 = vector.shape_cast %30 : vector<128xf32> to vector<1x1x1x128xf32>
    %32 = vector.broadcast %31 : vector<1x1x1x128xf32> to vector<1x16x16x128xf32>
    %33 = arith.mulf %28, %32 : vector<1x16x16x128xf32>
    %34 = arith.addf %27, %33 : vector<1x16x16x128xf32>
    %35 = vector.extract_strided_slice %12 {offsets = [0, 1, 0, 0], sizes = [1, 16, 16, 128], strides = [1, 1, 1, 1]} : vector<1x18x16x128xf32> to vector<1x16x16x128xf32>
    %c3 = arith.constant 3 : index
    %c0_12 = arith.constant 0 : index
    %36 = vector.load %arg5[%c3, %c0_12] : memref<9x128xf32, #tpu.memory_space<vmem>>, vector<1x128xf32>
    %37 = vector.shape_cast %36 : vector<1x128xf32> to vector<128xf32>
    %38 = vector.shape_cast %37 : vector<128xf32> to vector<1x1x1x128xf32>
    %39 = vector.broadcast %38 : vector<1x1x1x128xf32> to vector<1x16x16x128xf32>
    %40 = arith.mulf %35, %39 : vector<1x16x16x128xf32>
    %41 = arith.addf %34, %40 : vector<1x16x16x128xf32>
    %42 = vector.extract_strided_slice %13 {offsets = [0, 1, 0, 0], sizes = [1, 16, 16, 128], strides = [1, 1, 1, 1]} : vector<1x18x16x128xf32> to vector<1x16x16x128xf32>
    %c4 = arith.constant 4 : index
    %c0_13 = arith.constant 0 : index
    %43 = vector.load %arg5[%c4, %c0_13] : memref<9x128xf32, #tpu.memory_space<vmem>>, vector<1x128xf32>
    %44 = vector.shape_cast %43 : vector<1x128xf32> to vector<128xf32>
    %45 = vector.shape_cast %44 : vector<128xf32> to vector<1x1x1x128xf32>
    %46 = vector.broadcast %45 : vector<1x1x1x128xf32> to vector<1x16x16x128xf32>
    %47 = arith.mulf %42, %46 : vector<1x16x16x128xf32>
    %48 = arith.addf %41, %47 : vector<1x16x16x128xf32>
    %49 = vector.extract_strided_slice %14 {offsets = [0, 1, 0, 0], sizes = [1, 16, 16, 128], strides = [1, 1, 1, 1]} : vector<1x18x16x128xf32> to vector<1x16x16x128xf32>
    %c5 = arith.constant 5 : index
    %c0_14 = arith.constant 0 : index
    %50 = vector.load %arg5[%c5, %c0_14] : memref<9x128xf32, #tpu.memory_space<vmem>>, vector<1x128xf32>
    %51 = vector.shape_cast %50 : vector<1x128xf32> to vector<128xf32>
    %52 = vector.shape_cast %51 : vector<128xf32> to vector<1x1x1x128xf32>
    %53 = vector.broadcast %52 : vector<1x1x1x128xf32> to vector<1x16x16x128xf32>
    %54 = arith.mulf %49, %53 : vector<1x16x16x128xf32>
    %55 = arith.addf %48, %54 : vector<1x16x16x128xf32>
    %56 = vector.extract_strided_slice %12 {offsets = [0, 2, 0, 0], sizes = [1, 16, 16, 128], strides = [1, 1, 1, 1]} : vector<1x18x16x128xf32> to vector<1x16x16x128xf32>
    %c6 = arith.constant 6 : index
    %c0_15 = arith.constant 0 : index
    %57 = vector.load %arg5[%c6, %c0_15] : memref<9x128xf32, #tpu.memory_space<vmem>>, vector<1x128xf32>
    %58 = vector.shape_cast %57 : vector<1x128xf32> to vector<128xf32>
    %59 = vector.shape_cast %58 : vector<128xf32> to vector<1x1x1x128xf32>
    %60 = vector.broadcast %59 : vector<1x1x1x128xf32> to vector<1x16x16x128xf32>
    %61 = arith.mulf %56, %60 : vector<1x16x16x128xf32>
    %62 = arith.addf %55, %61 : vector<1x16x16x128xf32>
    %63 = vector.extract_strided_slice %13 {offsets = [0, 2, 0, 0], sizes = [1, 16, 16, 128], strides = [1, 1, 1, 1]} : vector<1x18x16x128xf32> to vector<1x16x16x128xf32>
    %c7 = arith.constant 7 : index
    %c0_16 = arith.constant 0 : index
    %64 = vector.load %arg5[%c7, %c0_16] : memref<9x128xf32, #tpu.memory_space<vmem>>, vector<1x128xf32>
    %65 = vector.shape_cast %64 : vector<1x128xf32> to vector<128xf32>
    %66 = vector.shape_cast %65 : vector<128xf32> to vector<1x1x1x128xf32>
    %67 = vector.broadcast %66 : vector<1x1x1x128xf32> to vector<1x16x16x128xf32>
    %68 = arith.mulf %63, %67 : vector<1x16x16x128xf32>
    %69 = arith.addf %62, %68 : vector<1x16x16x128xf32>
    %70 = vector.extract_strided_slice %14 {offsets = [0, 2, 0, 0], sizes = [1, 16, 16, 128], strides = [1, 1, 1, 1]} : vector<1x18x16x128xf32> to vector<1x16x16x128xf32>
    %c8 = arith.constant 8 : index
    %c0_17 = arith.constant 0 : index
    %71 = vector.load %arg5[%c8, %c0_17] : memref<9x128xf32, #tpu.memory_space<vmem>>, vector<1x128xf32>
    %72 = vector.shape_cast %71 : vector<1x128xf32> to vector<128xf32>
    %73 = vector.shape_cast %72 : vector<128xf32> to vector<1x1x1x128xf32>
    %74 = vector.broadcast %73 : vector<1x1x1x128xf32> to vector<1x16x16x128xf32>
    %75 = arith.mulf %70, %74 : vector<1x16x16x128xf32>
    %76 = arith.addf %69, %75 : vector<1x16x16x128xf32>
    %c0_18 = arith.constant 0 : index
    %c0_19 = arith.constant 0 : index
    %77 = vector.load %arg6[%c0_18, %c0_19] : memref<1x128xf32, #tpu.memory_space<vmem>>, vector<1x128xf32>
    %78 = vector.shape_cast %77 : vector<1x128xf32> to vector<128xf32>
    %79 = vector.shape_cast %78 : vector<128xf32> to vector<1x1x1x128xf32>
    %80 = vector.broadcast %79 : vector<1x1x1x128xf32> to vector<1x16x16x128xf32>
    %81 = arith.addf %76, %80 : vector<1x16x16x128xf32>
    %82 = vector.shape_cast %81 : vector<1x16x16x128xf32> to vector<256x128xf32>
    %c0_20 = arith.constant 0 : index
    %c0_21 = arith.constant 0 : index
    %83 = vector.load %arg7[%c0_20, %c0_21] : memref<128x128xf32, #tpu.memory_space<vmem>>, vector<128x128xf32>
    %cst_22 = arith.constant dense<0.000000e+00> : vector<256x128xf32>
    %84 = tpu.matmul %82, %83, %cst_22 {dimension_numbers = #tpu.dot_dimension_numbers<[1], [0], [0], [1], [0, 0, 1, 1], [], []>} : vector<256x128xf32>, vector<128x128xf32>, vector<256x128xf32> -> vector<256x128xf32>
    %c0_23 = arith.constant 0 : index
    %c0_24 = arith.constant 0 : index
    %85 = vector.load %arg8[%c0_23, %c0_24] : memref<1x128xf32, #tpu.memory_space<vmem>>, vector<1x128xf32>
    %86 = vector.shape_cast %85 : vector<1x128xf32> to vector<128xf32>
    %87 = vector.shape_cast %86 : vector<128xf32> to vector<1x128xf32>
    %88 = vector.broadcast %87 : vector<1x128xf32> to vector<256x128xf32>
    %89 = arith.addf %84, %88 : vector<256x128xf32>
    %90 = vector.shape_cast %89 : vector<256x128xf32> to vector<1x16x16x128xf32>
    %c0_25 = arith.constant 0 : index
    %c0_26 = arith.constant 0 : index
    %c0_27 = arith.constant 0 : index
    %c0_28 = arith.constant 0 : index
    %91 = vector.load %arg2[%c0_25, %c0_26, %c0_27, %c0_28] : memref<1x16x16x128xf32, #tpu.memory_space<vmem>>, vector<1x16x16x128xf32>
    %92 = arith.addf %90, %91 : vector<1x16x16x128xf32>
    %cst_29 = arith.constant 0.000000e+00 : f32
    %93 = vector.broadcast %cst_29 : f32 to vector<1x16x16x128xf32>
    %94 = arith.maximumf %92, %93 : vector<1x16x16x128xf32>
    %c0_30 = arith.constant 0 : index
    %c0_31 = arith.constant 0 : index
    %c0_32 = arith.constant 0 : index
    %c0_33 = arith.constant 0 : index
    %95 = vector.load %arg9[%c0_30, %c0_31, %c0_32, %c0_33] : memref<1x16x16x128xf32, #tpu.memory_space<vmem>>, vector<1x16x16x128xf32>
    tpu.vector_store %arg9[%c0_30, %c0_31, %c0_32, %c0_33], %94 {strides = array<i32>} : memref<1x16x16x128xf32, #tpu.memory_space<vmem>>, vector<1x16x16x128xf32>,
    return
  }
  func.func @transform_0(%arg0: i32) -> (i32, i32, i32, i32) {
    %c0_i32 = arith.constant 0 : i32
    %c0_i32_0 = arith.constant 0 : i32
    %c0_i32_1 = arith.constant 0 : i32
    %c0_i32_2 = arith.constant 0 : i32
    return %arg0, %c0_i32, %c0_i32_0, %c0_i32_1 : i32, i32, i32, i32
  }
  func.func @transform_1(%arg0: i32) -> (i32, i32, i32, i32) {
    %c0_i32 = arith.constant 0 : i32
    %c0_i32_0 = arith.constant 0 : i32
    %c0_i32_1 = arith.constant 0 : i32
    %c0_i32_2 = arith.constant 0 : i32
    return %arg0, %c0_i32, %c0_i32_0, %c0_i32_1 : i32, i32, i32, i32
  }
  func.func @transform_2(%arg0: i32) -> (i32, i32) {
    %c0_i32 = arith.constant 0 : i32
    %c0_i32_0 = arith.constant 0 : i32
    %c0_i32_1 = arith.constant 0 : i32
    return %c0_i32, %c0_i32_0 : i32, i32
  }
  func.func @transform_3(%arg0: i32) -> (i32, i32) {
    %c0_i32 = arith.constant 0 : i32
    %c0_i32_0 = arith.constant 0 : i32
    %c0_i32_1 = arith.constant 0 : i32
    return %c0_i32, %c0_i32_0 : i32, i32
  }
  func.func @transform_4(%arg0: i32) -> (i32, i32) {
    %c0_i32 = arith.constant 0 : i32
    %c0_i32_0 = arith.constant 0 : i32
    %c0_i32_1 = arith.constant 0 : i32
    return %c0_i32, %c0_i32_0 : i32, i32
  }
  func.func @transform_5(%arg0: i32) -> (i32, i32) {
    %c0_i32 = arith.constant 0 : i32
    %c0_i32_0 = arith.constant 0 : i32
    %c0_i32_1 = arith.constant 0 : i32
    return %c0_i32, %c0_i32_0 : i32, i32
  }
  func.func @transform_6(%arg0: i32) -> (i32, i32) {
    %c0_i32 = arith.constant 0 : i32
    %c0_i32_0 = arith.constant 0 : i32
    %c0_i32_1 = arith.constant 0 : i32
    return %c0_i32, %c0_i32_0 : i32, i32
  }
  func.func @transform_7(%arg0: i32) -> (i32, i32) {
    %c0_i32 = arith.constant 0 : i32
    %c0_i32_0 = arith.constant 0 : i32
    %c0_i32_1 = arith.constant 0 : i32
    return %c0_i32, %c0_i32_0 : i32, i32
  }
  func.func @transform_8(%arg0: i32) -> (i32, i32, i32, i32) {
    %c0_i32 = arith.constant 0 : i32
    %c0_i32_0 = arith.constant 0 : i32
    %c0_i32_1 = arith.constant 0 : i32
    %c0_i32_2 = arith.constant 0 : i32
    return %arg0, %c0_i32, %c0_i32_0, %c0_i32_1 : i32, i32, i32, i32
  }
}

</mosaic_0001>

<bundles_post_ra>
// kernel: tpu_custom_call.1
= control target key start
LH: loop header
LB: loop body
LE: loop exit
PB: predicated region body
PF: predicated region fallthrough
CT: control target
= control target key end

     0   :  { %s6028_s0 = inlined_call_operand.hbm [shape: f32[2,18,32,128], index: 0, kind: input, shape index: {}]   ;;  %s6029_s1 = inlined_call_operand.hbm [shape: f32[2,16,16,128], index: 1, kind: input, shape index: {}]   ;;  %s6030_s2 = inlined_call_operand.hbm [shape: f32[128,128], index: 2, kind: input, shape index: {}]   ;;  %s6031_s3 = inlined_call_operand.vmem [shape: f32[1,128], index: 3, kind: input, shape index: {}]   ;;  %s6032_s4 = inlined_call_operand.hbm [shape: f32[9,128], index: 4, kind: input, shape index: {}]   ;;  %s6033_s5 = inlined_call_operand.vmem [shape: f32[1,128], index: 5, kind: input, shape index: {}]   ;;  %s6034_s6 = inlined_call_operand.hbm [shape: f32[128,128], index: 6, kind: input, shape index: {}]   ;;  %s6035_s7 = inlined_call_operand.vmem [shape: f32[1,128], index: 7, kind: input, shape index: {}]   ;;  %s6036_s8 = inlined_call_operand.hbm [shape: f32[2,16,16,128], index: 8, kind: output, shape index: {}]  }
   0x1   :  { %6083 = sst [smem:[#allocation45_spill]] %s6028_s0 }
   0x2   :  { %6084 = sst [smem:[#allocation46_spill]] %s6030_s2 }
   0x3   :  { %6085 = sst [smem:[#allocation47_spill]] %s6032_s4 }
   0x4   :  { %6086 = sst [smem:[#allocation48_spill]] %s6034_s6 }
   0x5   :  { %13 = vsyncpa [#allocation3], 0 }
   0x6   :  { %15 = vsyncpa [#allocation3 + $0x1], 0 }
   0x7   :  { %16 = vsyncpa [#allocation6], 0 }
   0x8   :  { %18 = vsyncpa [#allocation6 + $0x1], 0 }
   0x9   :  { %19 = vsyncpa [#allocation9], 0 }
   0xa   :  { %20 = vsyncpa [#allocation4], 0 }
   0xb   :  { %22 = vsyncpa [#allocation4 + $0x1], 0  ;;  %s3963_s27 = smov 0   ;;  %s3965_s28 = smov 0  }
   0xc   :  { %s3967_s29 = smov 0   ;;  %s3969_s30 = smov 0  }
   0xd LB: > { %6087 = sst [smem:[#allocation17_spill]] %s3902_s29  ;;  %s3984_s9 = sadd.s32 4294967295, %s3906_s30   ;;  %s3906_s30 = sphi %s3969_s30, %s6242_s30   ;;  %s3902_s29 = sphi %s3967_s29, %s6239_s29   ;;  %s3898_s28 = sphi %s3965_s28, %s6241_s28   ;;  %s3894_s27 = sphi %s3963_s27, %s6240_s27  }
   0xe   : > { %s3163_s10 = sadd.s32 4294967294, %s3906_s30   ;;  %p48_p0 = scmp.ne.s32.totalorder %s3898_s28, %s3894_s27 }
   0xf   : > { %p6037_p1 = scmp.eq.s32.totalorder %s3984_s9, 0  ;;  %p224_p2 = scmp.eq.s32.totalorder %s3984_s9, 1 }
  0x10   : > { %p230_p3 = scmp.eq.s32.totalorder %s3163_s10, 1  ;;  %p3164_p5 = scmp.ge.s32.totalorder %s3906_s30, 1 }
  0x11   : > { %p3993_p4 = por %p6037_p1, %p48_p0  ;;  %p237_p7 = scmp.lt.s32.totalorder %s3906_s30, 3 }
  0x12   : > { %p3998_p6 = por %p230_p3, %p48_p0  ;;  %s3908_s14 = smov [#allocation7]  }
  0x13   : > { %s6088_s11 = scalar_select %p3993_p4, 1, 0 }
  0x14   : > { %s6089_s12 = scalar_select %p3998_p6, 1, 0 }
  0x15   : > { %p4003_p8 = pnand %p3164_p5, %p237_p7  ;;  %s249_s15 = sshll.u32 %s3908_s14, 4  ;;  %s250_s15 = int_to_ptr.vmem [resolvable:$true] %s249_s15 }
  0x16   : > { %s3909_s17 = smov [#allocation8]   ;;  %s3910_s19 = smov [#allocation10]  }
  0x17   : > { %p3607_p9 = pneg %p4003_p8  ;;  %s265_s18 = sshll.u32 %s3909_s17, 4  ;;  %s266_s18 = int_to_ptr.vmem [resolvable:$true] %s265_s18 }
  0x18   : > { %s281_s20 = sshll.u32 %s3910_s19, 4  ;;  %s3707_s21 = scalar_lea.vmem %s250_s15, 2048  ;;  %s282_s20 = int_to_ptr.vmem [resolvable:$true] %s281_s20 }
  0x19   : > { %p4012_p11 = pnand %p3607_p9, %p6037_p1  ;;  %p3708_p13 = scmp.ne.s32.totalorder %s250_s15, %s3707_s21 }
  0x1a   : > { %p3715_p5 = scmp.lt.s32.totalorder %s250_s15, %s250_s15  ;;  %p3716_p7 = scmp.lt.s32.totalorder %s3707_s21, %s3707_s21 }
  0x1b   : > { %p3698_p12 = pneg %p4012_p11 }
  0x1c   : > { %p3717_p9 = por %p3716_p7, %p3715_p5 }
  0x1d   : > { %p3710_p0 = pnand %p3708_p13, %p3698_p12 }
  0x1f   : > { %p3711_p3 = pneg %p3710_p0 }
  0x21   : > { %p3718_p10 = pnand %p3717_p9, %p3711_p3 }
  0x23   : > { %3721 = shalt.err (!%p3718_p10)
}
  0x24   : > { %s6038_s22 = smov 128   ;;  %s6040_s23 = smov 8  }
  0x25   : > { %s6092_s2 = sld [smem:[#allocation46_spill]]  ;;  %s3733_s26 = scalar_lea.vmem %s266_s18, 256 }
  0x26   : > { %p3734_p13 = scmp.ne.s32.totalorder %s266_s18, %s3733_s26  ;;  %p3741_p3 = scmp.lt.s32.totalorder %s266_s18, %s266_s18 }
  0x27   : > { %p3742_p10 = scmp.lt.s32.totalorder %s3733_s26, %s3733_s26 }
  0x28   : > { %p3736_p0 = pnand %p3734_p13, %p3698_p12 }
  0x29   : > { %p3743_p7 = por %p3742_p10, %p3741_p3 }
  0x2a   : > { %p3737_p5 = pneg %p3736_p0 }
  0x2b   : > { %3610 = dma.hbm_to_vmem [thread:$0]  (!%p4012_p11), %s6092_s2, 2048, %s250_s15, [#allocation6], %s6038_s22, %s6038_s22, %s6040_s23  }
  0x2c   : > { %p3744_p9 = pnand %p3743_p7, %p3737_p5 }
  0x2e   : > { %3747 = shalt.err (!%p3744_p9)
}
  0x2f   : > { %s6093_s4 = sld [smem:[#allocation47_spill]]  ;;  %s3759_s15 = scalar_lea.vmem %s282_s20, 2048 }
  0x30   : > { %p3760_p1 = scmp.ne.s32.totalorder %s282_s20, %s3759_s15  ;;  %p3767_p3 = scmp.lt.s32.totalorder %s282_s20, %s282_s20 }
  0x31   : > { %p3768_p5 = scmp.lt.s32.totalorder %s3759_s15, %s3759_s15 }
  0x32   : > { %p3762_p13 = pnand %p3760_p1, %p3698_p12 }
  0x33   : > { %p3769_p10 = por %p3768_p5, %p3767_p3 }
  0x34   : > { %p3763_p0 = pneg %p3762_p13 }
  0x35   : > { %3613 = dma.hbm_to_vmem [thread:$0]  (!%p4012_p11), %s6093_s4, 256, %s266_s18, [#allocation9], %s6038_s22, %s6038_s22, %s6040_s23  }
  0x36   : > { %p3770_p7 = pnand %p3769_p10, %p3763_p0 }
  0x38   : > { %3773 = shalt.err (!%p3770_p7)
}
  0x39   : > { %s6094_s6 = sld [smem:[#allocation48_spill]]  ;;  %s4052_s16 = sadd.s32 1, %s3906_s30  }
  0x3a   : > { %s32_s18 = ssub.s32 %s3906_s30, %s4052_s16  ;;  %s35_s21 = sadd.s32 1, %s3902_s29 }
  0x3b   : > { %p33_p1 = scmp.eq.s32.totalorder %s32_s18, 0  ;;  %p42_p12 = scmp.ne.s32.totalorder %s3902_s29, %s3898_s28 }
  0x3c   : > { %p43_p9 = scmp.eq.s32.totalorder %s3906_s30, 0  ;;  %p3631_p13 = scmp.lt.s32.totalorder %s3906_s30, 2 }
  0x3d   : > { %s4062_s24 = scalar_select %p33_p1, %s3902_s29, %s35_s21  }
  0x3e   : > { %p44_p0 = por %p43_p9, %p42_p12  ;;  %p4066_p3 = por %p224_p2, %p42_p12 }
  0x3f   : > { %3616 = dma.hbm_to_vmem [thread:$0]  (!%p4012_p11), %s6094_s6, 2048, %s282_s20, [#allocation9], %s6038_s22, %s6038_s22, %s6040_s23  }
  0x40   : > { %6095 = sst [smem:[#allocation18_spill]] %s4062_s24  ;;  %s4071_s26 = sand.u32 1, %s3902_s29  }
  0x41   : > { %s6096_s25 = scalar_select %p4066_p3, 1, 0 }
  0x42   : > { %s3587_s20 = smul.u32 9216, %s3906_s30  ;;  %s6097_s0 = sld [smem:[#allocation45_spill]] }
  0x43   : > { %s3586_s10 = smul.u32 576, %s4071_s26  ;;  %p4080_p11 = pnand %p3631_p13, %p44_p0 }
  0x44   : > { %s299_s23 = scalar_lea.sflag [#allocation3], %s4071_s26 }
  0x45   : > { %s302_s21 = scalar_lea.vmem [#allocation2], %s3586_s10  ;;  %p3776_p5 = pneg %p4080_p11 }
  0x46   : > { %s309_s22 = sshll.u32 %s302_s21, 4  ;;  %s4085_s22 = int_to_ptr.vmem [resolvable:$true] %s309_s22 }
  0x48   : > { %s4078_s17 = scalar_lea.hbm %s6097_s0, %s3587_s20  ;;  %s3779_s15 = scalar_lea.hbm %s6097_s0, 18432 }
  0x49   : > { %s3774_s2 = scalar_lea.hbm %s4078_s17, 9216  ;;  %p3780_p1 = scmp.lt.s32.totalorder %s4078_s17, %s6097_s0 }
  0x4a   : > { %p3775_p2 = scmp.ne.s32.totalorder %s4078_s17, %s3774_s2  ;;  %p3781_p12 = scmp.lt.s32.totalorder %s3779_s15, %s3774_s2 }
  0x4c   : > { %p3777_p10 = pnand %p3776_p5, %p3775_p2  ;;  %p3782_p9 = por %p3781_p12, %p3780_p1 }
  0x4e   : > { %p3778_p7 = pneg %p3777_p10 }
  0x50   : > { %p3783_p13 = pnand %p3782_p9, %p3778_p7 }
  0x52   : > { %3786 = shalt.err (!%p3783_p13)
}
  0x53   : > { %s3787_s10 = scalar_lea.vmem %s4085_s22, 9216  ;;  %s3913_s21 = smov [#allocation2]  }
  0x54   : > { %p3788_p0 = scmp.ne.s32.totalorder %s4085_s22, %s3787_s10  ;;  %s3792_s20 = sshll.u32 %s3913_s21, 4  ;;  %s3793_s20 = int_to_ptr.vmem [resolvable:$false] %s3792_s20 }
  0x55   : > { %s3794_s14 = scalar_lea.vmem %s3793_s20, 18432  ;;  %p3795_p6 = scmp.lt.s32.totalorder %s4085_s22, %s3793_s20 }
  0x56   : > { %p3790_p2 = pnand %p3788_p0, %p3776_p5  ;;  %p3796_p3 = scmp.lt.s32.totalorder %s3794_s14, %s3787_s10 }
  0x58   : > { %p3791_p10 = pneg %p3790_p2  ;;  %p3797_p4 = por %p3796_p3, %p3795_p6 }
  0x5a   : > { %p3798_p1 = pnand %p3797_p4, %p3791_p10 }
  0x5c   : > { %3801 = shalt.err (!%p3798_p1)
}
  0x5d   : > { %s6099_s2 = smov 8   ;;  %s6100_s4 = smov 128  }
  0x5e   : > { %3620 = dma.hbm_to_vmem [thread:$0]  (!%p4080_p11), %s4078_s17, 9216, %s4085_s22, %s299_s23, %s6100_s4, %s6100_s4, %s6099_s2  }
  0x5f   : > { %s3170_s6 = sshll.u32 %s4071_s26, 8  ;;  %s3196_s15 = sshll.u32 %s3906_s30, 12 }
  0x60   : > { %s4122_s20 = scalar_lea.hbm %s6029_s1, %s3196_s15  ;;  %s323_s14 = scalar_lea.vmem [#allocation5], %s3170_s6 }
  0x61   : > { %s330_s18 = sshll.u32 %s323_s14, 4  ;;  %s6101_s0 = sand.u32 1, %s3906_s30   ;;  %s4124_s18 = int_to_ptr.vmem [resolvable:$true] %s330_s18 }
  0x62   : > { %s320_s24 = scalar_lea.sflag [#allocation6], %s6101_s0  ;;  %s3802_s29 = scalar_lea.hbm %s4122_s20, 4096 }
  0x63   : > { %p3803_p4 = scmp.ne.s32.totalorder %s4122_s20, %s3802_s29  ;;  %s3807_s26 = scalar_lea.hbm %s6029_s1, 8192 }
  0x64   : > { %p3808_p7 = scmp.lt.s32.totalorder %s4122_s20, %s6029_s1  ;;  %p3809_p12 = scmp.lt.s32.totalorder %s3807_s26, %s3802_s29 }
  0x65   : > { %p3805_p6 = pnand %p3803_p4, %p3776_p5 }
  0x66   : > { %p3810_p9 = por %p3809_p12, %p3808_p7 }
  0x67   : > { %p3806_p3 = pneg %p3805_p6 }
  0x69   : > { %p3811_p13 = pnand %p3810_p9, %p3806_p3 }
  0x6b   : > { %3814 = shalt.err (!%p3811_p13)
}
  0x6c   : > { %s3815_s0 = scalar_lea.vmem %s4124_s18, 4096  ;;  %s3914_s6 = smov [#allocation5]  }
  0x6d   : > { %p3816_p0 = scmp.ne.s32.totalorder %s4124_s18, %s3815_s0  ;;  %s3820_s10 = sshll.u32 %s3914_s6, 4  ;;  %s3821_s10 = int_to_ptr.vmem [resolvable:$false] %s3820_s10 }
  0x6e   : > { %s3822_s21 = scalar_lea.vmem %s3821_s10, 8192  ;;  %p3823_p1 = scmp.lt.s32.totalorder %s4124_s18, %s3821_s10 }
  0x6f   : > { %p3818_p2 = pnand %p3816_p0, %p3776_p5  ;;  %p3824_p4 = scmp.lt.s32.totalorder %s3822_s21, %s3815_s0 }
  0x71   : > { %p3819_p10 = pneg %p3818_p2  ;;  %p3825_p6 = por %p3824_p4, %p3823_p1 }
  0x73   : > { %p3826_p7 = pnand %p3825_p6, %p3819_p10 }
  0x75   : > { %3829 = shalt.err (!%p3826_p7)
}
  0x76   : > { %3623 = dma.hbm_to_vmem [thread:$0]  (!%p4080_p11), %s4122_s20, 4096, %s4124_s18, %s320_s24, %s6100_s4, %s6100_s4, %s6099_s2  }
  0x77   : > { %342 = sbr.rel (%p4003_p8) target bundleno = 914 (0x392), region = 52 }
  0x7c   : > { %s4156_s29 = sand.u32 1, %s3898_s28   ;;  %p6102_p5 = scmp.ne.s32.totalorder %s6088_s11, 0 }
  0x7d   : > { %s3588_s14 = smul.u32 576, %s4156_s29  ;;  %s345_s22 = scalar_lea.sflag [#allocation3], %s4156_s29 }
  0x7f   : > { %s4160_s23 = scalar_lea.vmem [#allocation2], %s3588_s14 }
  0x80   : > { %3873 = dma.done.wait (%p6102_p5), %s345_s22, 9216  }
  0x81   : > { %3875 = vsyncadd (%p6102_p5), %s345_s22, 4294958080  ;;  %s353_s13 = sand.u32 1, %s3984_s9   ;;  %s3174_s24 = sshll.u32 %s4156_s29, 8 }
  0x82   : > { %s354_s19 = scalar_lea.sflag [#allocation6], %s353_s13  ;;  %s4170_s18 = scalar_lea.vmem [#allocation5], %s3174_s24 }
  0x83   : > { %3877 = dma.done.wait (%p6102_p5), %s354_s19, 4096  }
  0x84   : > { %3879 = vsyncadd (%p6102_p5), %s354_s19, 4294963200  ;;  %p6103_p8 = scmp.eq.s32.totalorder %s3984_s9, 0 }
  0x86   : > { %3881 = dma.done.wait (%p6103_p8), [#allocation6], 2048   ;;  %p6104_p11 = pmov %p6103_p8 }
  0x87   : > { %p6105_p3 = pmov %p6103_p8 }
  0x88   : > { %3883 = vsyncadd (%p6104_p11), [#allocation6], 4294965248 }
  0x89   : > { %3885 = dma.done.wait (%p6105_p3), [#allocation9], 2304   ;;  %p6106_p12 = pmov %p6105_p3 }
  0x8a   : > { %v494_v0 = vld [vmem:[#allocation7 + $0x78] sm:$0xff]  ;;  %v493_v1 = vld [vmem:[#allocation7 + $0x70] sm:$0xff]  ;;  %v492_v2 = vld [vmem:[#allocation7 + $0x68] sm:$0xff]  ;;  %vm1101_vm0 = vcmask 1046528   ;;  %vm1347_vm1 = vcmask 1045504   ;;  %s5891_s22 = scalar_lea.vmem [#allocation11], %s3174_s24 }
  0x8b   : > { %3887 = vsyncadd (%p6106_p12), [#allocation9], 4294964992  ;;  %3334 = vmatprep.subr.mxu0 %v494_v0  ;;  %3554 = vmatprep.subr.mxu1 %v494_v0  ;;  %v491_v3 = vld [vmem:[#allocation7 + $0x60] sm:$0xff]  ;;  %v490_v5 = vld [vmem:[#allocation7 + $0x58] sm:$0xff]  ;;  %s3039_s13 = sshll.u32 %s5891_s22, 4  ;;  %p6235_p13 = scmp.ne.s32.totalorder %s6096_s25, 0  ;;  %s5983_s13 = int_to_ptr.vmem [resolvable:$true] %s3039_s13 }
  0x8c   : > { %3335 = vmatpush3.msra.mxu0 %v494_v0  ;;  %3570 = vmatpush3.msra.mxu1 %v494_v0  ;;  %v407_v4 = vld [vmem:[%s4160_s23] sm:$0xff]  ;;  %v489_v6 = vld [vmem:[#allocation7 + $0x50] sm:$0xff]  ;;  %v488_v7 = vld [vmem:[#allocation7 + $0x48] sm:$0xff]  ;;  %s3830_s2 = scalar_lea.vmem %s5983_s13, 4096 }
  0x8d   : > { %3336 = vmatprep.subr.mxu0 %v493_v1  ;;  %3555 = vmatprep.subr.mxu1 %v493_v1  ;;  %v487_v8 = vld [vmem:[#allocation7 + $0x40] sm:$0xff]  ;;  %v486_v9 = vld [vmem:[#allocation7 + $0x38] sm:$0xff]  ;;  %v485_v10 = vld [vmem:[#allocation7 + $0x30] sm:$0xff]  ;;  %p3831_p9 = scmp.ne.s32.totalorder %s5983_s13, %s3830_s2 }
  0x8e   : > { %3337 = vmatpush3.msra.mxu0 %v493_v1  ;;  %3571 = vmatpush3.msra.mxu1 %v493_v1  ;;  %v484_v11 = vld [vmem:[#allocation7 + $0x28] sm:$0xff]  ;;  %v483_v12 = vld [vmem:[#allocation7 + $0x20] sm:$0xff]  ;;  %v482_v13 = vld [vmem:[#allocation7 + $0x18] sm:$0xff] }
  0x8f   : > { %3338 = vmatprep.subr.mxu0 %v492_v2  ;;  %3556 = vmatprep.subr.mxu1 %v492_v2  ;;  %v481_v14 = vld [vmem:[#allocation7 + $0x10] sm:$0xff]  ;;  %v480_v15 = vld [vmem:[#allocation7 + $0x8] sm:$0xff]  ;;  %v479_v16 = vld [vmem:[#allocation7] sm:$0xff]  ;;  %p3832_p0 = pnand %p3831_p9, %p6235_p13 }
  0x90   : > { %3339 = vmatpush3.msra.mxu0 %v492_v2  ;;  %3366 = vmatprep.mubr.f32.mxu0 %v407_v4  ;;  %v408_v17 = vld [vmem:[%s4160_s23 + $0x8] sm:$0xff]  ;;  %v409_v18 = vld [vmem:[%s4160_s23 + $0x10] sm:$0xff]  ;;  %v459_v19 = vld [vmem:[%s4160_s23 + $0x1a0] sm:$0xff] }
  0x91   : > { %3340 = vmatprep.subr.mxu0 %v491_v3  ;;  %3572 = vmatpush3.msra.mxu1 %v492_v2  ;;  %v460_v20 = vld [vmem:[%s4160_s23 + $0x1a8] sm:$0xff]  ;;  %v461_v21 = vld [vmem:[%s4160_s23 + $0x1b0] sm:$0xff]  ;;  %v410_v22 = vld [vmem:[%s4160_s23 + $0x18] sm:$0xff]  ;;  %p3833_p2 = pneg %p3832_p0 }
  0x92   : > { %3341 = vmatpush3.msra.mxu0 %v491_v3  ;;  %3557 = vmatprep.subr.mxu1 %v491_v3  ;;  %v411_v23 = vld [vmem:[%s4160_s23 + $0x20] sm:$0xff]  ;;  %v462_v24 = vld [vmem:[%s4160_s23 + $0x1b8] sm:$0xff]  ;;  %v412_v26 = vld [vmem:[%s4160_s23 + $0x28] sm:$0xff] }
  0x93   : > { %3342 = vmatprep.subr.mxu0 %v490_v5  ;;  %3573 = vmatpush3.msra.mxu1 %v491_v3  ;;  %v463_v25 = vld [vmem:[%s4160_s23 + $0x1c0] sm:$0xff]  ;;  %v413_v27 = vld [vmem:[%s4160_s23 + $0x30] sm:$0xff]  ;;  %v464_v28 = vld [vmem:[%s4160_s23 + $0x1c8] sm:$0xff] }
  0x94   : > { %3343 = vmatpush3.msra.mxu0 %v490_v5  ;;  %3558 = vmatprep.subr.mxu1 %v490_v5  ;;  %v465_v29 = vld [vmem:[%s4160_s23 + $0x1d0] sm:$0xff]  ;;  %v414_v30 = vld [vmem:[%s4160_s23 + $0x38] sm:$0xff]  ;;  %v415_v31 = vld [vmem:[%s4160_s23 + $0x40] sm:$0xff] }
  0x95   : > { %3344 = vmatprep.subr.mxu0 %v489_v6  ;;  %3574 = vmatpush3.msra.mxu1 %v490_v5  ;;  %v466_v32 = vld [vmem:[%s4160_s23 + $0x1d8] sm:$0xff]  ;;  %v467_v33 = vld [vmem:[%s4160_s23 + $0x1e0] sm:$0xff]  ;;  %v416_v34 = vld [vmem:[%s4160_s23 + $0x48] sm:$0xff] }
  0x96   : > { %3345 = vmatpush3.msra.mxu0 %v489_v6  ;;  %3559 = vmatprep.subr.mxu1 %v489_v6  ;;  %v417_v35 = vld [vmem:[%s4160_s23 + $0x50] sm:$0xff]  ;;  %v468_v36 = vld [vmem:[%s4160_s23 + $0x1e8] sm:$0xff]  ;;  %v418_v38 = vld [vmem:[%s4160_s23 + $0x58] sm:$0xff] }
  0x97   : > { %3346 = vmatprep.subr.mxu0 %v488_v7  ;;  %3575 = vmatpush3.msra.mxu1 %v489_v6  ;;  %v469_v37 = vld [vmem:[%s4160_s23 + $0x1f0] sm:$0xff]  ;;  %v419_v39 = vld [vmem:[%s4160_s23 + $0x60] sm:$0xff]  ;;  %v470_v40 = vld [vmem:[%s4160_s23 + $0x1f8] sm:$0xff] }
  0x98   : > { %3347 = vmatpush3.msra.mxu0 %v488_v7  ;;  %3560 = vmatprep.subr.mxu1 %v488_v7  ;;  %v471_v41 = vld [vmem:[%s4160_s23 + $0x200] sm:$0xff]  ;;  %v420_v42 = vld [vmem:[%s4160_s23 + $0x68] sm:$0xff]  ;;  %v421_v43 = vld [vmem:[%s4160_s23 + $0x70] sm:$0xff] }
  0x99   : > { %3348 = vmatprep.subr.mxu0 %v487_v8  ;;  %3576 = vmatpush3.msra.mxu1 %v488_v7  ;;  %v472_v44 = vld [vmem:[%s4160_s23 + $0x208] sm:$0xff]  ;;  %v473_v45 = vld [vmem:[%s4160_s23 + $0x210] sm:$0xff]  ;;  %v422_v46 = vld [vmem:[%s4160_s23 + $0x78] sm:$0xff] }
  0x9a   : > { %3349 = vmatpush3.msra.mxu0 %v487_v8  ;;  %3561 = vmatprep.subr.mxu1 %v487_v8  ;;  %v423_v47 = vld [vmem:[%s4160_s23 + $0x80] sm:$0xff]  ;;  %v474_v48 = vld [vmem:[%s4160_s23 + $0x218] sm:$0xff]  ;;  %v424_v50 = vld [vmem:[%s4160_s23 + $0x88] sm:$0xff] }
  0x9b   : > { %3350 = vmatprep.subr.mxu0 %v486_v9  ;;  %3577 = vmatpush3.msra.mxu1 %v487_v8  ;;  %v475_v49 = vld [vmem:[%s4160_s23 + $0x220] sm:$0xff]  ;;  %v425_v51 = vld [vmem:[%s4160_s23 + $0x90] sm:$0xff]  ;;  %v476_v52 = vld [vmem:[%s4160_s23 + $0x228] sm:$0xff] }
  0x9c   : > { %3351 = vmatpush3.msra.mxu0 %v486_v9  ;;  %3562 = vmatprep.subr.mxu1 %v486_v9  ;;  %v477_v53 = vld [vmem:[%s4160_s23 + $0x230] sm:$0xff]  ;;  %v426_v54 = vld [vmem:[%s4160_s23 + $0x98] sm:$0xff]  ;;  %v427_v55 = vld [vmem:[%s4160_s23 + $0xa0] sm:$0xff] }
  0x9d   : > { %3352 = vmatprep.subr.mxu0 %v485_v10  ;;  %3578 = vmatpush3.msra.mxu1 %v486_v9  ;;  %v478_v56 = vld [vmem:[%s4160_s23 + $0x238] sm:$0xff]  ;;  %v428_v57 = vld [vmem:[%s4160_s23 + $0xa8] sm:$0xff]  ;;  %v429_v58 = vld [vmem:[%s4160_s23 + $0xb0] sm:$0xff] }
  0x9e   : > { %3353 = vmatpush3.msra.mxu0 %v485_v10  ;;  %3563 = vmatprep.subr.mxu1 %v485_v10  ;;  %v430_v59 = vld [vmem:[%s4160_s23 + $0xb8] sm:$0xff]  ;;  %v431_v60 = vld [vmem:[%s4160_s23 + $0xc0] sm:$0xff]  ;;  %v432_v61 = vld [vmem:[%s4160_s23 + $0xc8] sm:$0xff] }
  0x9f   : > { %3354 = vmatprep.subr.mxu0 %v484_v11  ;;  %3579 = vmatpush3.msra.mxu1 %v485_v10  ;;  %v433_v62 = vld [vmem:[%s4160_s23 + $0xd0] sm:$0xff]  ;;  %v434_v63 = vld [vmem:[%s4160_s23 + $0xd8] sm:$0xff]  ;;  %v435_v0 = vld [vmem:[%s4160_s23 + $0xe0] sm:$0xff] }
  0xa0   : > { %3355 = vmatpush3.msra.mxu0 %v484_v11  ;;  %3564 = vmatprep.subr.mxu1 %v484_v11  ;;  %v436_v1 = vld [vmem:[%s4160_s23 + $0xe8] sm:$0xff]  ;;  %v437_v2 = vld [vmem:[%s4160_s23 + $0xf0] sm:$0xff]  ;;  %v438_v3 = vld [vmem:[%s4160_s23 + $0xf8] sm:$0xff] }
  0xa1   : > { %3356 = vmatprep.subr.mxu0 %v483_v12  ;;  %3580 = vmatpush3.msra.mxu1 %v484_v11  ;;  %v439_v4 = vld [vmem:[%s4160_s23 + $0x100] sm:$0xff]  ;;  %v440_v5 = vld [vmem:[%s4160_s23 + $0x108] sm:$0xff]  ;;  %v441_v6 = vld [vmem:[%s4160_s23 + $0x110] sm:$0xff] }
  0xa2   : > { %3357 = vmatpush3.msra.mxu0 %v483_v12  ;;  %3565 = vmatprep.subr.mxu1 %v483_v12  ;;  %v442_v7 = vld [vmem:[%s4160_s23 + $0x118] sm:$0xff]  ;;  %v443_v8 = vld [vmem:[%s4160_s23 + $0x120] sm:$0xff]  ;;  %v444_v9 = vld [vmem:[%s4160_s23 + $0x128] sm:$0xff] }
  0xa3   : > { %3358 = vmatprep.subr.mxu0 %v482_v13  ;;  %3581 = vmatpush3.msra.mxu1 %v483_v12  ;;  %v445_v10 = vld [vmem:[%s4160_s23 + $0x130] sm:$0xff]  ;;  %v2664_v11 = vld [vmem:[#allocation10 + $0x78] sm:$0xff]  ;;  %v2663_v12 = vld [vmem:[#allocation10 + $0x70] sm:$0xff] }
  0xa4   : > { %3359 = vmatpush3.msra.mxu0 %v482_v13  ;;  %3566 = vmatprep.subr.mxu1 %v482_v13 }
  0xa5   : > { %3360 = vmatprep.subr.mxu0 %v481_v14  ;;  %3582 = vmatpush3.msra.mxu1 %v482_v13  ;;  %v446_v13 = vld [vmem:[%s4160_s23 + $0x138] sm:$0xff] }
  0xa6   : > { %3361 = vmatpush3.msra.mxu0 %v481_v14  ;;  %3567 = vmatprep.subr.mxu1 %v481_v14 }
  0xa7   : > { %3362 = vmatprep.subr.mxu0 %v480_v15  ;;  %3583 = vmatpush3.msra.mxu1 %v481_v14  ;;  %v447_v14 = vld [vmem:[%s4160_s23 + $0x140] sm:$0xff] }
  0xa8   : > { %3363 = vmatpush3.msra.mxu0 %v480_v15  ;;  %3568 = vmatprep.subr.mxu1 %v480_v15 }
  0xa9   : > { %3364 = vmatprep.subr.mxu0 %v479_v16  ;;  %3584 = vmatpush3.msra.mxu1 %v480_v15  ;;  %v2662_v15 = vld [vmem:[#allocation10 + $0x68] sm:$0xff] }
  0xaa   : > { %3365 = vmatpush3.msra.mxu0 %v479_v16  ;;  %3569 = vmatprep.subr.mxu1 %v479_v16 }
  0xab   : > { %3367 = vmatmul.mubr.f32.vlgmr.msra.gmra.mxu0 %v408_v17  ;;  %3585 = vmatpush3.msra.mxu1 %v479_v16  ;;  %v2661_v16 = vld [vmem:[#allocation10 + $0x60] sm:$0xff]  ;;  %v448_v17 = vld [vmem:[%s4160_s23 + $0x148] sm:$0xff] }
  0xac   : > { %3369 = vmatprep.mubr.f32.mxu0 %v409_v18  ;;  %3444 = vmatprep.mubr.f32.mxu1 %v459_v19  ;;  %v449_v18 = vld [vmem:[%s4160_s23 + $0x150] sm:$0xff]  ;;  %v450_v19 = vld [vmem:[%s4160_s23 + $0x158] sm:$0xff] }
  0xad   : > { %3445 = vmatmul.mubr.f32.vlgmr.msra.gmra.mxu1 %v460_v20  ;;  %3474 = vmatprep.subr.mxu1 %v2664_v11  ;;  %v451_v20 = vld [vmem:[%s4160_s23 + $0x160] sm:$0xff] }
  0xae   : > { %3447 = vmatprep.mubr.f32.mxu1 %v461_v21  ;;  %3475 = vmatpush3.msra.mxu1 %v2664_v11  ;;  %v2660_v21 = vld [vmem:[#allocation10 + $0x58] sm:$0xff] }
  0xaf   : > { %3370 = vmatmul.mubr.f32.gmra.mxu0 %v410_v22  ;;  %3476 = vmatprep.subr.mxu1 %v2663_v12  ;;  %v452_v22 = vld [vmem:[%s4160_s23 + $0x168] sm:$0xff] }
  0xb0   : > { %3372 = vmatprep.mubr.f32.mxu0 %v411_v23  ;;  %3477 = vmatpush3.msra.mxu1 %v2663_v12  ;;  %v2659_v23 = vld [vmem:[#allocation10 + $0x50] sm:$0xff] }
  0xb1   : > { %3448 = vmatmul.mubr.f32.gmra.mxu1 %v462_v24  ;;  %3478 = vmatprep.subr.mxu1 %v2662_v15  ;;  %v453_v24 = vld [vmem:[%s4160_s23 + $0x170] sm:$0xff] }
  0xb2   : > { %3450 = vmatprep.mubr.f32.mxu1 %v463_v25  ;;  %3479 = vmatpush3.msra.mxu1 %v2662_v15  ;;  %v2658_v25 = vld [vmem:[#allocation10 + $0x48] sm:$0xff] }
  0xb3   : > { %3373 = vmatmul.mubr.f32.gmra.mxu0 %v412_v26  ;;  %3480 = vmatprep.subr.mxu1 %v2661_v16  ;;  %v454_v26 = vld [vmem:[%s4160_s23 + $0x178] sm:$0xff] }
  0xb4   : > { %3375 = vmatprep.mubr.f32.mxu0 %v413_v27  ;;  %3481 = vmatpush3.msra.mxu1 %v2661_v16  ;;  %v2657_v27 = vld [vmem:[#allocation10 + $0x40] sm:$0xff] }
  0xb5   : > { %3451 = vmatmul.mubr.f32.gmra.mxu1 %v464_v28  ;;  %3482 = vmatprep.subr.mxu1 %v2660_v21  ;;  %v455_v28 = vld [vmem:[%s4160_s23 + $0x180] sm:$0xff] }
  0xb6   : > { %3453 = vmatprep.mubr.f32.mxu1 %v465_v29  ;;  %3483 = vmatpush3.msra.mxu1 %v2660_v21  ;;  %v2656_v29 = vld [vmem:[#allocation10 + $0x38] sm:$0xff] }
  0xb7   : > { %3376 = vmatmul.mubr.f32.gmra.mxu0 %v414_v30  ;;  %3484 = vmatprep.subr.mxu1 %v2659_v23  ;;  %v456_v30 = vld [vmem:[%s4160_s23 + $0x188] sm:$0xff] }
  0xb8   : > { %3378 = vmatprep.mubr.f32.mxu0 %v415_v31  ;;  %3485 = vmatpush3.msra.mxu1 %v2659_v23  ;;  %v2655_v31 = vld [vmem:[#allocation10 + $0x30] sm:$0xff] }
  0xb9   : > { %3454 = vmatmul.mubr.f32.gmra.mxu1 %v466_v32  ;;  %3486 = vmatprep.subr.mxu1 %v2658_v25  ;;  %v457_v32 = vld [vmem:[%s4160_s23 + $0x190] sm:$0xff] }
  0xba   : > { %3456 = vmatprep.mubr.f32.mxu1 %v467_v33  ;;  %3487 = vmatpush3.msra.mxu1 %v2658_v25  ;;  %v2654_v33 = vld [vmem:[#allocation10 + $0x28] sm:$0xff] }
  0xbb   : > { %3379 = vmatmul.mubr.f32.gmra.mxu0 %v416_v34  ;;  %3488 = vmatprep.subr.mxu1 %v2657_v27  ;;  %v2653_v34 = vld [vmem:[#allocation10 + $0x20] sm:$0xff] }
  0xbc   : > { %3381 = vmatprep.mubr.f32.mxu0 %v417_v35  ;;  %3489 = vmatpush3.msra.mxu1 %v2657_v27  ;;  %v458_v35 = vld [vmem:[%s4160_s23 + $0x198] sm:$0xff]  ;;  %s3197_s23 = sshll.u32 %s3984_s9, 12  ;;  %s3915_s9 = smov [#allocation11]  }
  0xbd   : > { %3457 = vmatmul.mubr.f32.gmra.mxu1 %v468_v36  ;;  %3490 = vmatprep.subr.mxu1 %v2656_v29  ;;  %v2652_v36 = vld [vmem:[#allocation10 + $0x18] sm:$0xff]  ;;  %s5981_s11 = scalar_lea.hbm %s6036_s8, %s3197_s23  ;;  %s3834_s4 = sshll.u32 %s3915_s9, 4  ;;  %s3835_s4 = int_to_ptr.vmem [resolvable:$false] %s3834_s4 }
  0xbe   : > { %3459 = vmatprep.mubr.f32.mxu1 %v469_v37  ;;  %3491 = vmatpush3.msra.mxu1 %v2656_v29  ;;  %v2651_v37 = vld [vmem:[#allocation10 + $0x10] sm:$0xff]  ;;  %s3836_s20 = scalar_lea.vmem %s3835_s4, 8192  ;;  %p3837_p10 = scmp.lt.s32.totalorder %s5983_s13, %s3835_s4 }
  0xbf   : > { %3382 = vmatmul.mubr.f32.gmra.mxu0 %v418_v38  ;;  %3492 = vmatprep.subr.mxu1 %v2655_v31  ;;  %v2650_v38 = vld [vmem:[#allocation10 + $0x8] sm:$0xff]  ;;  %p3838_p1 = scmp.lt.s32.totalorder %s3836_s20, %s3830_s2 }
  0xc0   : > { %3384 = vmatprep.mubr.f32.mxu0 %v419_v39  ;;  %3493 = vmatpush3.msra.mxu1 %v2655_v31  ;;  %v2649_v39 = vld [vmem:[#allocation10] sm:$0xff] }
  0xc1   : > { %3460 = vmatmul.mubr.f32.gmra.mxu1 %v470_v40  ;;  %3494 = vmatprep.subr.mxu1 %v2654_v33  ;;  %v4259_v40 = vld [vmem:[%s6031_s3] ss:$0 sm:$0xff]  ;;  %p3839_p4 = por %p3838_p1, %p3837_p10 }
  0xc2   : > { %3462 = vmatprep.mubr.f32.mxu1 %v471_v41  ;;  %3495 = vmatpush3.msra.mxu1 %v2654_v33 }
  0xc3   : > { %3385 = vmatmul.mubr.f32.gmra.mxu0 %v420_v42  ;;  %3496 = vmatprep.subr.mxu1 %v2653_v34  ;;  %p3840_p6 = pnand %p3839_p4, %p3833_p2 }
  0xc4   : > { %3387 = vmatprep.mubr.f32.mxu0 %v421_v43  ;;  %3497 = vmatpush3.msra.mxu1 %v2653_v34  ;;  %v4262_v43 = vld [vmem:[#allocation8 + $0x1] ss:$0 sm:$0xff] }
  0xc5   : > { %3463 = vmatmul.mubr.f32.gmra.mxu1 %v472_v44  ;;  %3498 = vmatprep.subr.mxu1 %v2652_v36 }
  0xc6   : > { %3465 = vmatprep.mubr.f32.mxu1 %v473_v45  ;;  %3499 = vmatpush3.msra.mxu1 %v2652_v36 }
  0xc7   : > { %3388 = vmatmul.mubr.f32.gmra.mxu0 %v422_v46  ;;  %3500 = vmatprep.subr.mxu1 %v2651_v37 }
  0xc8   : > { %3390 = vmatprep.mubr.f32.mxu0 %v423_v47  ;;  %3501 = vmatpush3.msra.mxu1 %v2651_v37 }
  0xc9   : > { %3466 = vmatmul.mubr.f32.gmra.mxu1 %v474_v48  ;;  %3502 = vmatprep.subr.mxu1 %v2650_v38 }
  0xca   : > { %3468 = vmatprep.mubr.f32.mxu1 %v475_v49  ;;  %3503 = vmatpush3.msra.mxu1 %v2650_v38  ;;  %v4266_v49 = vld [vmem:[#allocation8 + $0x2] ss:$0 sm:$0xff] }
  0xcb   : > { %3391 = vmatmul.mubr.f32.gmra.mxu0 %v424_v50  ;;  %3504 = vmatprep.subr.mxu1 %v2649_v39 }
  0xcc   : > { %3393 = vmatprep.mubr.f32.mxu0 %v425_v51  ;;  %3505 = vmatpush3.msra.mxu1 %v2649_v39 }
  0xcd   : > { %3469 = vmatmul.mubr.f32.gmra.mxu1 %v476_v52 }
  0xce   : > { %3471 = vmatprep.mubr.f32.mxu1 %v477_v53 }
  0xcf   : > { %3394 = vmatmul.mubr.f32.gmra.mxu0 %v426_v54 }
  0xd0   : > { %3396 = vmatprep.mubr.f32.mxu0 %v427_v55 }
  0xd1   : > { %3472 = vmatmul.mubr.f32.gmra.mxu1 %v478_v56 }
  0xd3   : > { %3397 = vmatmul.mubr.f32.gmra.mxu0 %v428_v57  ;;  %v4272_v57 = vld [vmem:[#allocation8] ss:$0 sm:$0xff] }
  0xd4   : > { %3399 = vmatprep.mubr.f32.mxu0 %v429_v58 }
  0xd7   : > { %3400 = vmatmul.mubr.f32.gmra.mxu0 %v430_v59 }
  0xd8   : > { %3402 = vmatprep.mubr.f32.mxu0 %v431_v60 }
  0xdb   : > { %3403 = vmatmul.mubr.f32.gmra.mxu0 %v432_v61 }
  0xdc   : > { %3405 = vmatprep.mubr.f32.mxu0 %v433_v62 }
  0xdf   : > { %3406 = vmatmul.mubr.f32.gmra.mxu0 %v434_v63 }
  0xe0   : > { %3408 = vmatprep.mubr.f32.mxu0 %v435_v0 }
  0xe3   : > { %3409 = vmatmul.mubr.f32.gmra.mxu0 %v436_v1 }
  0xe4   : > { %3411 = vmatprep.mubr.f32.mxu0 %v437_v2 }
  0xe7   : > { %3412 = vmatmul.mubr.f32.gmra.mxu0 %v438_v3 }
  0xe8   : > { %3414 = vmatprep.mubr.f32.mxu0 %v439_v4 }
  0xeb   : > { %3415 = vmatmul.mubr.f32.gmra.mxu0 %v440_v5 }
  0xec   : > { %3417 = vmatprep.mubr.f32.mxu0 %v441_v6 }
  0xef   : > { %3418 = vmatmul.mubr.f32.gmra.mxu0 %v442_v7 }
  0xf0   : > { %3420 = vmatprep.mubr.f32.mxu0 %v443_v8 }
  0xf3   : > { %3421 = vmatmul.mubr.f32.gmra.mxu0 %v444_v9 }
  0xf4   : > { %3423 = vmatprep.mubr.f32.mxu0 %v445_v10 }
  0xf7   : > { %3424 = vmatmul.mubr.f32.gmra.mxu0 %v446_v13  ;;  %v4283_v13 = vld [vmem:[#allocation8 + $0x3] ss:$0 sm:$0xff] }
  0xf8   : > { %3426 = vmatprep.mubr.f32.mxu0 %v447_v14 }
  0xfb   : > { %3427 = vmatmul.mubr.f32.gmra.mxu0 %v448_v17 }
  0xfc   : > { %3429 = vmatprep.mubr.f32.mxu0 %v449_v18  ;;  %v4289_v18 = vld [vmem:[#allocation8 + $0x4] ss:$0 sm:$0xff] }
  0xff   : > { %3430 = vmatmul.mubr.f32.gmra.mxu0 %v450_v19 }
 0x100   : > { %3432 = vmatprep.mubr.f32.mxu0 %v451_v20 }
 0x103   : > { %3433 = vmatmul.mubr.f32.gmra.mxu0 %v452_v22 }
 0x104   : > { %3435 = vmatprep.mubr.f32.mxu0 %v453_v24 }
 0x107   : > { %3436 = vmatmul.mubr.f32.gmra.mxu0 %v454_v26 }
 0x108   : > { %3438 = vmatprep.mubr.f32.mxu0 %v455_v28 }
 0x10b   : > { %3439 = vmatmul.mubr.f32.gmra.mxu0 %v456_v30 }
 0x10c   : > { %3441 = vmatprep.mubr.f32.mxu0 %v457_v32 }
 0x10f   : > { %3442 = vmatmul.mubr.f32.gmra.mxu0 %v458_v35  ;;  %v4312_v35 = vld [vmem:[#allocation8 + $0x5] ss:$0 sm:$0xff] }
 0x16b   : > { %v3368_v41 = vpop.f32.mrf.mxu0 }
 0x16c   : > { %v574_v42 = vadd.f32 %v3368_v41, %v4259_v40 }
 0x16d   : > { %v568_v44 = vpop.f32.mrf.mxu0  ;;  %v3446_v1 = vpop.f32.mrf.mxu1 }
 0x16e   : > { %v910_v45 = vmax.f32 %v574_v42, 0.0  ;;  %v569_v46 = vadd.f32 %v4259_v40, %v568_v44  ;;  %v4286_v14 = vadd.f32 %v3446_v1, %v4259_v40 }
 0x16f   : > { %v3371_v47 = vpop.f32.mrf.mxu0  ;;  %v4280_v10 = vpop.f32.mrf.mxu1 }
 0x170   : > { %v1006_v48 = vmul.f32 %v4262_v43, %v910_v45  ;;  %v909_v50 = vmax.f32 %v569_v46, 0.0  ;;  %v1252_v53 = vmul.f32 %v4266_v49, %v910_v45  ;;  %v969_v11 = vmul.f32 %v4272_v57, %v910_v45  ;;  %6107 = vst [vmem:[#allocation19_spill] sm:$0xff] %v4286_v14 }
 0x171   : > { %v578_v51 = vpop.f32.mrf.mxu0  ;;  %v3449_v21 = vpop.f32.mrf.mxu1 }
 0x172   : > { %v1005_v52 = vmul.f32 %v4262_v43, %v909_v50  ;;  %v1251_v54 = vmul.f32 %v4266_v49, %v909_v50  ;;  %v579_v55 = vadd.f32 %v4259_v40, %v578_v51  ;;  %v1103_v58 = vrot.slane %v1006_v48, 1 }
 0x173   : > { %v3374_v56 = vpop.f32.mrf.mxu0  ;;  %v968_v61 = vmul.f32 %v4272_v57, %v909_v50  ;;  %v1349_v5 = vrot.slane %v1252_v53, 2 }
 0x174   : > { %v1102_v59 = vrot.slane %v1005_v52, 1  ;;  %v593_v60 = vadd.f32 %v3374_v56, %v4259_v40  ;;  %v1348_v62 = vrot.slane %v1251_v54, 2  ;;  %v911_v63 = vmax.f32 %v579_v55, 0.0 }
 0x175   : > { %v587_v0 = vpop.f32.mrf.mxu0 }
 0x176   : > { %v1104_v2 = vsel %vm1101_vm0, %v1102_v59, %v1103_v58  ;;  %v913_v3 = vmax.f32 %v593_v60, 0.0  ;;  %v588_v4 = vadd.f32 %v4259_v40, %v587_v0  ;;  %v1007_v7 = vmul.f32 %v4262_v43, %v911_v63 }
 0x177   : > { %v1214_v6 = vadd.f32 %v1104_v2, %v968_v61  ;;  %v1253_v8 = vmul.f32 %v4266_v49, %v911_v63  ;;  %v3377_v9 = vpop.f32.mrf.mxu0  ;;  %v1350_v15 = vsel %vm1347_vm1, %v1348_v62, %v1349_v5 }
 0x178   : > { %v912_v12 = vmax.f32 %v588_v4, 0.0  ;;  %v1105_v16 = vrot.slane %v1007_v7, 1  ;;  %v4292_v20 = vmul.f32 %v4262_v43, %v913_v3  ;;  %v971_v24 = vmul.f32 %v4272_v57, %v913_v3 }
 0x179   : > { %v1351_v17 = vrot.slane %v1253_v8, 2  ;;  %v597_v19 = vpop.f32.mrf.mxu0  ;;  %v4300_v25 = vmul.f32 %v4266_v49, %v913_v3  ;;  %v1460_v26 = vadd.f32 %v1350_v15, %v1214_v6  ;;  %v1498_v29 = vmul.f32 %v4283_v13, %v913_v3 }
 0x17a   : > { %v4295_v22 = vmul.f32 %v4262_v43, %v912_v12  ;;  %v1566_v23 = vmul.f32 %v4289_v18, %v912_v12  ;;  %v1106_v27 = vsel %vm1101_vm0, %v1103_v58, %v1105_v16  ;;  %v598_v28 = vadd.f32 %v4259_v40, %v597_v19 }
 0x17b   : > { %v3380_v30 = vpop.f32.mrf.mxu0  ;;  %v1215_v31 = vadd.f32 %v1106_v27, %v969_v11  ;;  %v1352_v32 = vsel %vm1347_vm1, %v1349_v5, %v1351_v17  ;;  %v4307_v33 = vmul.f32 %v4272_v57, %v912_v12  ;;  %v4310_v34 = vmul.f32 %v4266_v49, %v912_v12 }
 0x17c   : > { %v1107_v36 = vrot.slane %v4295_v22, 1  ;;  %v914_v37 = vmax.f32 %v598_v28, 0.0  ;;  %v1108_v38 = vrot.slane %v4292_v20, 1  ;;  %v1567_v39 = vmul.f32 %v4289_v18, %v913_v3 }
 0x17d   : > { %v606_v41 = vpop.f32.mrf.mxu0  ;;  %v1461_v42 = vadd.f32 %v1352_v32, %v1215_v31  ;;  %v1497_v45 = vmul.f32 %v4283_v13, %v912_v12  ;;  %v1662_v46 = vrot.slane %v1566_v23, 1  ;;  %v1812_v51 = vmul.f32 %v4312_v35, %v913_v3 }
 0x17e   : > { %v607_v44 = vadd.f32 %v4259_v40, %v606_v41  ;;  %v1010_v47 = vmul.f32 %v4262_v43, %v914_v37  ;;  %v1256_v48 = vmul.f32 %v4266_v49, %v914_v37  ;;  %v1568_v50 = vmul.f32 %v4289_v18, %v914_v37  ;;  %v4361_v41 = vld [vmem:[#allocation8 + $0x8] ss:$0 sm:$0xff] }
 0x17f   : > { %v3383_v52 = vpop.f32.mrf.mxu0  ;;  %v1530_v53 = vadd.f32 %v1498_v29, %v1461_v42  ;;  %v1663_v54 = vrot.slane %v1567_v39, 1  ;;  %v1813_v55 = vmul.f32 %v4312_v35, %v914_v37  ;;  %v612_v56 = vadd.f32 %v3380_v30, %v4259_v40  ;;  %v4351_v30 = vpop.f32.mrf.mxu1 }
 0x180   : > { %v1110_v58 = vrot.slane %v1010_v47, 1  ;;  %v1356_v59 = vrot.slane %v1256_v48, 2  ;;  %v1665_v60 = vrot.slane %v1568_v50, 1  ;;  %v4325_v61 = vmax.f32 %v607_v44, 0.0  ;;  %6108 = vst [vmem:[#allocation20_spill] sm:$0xff] %v4351_v30 }
 0x181   : > { %v616_v62 = vpop.f32.mrf.mxu0  ;;  %v1910_v63 = vrot.slane %v1813_v55, 2  ;;  %v1529_v1 = vadd.f32 %v1497_v45, %v1460_v26  ;;  %v1664_v2 = vsel %vm1101_vm0, %v1662_v46, %v1663_v54  ;;  %v1354_v4 = vrot.slane %v4300_v25, 2  ;;  %v4340_v26 = vld [vmem:[#allocation8 + $0x6] ss:$0 sm:$0xff] }
 0x182   : > { %v617_v0 = vadd.f32 %v4259_v40, %v616_v62  ;;  %v1111_v3 = vsel %vm1101_vm0, %v1108_v38, %v1110_v58  ;;  %v1666_v5 = vsel %vm1101_vm0, %v1663_v54, %v1665_v60  ;;  %v1811_v7 = vmul.f32 %v4312_v35, %v912_v12 }
 0x183   : > { %v3386_v6 = vpop.f32.mrf.mxu0  ;;  %v1217_v8 = vadd.f32 %v1111_v3, %v971_v24  ;;  %v1775_v9 = vadd.f32 %v1666_v5, %v1530_v53  ;;  %v1908_v11 = vrot.slane %v1812_v51, 2  ;;  %v1353_v16 = vrot.slane %v4310_v34, 2  ;;  %v4346_v24 = vld [vmem:[#allocation8 + $0x7] ss:$0 sm:$0xff] }
 0x184   : > { %v4335_v15 = vmax.f32 %v617_v0, 0.0  ;;  %v4338_v17 = vmax.f32 %v612_v56, 0.0  ;;  %v1774_v21 = vadd.f32 %v1664_v2, %v1529_v1  ;;  %v1907_v23 = vrot.slane %v1811_v7, 2 }
 0x185   : > { %v625_v19 = vpop.f32.mrf.mxu0  ;;  %v1357_v27 = vsel %vm1347_vm1, %v1354_v4, %v1356_v59  ;;  %v1911_v12 = vsel %vm1347_vm1, %v1908_v11, %v1910_v63  ;;  %v631_v28 = vadd.f32 %v3386_v6, %v4259_v40  ;;  %v2056_v29 = vmul.f32 %v4340_v26, %v4325_v61  ;;  %v4384_v59 = vpop.f32.mrf.mxu1 }
 0x186   : > { %v4353_v31 = vadd.f32 %v1357_v27, %v1217_v8  ;;  %v2020_v32 = vadd.f32 %v1911_v12, %v1775_v9  ;;  %v4357_v37 = vmul.f32 %v4262_v43, %v4335_v15  ;;  %v2127_v39 = vmul.f32 %v4346_v24, %v4335_v15  ;;  %6109 = vst [vmem:[#allocation21_spill] sm:$0xff] %v4384_v59 }
 0x187   : > { %v3389_v42 = vpop.f32.mrf.mxu0  ;;  %v4365_v44 = vmul.f32 %v4266_v49, %v4335_v15  ;;  %v4369_v45 = vmul.f32 %v4289_v18, %v4335_v15  ;;  %v2372_v46 = vmul.f32 %v4361_v41, %v4335_v15  ;;  %v1909_v47 = vsel %vm1347_vm1, %v1907_v23, %v1908_v11  ;;  %v4393_v7 = vpop.f32.mrf.mxu1 }
 0x188   : > { %v2224_v48 = vrot.slane %v2127_v39, 1  ;;  %v2019_v51 = vadd.f32 %v1909_v47, %v1774_v21  ;;  %v2125_v52 = vmul.f32 %v4346_v24, %v4325_v61  ;;  %v2126_v53 = vmul.f32 %v4346_v24, %v4338_v17  ;;  %6110 = vst [vmem:[#allocation22_spill] sm:$0xff] %v4393_v7 }
 0x189   : > { %v635_v50 = vpop.f32.mrf.mxu0  ;;  %v626_v54 = vadd.f32 %v4259_v40, %v625_v19  ;;  %v2370_v56 = vmul.f32 %v4361_v41, %v4325_v61  ;;  %v2371_v58 = vmul.f32 %v4361_v41, %v4338_v17  ;;  %v2057_v1 = vmul.f32 %v4340_v26, %v4338_v17 }
 0x18a   : > { %v636_v55 = vadd.f32 %v4259_v40, %v635_v50  ;;  %v2088_v62 = vadd.f32 %v2056_v29, %v2019_v51  ;;  %v2221_v63 = vrot.slane %v2125_v52, 1  ;;  %v2222_v0 = vrot.slane %v2126_v53, 1  ;;  %v3455_v29 = vpop.f32.mrf.mxu1  ;;  %v4417_v51 = vld [vmem:[%s6033_s5] ss:$0 sm:$0xff] }
 0x18b   : > { %v3392_v60 = vpop.f32.mrf.mxu0  ;;  %v4389_v3 = vmax.f32 %v631_v28, 0.0  ;;  %v2466_v6 = vrot.slane %v2370_v56, 2  ;;  %v2089_v11 = vadd.f32 %v2057_v1, %v2020_v32  ;;  %v2469_v21 = vrot.slane %v2372_v46, 2 }
 0x18c   : > { %v4391_v5 = vmax.f32 %v636_v55, 0.0  ;;  %v2223_v9 = vsel %vm1101_vm0, %v2221_v63, %v2222_v0  ;;  %v2225_v19 = vsel %vm1101_vm0, %v2222_v0, %v2224_v48  ;;  %v4398_v27 = vmax.f32 %v626_v54, 0.0 }
 0x18d   : > { %v644_v8 = vpop.f32.mrf.mxu0  ;;  %v650_v12 = vadd.f32 %v3392_v60, %v4259_v40  ;;  %v2467_v28 = vrot.slane %v2371_v58, 2  ;;  %v2333_v32 = vadd.f32 %v2223_v9, %v2088_v62  ;;  %v2334_v48 = vadd.f32 %v2225_v19, %v2089_v11 }
 0x18e   : > { %v4403_v39 = vmul.f32 %v4262_v43, %v4391_v5  ;;  %v4407_v42 = vmul.f32 %v4266_v49, %v4391_v5  ;;  %v4411_v46 = vmul.f32 %v4289_v18, %v4391_v5  ;;  %v1109_v53 = vsel %vm1101_vm0, %v1107_v36, %v1108_v38 }
 0x18f   : > { %v3395_v47 = vpop.f32.mrf.mxu0  ;;  %v2468_v50 = vsel %vm1347_vm1, %v2466_v6, %v2467_v28  ;;  %v2470_v52 = vsel %vm1347_vm1, %v2467_v28, %v2469_v21  ;;  %v645_v54 = vadd.f32 %v4259_v40, %v644_v8  ;;  %v1216_v60 = vadd.f32 %v1109_v53, %v4307_v33 }
 0x190   : > { %v2578_v55 = vadd.f32 %v2468_v50, %v2333_v32  ;;  %v2579_v58 = vadd.f32 %v2470_v52, %v2334_v48  ;;  %v1355_v63 = vsel %vm1347_vm1, %v1353_v16, %v1354_v4  ;;  %v1499_v20 = vmul.f32 %v4283_v13, %v4325_v61 }
 0x191   : > { %v654_v56 = vpop.f32.mrf.mxu0  ;;  %v1569_v22 = vmul.f32 %v4289_v18, %v4325_v61  ;;  %v1462_v33 = vadd.f32 %v1355_v63, %v1216_v60  ;;  %v1570_v1 = vmul.f32 %v4289_v18, %v4338_v17  ;;  %v4441_v25 = vmax.f32 %v650_v12, 0.0 }
 0x192   : > { %v655_v62 = vadd.f32 %v4259_v40, %v654_v56  ;;  %v2617_v36 = vadd.f32 %v4417_v51, %v2578_v55  ;;  %v2618_v38 = vadd.f32 %v4417_v51, %v2579_v58  ;;  %v1814_v16 = vmul.f32 %v4312_v35, %v4325_v61 }
 0x193   : > { %v3398_v0 = vpop.f32.mrf.mxu0  ;;  %v1667_v4 = vrot.slane %v1569_v22, 1  ;;  %v1531_v9 = vadd.f32 %v1499_v20, %v1462_v33  ;;  %v1668_v11 = vrot.slane %v1570_v1, 1  ;;  %v1815_v19 = vmul.f32 %v4312_v35, %v4338_v17 }
 0x194   : > { %v4443_v34 = vmax.f32 %v655_v62, 0.0  ;;  %3506 = vmatprep.mubr.f32.mxu1 %v2617_v36  ;;  %v669_v6 = vadd.f32 %v3398_v0, %v4259_v40  ;;  %v4452_v28 = vmax.f32 %v645_v54, 0.0  ;;  %v2058_v29 = vmul.f32 %v4340_v26, %v4398_v27 }
 0x195   : > { %v663_v8 = vpop.f32.mrf.mxu0  ;;  %3507 = vmatmul.mubr.f32.vlgmr.msra.gmra.mxu1 %v2618_v38  ;;  %v1669_v47 = vsel %vm1101_vm0, %v1667_v4, %v1668_v11  ;;  %v1912_v48 = vrot.slane %v1814_v16, 2  ;;  %v1913_v50 = vrot.slane %v1815_v19, 2  ;;  %v2128_v56 = vmul.f32 %v4346_v24, %v4398_v27 }
 0x196   : > { %v4458_v32 = vmul.f32 %v4262_v43, %v4443_v34  ;;  %v4463_v53 = vmul.f32 %v4266_v49, %v4443_v34  ;;  %v4467_v54 = vmul.f32 %v4289_v18, %v4443_v34  ;;  %v1776_v55 = vadd.f32 %v1669_v47, %v1531_v9 }
 0x197   : > { %v3401_v52 = vpop.f32.mrf.mxu0  ;;  %v4471_v58 = vmax.f32 %v669_v6, 0.0  ;;  %v1914_v60 = vsel %vm1347_vm1, %v1912_v48, %v1913_v50  ;;  %v2129_v62 = vmul.f32 %v4346_v24, %v4389_v3  ;;  %v2373_v63 = vmul.f32 %v4361_v41, %v4398_v27 }
 0x198   : > { %v2021_v22 = vadd.f32 %v1914_v60, %v1776_v55  ;;  %v2226_v36 = vrot.slane %v2128_v56, 1  ;;  %v4480_v38 = vmul.f32 %v4361_v41, %v4389_v3  ;;  %v1500_v4 = vmul.f32 %v4283_v13, %v4338_v17  ;;  %v4491_v52 = vpop.f32.mrf.mxu1 }
 0x199   : > { %v673_v20 = vpop.f32.mrf.mxu0  ;;  %v2227_v33 = vrot.slane %v2129_v62, 1  ;;  %v2471_v1 = vrot.slane %v2373_v63, 2  ;;  %v1670_v16 = vrot.slane %v4369_v45, 1  ;;  %v664_v9 = vadd.f32 %v4259_v40, %v663_v8  ;;  %6111 = vst [vmem:[#allocation23_spill] sm:$0xff] %v4491_v52 }
 0x19a   : > { %v674_v0 = vadd.f32 %v4259_v40, %v673_v20  ;;  %v2090_v19 = vadd.f32 %v2058_v29, %v2021_v22  ;;  %v1816_v48 = vmul.f32 %v4312_v35, %v4335_v15  ;;  %v2472_v56 = vrot.slane %v4480_v38, 2 }
 0x19b   : > { %v3404_v6 = vpop.f32.mrf.mxu0  ;;  %v2228_v55 = vsel %vm1101_vm0, %v2226_v36, %v2227_v33  ;;  %v1532_v60 = vadd.f32 %v1500_v4, %v4353_v31  ;;  %v1671_v62 = vsel %vm1101_vm0, %v1668_v11, %v1670_v16  ;;  %v2130_v31 = vmul.f32 %v4346_v24, %v4391_v5 }
 0x19c   : > { %v4487_v47 = vmax.f32 %v674_v0, 0.0  ;;  %v2335_v8 = vadd.f32 %v2228_v55, %v2090_v19  ;;  %v2473_v20 = vsel %vm1347_vm1, %v2471_v1, %v2472_v56  ;;  %v1915_v36 = vrot.slane %v1816_v48, 2  ;;  %v4514_v19 = vpop.f32.mrf.mxu1 }
 0x19d   : > { %v682_v45 = vpop.f32.mrf.mxu0  ;;  %v1777_v22 = vadd.f32 %v1671_v62, %v1532_v60  ;;  %v4510_v0 = vmax.f32 %v664_v9, 0.0  ;;  %v2375_v16 = vmul.f32 %v4361_v41, %v4391_v5  ;;  %6113 = vst [vmem:[#allocation25_spill] sm:$0xff] %v4514_v19  ;;  %v2059_v48 = vmul.f32 %v4340_v26, %v4389_v3 }
 0x19e   : > { %v4500_v29 = vmul.f32 %v4262_v43, %v4487_v47  ;;  %v4504_v15 = vmul.f32 %v4266_v49, %v4487_v47  ;;  %v2580_v4 = vadd.f32 %v2473_v20, %v2335_v8  ;;  %v4518_v55 = vmul.f32 %v4289_v18, %v4487_v47  ;;  %v4526_v38 = vpop.f32.mrf.mxu1 }
 0x19f   : > { %v3407_v11 = vpop.f32.mrf.mxu0  ;;  %v1916_v1 = vsel %vm1347_vm1, %v1913_v50, %v1915_v36  ;;  %v2229_v60 = vrot.slane %v2130_v31, 1  ;;  %6114 = vst [vmem:[#allocation26_spill] sm:$0xff] %v4526_v38  ;;  %v2474_v12 = vrot.slane %v2375_v16, 2  ;;  %v688_v21 = vadd.f32 %v3404_v6, %v4259_v40 }
 0x1a0   : > { %6112 = vst [vmem:[#allocation24_spill] sm:$0xff] %v4504_v15  ;;  %v2619_v9 = vadd.f32 %v4417_v51, %v2580_v4  ;;  %v2022_v11 = vadd.f32 %v1916_v1, %v1777_v22  ;;  %v1011_v50 = vmul.f32 %v4262_v43, %v4325_v61  ;;  %v683_v4 = vadd.f32 %v4259_v40, %v682_v45  ;;  %v3461_v1 = vpop.f32.mrf.mxu1 }
 0x1a1   : > { %v692_v62 = vpop.f32.mrf.mxu0  ;;  %v2230_v63 = vsel %vm1101_vm0, %v2227_v33, %v2229_v60  ;;  %v1012_v20 = vmul.f32 %v4262_v43, %v4338_v17  ;;  %v1257_v22 = vmul.f32 %v4266_v49, %v4325_v61  ;;  %v972_v33 = vmul.f32 %v4272_v57, %v4325_v61 }
 0x1a2   : > { %3509 = vmatprep.mubr.f32.mxu1 %v2619_v9  ;;  %v2091_v31 = vadd.f32 %v2059_v48, %v2022_v11  ;;  %v1112_v6 = vrot.slane %v1011_v50, 1  ;;  %v1258_v16 = vmul.f32 %v4266_v49, %v4338_v17  ;;  %v1572_v60 = vmul.f32 %v4289_v18, %v4398_v27 }
 0x1a3   : > { %v4532_v36 = vpop.f32.mrf.mxu0  ;;  %v1113_v9 = vrot.slane %v1012_v20, 1  ;;  %v1358_v11 = vrot.slane %v1257_v22, 2  ;;  %v1573_v8 = vmul.f32 %v4289_v18, %v4389_v3  ;;  %v2475_v1 = vsel %vm1347_vm1, %v2472_v56, %v2474_v12 }
 0x1a4   : > { %v2336_v45 = vadd.f32 %v2230_v63, %v2091_v31  ;;  %v4550_v23 = vmax.f32 %v688_v21, 0.0  ;;  %v1817_v61 = vmul.f32 %v4312_v35, %v4398_v27  ;;  %v4556_v50 = vmul.f32 %v4312_v35, %v4389_v3 }
 0x1a5   : > { %v4545_v48 = vpop.f32.mrf.mxu0  ;;  %v1114_v63 = vsel %vm1101_vm0, %v1112_v6, %v1113_v9  ;;  %v1359_v20 = vrot.slane %v1258_v16, 2  ;;  %v1672_v31 = vrot.slane %v1572_v60, 1  ;;  %v4559_v22 = vmax.f32 %v683_v4, 0.0 }
 0x1a6   : > { %v2581_v38 = vadd.f32 %v2475_v1, %v2336_v45  ;;  %v1218_v19 = vadd.f32 %v1114_v63, %v972_v33  ;;  %v1501_v21 = vmul.f32 %v4283_v13, %v4398_v27  ;;  %v1917_v12 = vrot.slane %v1817_v61, 2 }
 0x1a7   : > { %v3413_v2 = vpop.f32.mrf.mxu0  ;;  %v1360_v7 = vsel %vm1347_vm1, %v1358_v11, %v1359_v20  ;;  %v1673_v59 = vrot.slane %v1573_v8, 1  ;;  %v1918_v16 = vrot.slane %v4556_v50, 2  ;;  %v2132_v4 = vmul.f32 %v4346_v24, %v4441_v25 }
 0x1a8   : > { %v2620_v52 = vadd.f32 %v4417_v51, %v2581_v38  ;;  %v2131_v2 = vmul.f32 %v4346_v24, %v4452_v28  ;;  %v1464_v6 = vadd.f32 %v1360_v7, %v1218_v19  ;;  %v2376_v33 = vmul.f32 %v4361_v41, %v4452_v28 }
 0x1a9   : > { %v4563_v56 = vpop.f32.mrf.mxu0  ;;  %v1674_v38 = vsel %vm1101_vm0, %v1672_v31, %v1673_v59  ;;  %v4579_v8 = vmul.f32 %v4361_v41, %v4441_v25  ;;  %v693_v45 = vadd.f32 %v4259_v40, %v692_v62  ;;  %v973_v7 = vmul.f32 %v4272_v57, %v4338_v17 }
 0x1aa   : > { %3510 = vmatmul.mubr.f32.gmra.mxu1 %v2620_v52  ;;  %v1533_v19 = vadd.f32 %v1501_v21, %v1464_v6  ;;  %v1919_v11 = vsel %vm1347_vm1, %v1917_v12, %v1918_v16  ;;  %v2060_v1 = vmul.f32 %v4340_v26, %v4452_v28  ;;  %v6115_v61 = vrot.slane %v4357_v37, 1 }
 0x1ab   : > { %v4574_v60 = vpop.f32.mrf.mxu0  ;;  %v2231_v63 = vrot.slane %v2131_v2, 1  ;;  %v2476_v31 = vrot.slane %v2376_v33, 2  ;;  %v4592_v30 = vmax.f32 %v693_v45, 0.0  ;;  %v2232_v15 = vrot.slane %v2132_v4, 1 }
 0x1ac   : > { %v1116_v52 = vsel %vm1101_vm0, %v1113_v9, %v6115_v61  ;;  %v1778_v14 = vadd.f32 %v1674_v38, %v1533_v19  ;;  %v6116_v17 = vrot.slane %v4365_v44, 2  ;;  %v1675_v12 = vrot.slane %v4411_v46, 1 }
 0x1ad   : > { %v4590_v50 = vpop.f32.mrf.mxu0  ;;  %v1219_v62 = vadd.f32 %v1116_v52, %v973_v7  ;;  %v2477_v37 = vrot.slane %v4579_v8, 2  ;;  %v4601_v9 = vmul.f32 %v4262_v43, %v4592_v30  ;;  %v1502_v33 = vmul.f32 %v4283_v13, %v4389_v3  ;;  %v4626_v52 = vpop.f32.mrf.mxu1 }
 0x1ae   : > { %v1362_v21 = vsel %vm1347_vm1, %v1359_v20, %v6116_v17  ;;  %v2023_v45 = vadd.f32 %v1919_v11, %v1778_v14  ;;  %v4607_v4 = vmul.f32 %v4266_v49, %v4592_v30  ;;  %v1676_v44 = vsel %vm1101_vm0, %v1673_v59, %v1675_v12  ;;  %6119 = vst [vmem:[#allocation29_spill] sm:$0xff] %v4626_v52 }
 0x1af   : > { %v3419_v6 = vpop.f32.mrf.mxu0  ;;  %6117 = vst [vmem:[#allocation27_spill] sm:$0xff] %v4601_v9  ;;  %v1465_v2 = vadd.f32 %v1362_v21, %v1219_v62  ;;  %v1819_v46 = vmul.f32 %v4312_v35, %v4391_v5  ;;  %v2233_v38 = vsel %vm1101_vm0, %v2231_v63, %v2232_v15  ;;  %v2478_v8 = vsel %vm1347_vm1, %v2476_v31, %v2477_v37 }
 0x1b0   : > { %6118 = vst [vmem:[#allocation28_spill] sm:$0xff] %v4607_v4  ;;  %v2133_v19 = vmul.f32 %v4346_v24, %v4443_v34  ;;  %v2092_v14 = vadd.f32 %v2060_v1, %v2023_v45  ;;  %v4620_v11 = vmul.f32 %v4289_v18, %v4592_v30  ;;  %v2378_v59 = vmul.f32 %v4361_v41, %v4443_v34 }
 0x1b1   : > { %v4612_v20 = vpop.f32.mrf.mxu0  ;;  %v1534_v7 = vadd.f32 %v1502_v33, %v1465_v2  ;;  %v1920_v61 = vrot.slane %v1819_v46, 2  ;;  %v2061_v62 = vmul.f32 %v4340_v26, %v4441_v25  ;;  %v707_v6 = vadd.f32 %v4532_v36, %v4259_v40 }
 0x1b2   : > { %v2234_v17 = vrot.slane %v2133_v19, 1  ;;  %v2337_v1 = vadd.f32 %v2233_v38, %v2092_v14  ;;  %v2479_v45 = vrot.slane %v2378_v59, 2  ;;  %v702_v46 = vadd.f32 %v4259_v40, %v4545_v48  ;;  %v4646_v14 = vpop.f32.mrf.mxu1 }
 0x1b3   : > { %v4624_v5 = vpop.f32.mrf.mxu0  ;;  %v1779_v31 = vadd.f32 %v1676_v44, %v1534_v7  ;;  %v1921_v12 = vsel %vm1347_vm1, %v1918_v16, %v1920_v61  ;;  %v1014_v44 = vmul.f32 %v4262_v43, %v4398_v27  ;;  %v1015_v19 = vmul.f32 %v4262_v43, %v4389_v3  ;;  %6120 = vst [vmem:[#allocation30_spill] sm:$0xff] %v4646_v14 }
 0x1b4   : > { %v2582_v7 = vadd.f32 %v2478_v8, %v2337_v1  ;;  %v2235_v38 = vsel %vm1101_vm0, %v2232_v15, %v2234_v17  ;;  %v1260_v16 = vmul.f32 %v4266_v49, %v4398_v27  ;;  %v974_v59 = vmul.f32 %v4272_v57, %v4398_v27 }
 0x1b5   : > { %v4635_v2 = vpop.f32.mrf.mxu0  ;;  %v2024_v33 = vadd.f32 %v1921_v12, %v1779_v31  ;;  %v1117_v48 = vrot.slane %v1014_v44, 1  ;;  %v1261_v31 = vmul.f32 %v4266_v49, %v4389_v3  ;;  %v1118_v15 = vrot.slane %v1015_v19, 1 }
 0x1b6   : > { %v2621_v8 = vadd.f32 %v4417_v51, %v2582_v7  ;;  %v1363_v17 = vrot.slane %v1260_v16, 2  ;;  %v1575_v1 = vmul.f32 %v4289_v18, %v4452_v28  ;;  %v1576_v27 = vmul.f32 %v4289_v18, %v4441_v25 }
 0x1b7   : > { %v3425_v36 = vpop.f32.mrf.mxu0  ;;  %v2093_v61 = vadd.f32 %v2061_v62, %v2024_v33  ;;  %v1364_v62 = vrot.slane %v1261_v31, 2  ;;  %v1820_v33 = vmul.f32 %v4312_v35, %v4452_v28  ;;  %v2480_v44 = vsel %vm1347_vm1, %v2477_v37, %v2479_v45 }
 0x1b8   : > { %v4657_v36 = vpop.f32.mrf.mxu1  ;;  %3512 = vmatprep.mubr.f32.mxu1 %v2621_v8  ;;  %v1119_v7 = vsel %vm1101_vm0, %v1117_v48, %v1118_v15  ;;  %v1677_v19 = vrot.slane %v1575_v1, 1  ;;  %v1821_v16 = vmul.f32 %v4312_v35, %v4441_v25  ;;  %v1503_v14 = vmul.f32 %v4283_v13, %v4452_v28 }
 0x1b9   : > { %v4655_v12 = vpop.f32.mrf.mxu0  ;;  %6121 = vst [vmem:[#allocation31_spill] sm:$0xff] %v4657_v36  ;;  %v2338_v21 = vadd.f32 %v2235_v38, %v2093_v61  ;;  %v1220_v61 = vadd.f32 %v1119_v7, %v974_v59  ;;  %v1365_v31 = vsel %vm1347_vm1, %v1363_v17, %v1364_v62  ;;  %v1678_v52 = vrot.slane %v1576_v27, 1 }
 0x1ba   : > { %v3467_v36 = vpop.f32.mrf.mxu1  ;;  %v1922_v8 = vrot.slane %v1820_v33, 2  ;;  %v2134_v37 = vmul.f32 %v4346_v24, %v4510_v0  ;;  %v4676_v45 = vmul.f32 %v4346_v24, %v4471_v58  ;;  %v2379_v17 = vmul.f32 %v4361_v41, %v4510_v0 }
 0x1bb   : > { %v4667_v63 = vpop.f32.mrf.mxu0  ;;  %v2583_v38 = vadd.f32 %v2480_v44, %v2338_v21  ;;  %v4681_v21 = vmax.f32 %v707_v6, 0.0  ;;  %v1466_v59 = vadd.f32 %v1365_v31, %v1220_v61  ;;  %v1679_v36 = vsel %vm1101_vm0, %v1677_v19, %v1678_v52 }
 0x1bc   : > { %v1923_v27 = vrot.slane %v1821_v16, 2  ;;  %v2236_v33 = vrot.slane %v2134_v37, 1  ;;  %v4688_v44 = vmul.f32 %v4361_v41, %v4471_v58  ;;  %v4690_v4 = vmax.f32 %v702_v46, 0.0 }
 0x1bd   : > { %v4678_v48 = vpop.f32.mrf.mxu0  ;;  %v2622_v1 = vadd.f32 %v4417_v51, %v2583_v38  ;;  %v1535_v9 = vadd.f32 %v1503_v14, %v1466_v59  ;;  %v712_v6 = vadd.f32 %v4259_v40, %v4563_v56  ;;  %v975_v38 = vmul.f32 %v4272_v57, %v4389_v3 }
 0x1be   : > { %6122 = vst [vmem:[#allocation32_spill] sm:$0xff] %v4678_v48  ;;  %v1924_v61 = vsel %vm1347_vm1, %v1922_v8, %v1923_v27  ;;  %v2062_v19 = vmul.f32 %v4340_v26, %v4510_v0  ;;  %v2237_v16 = vrot.slane %v4676_v45, 1  ;;  %v6123_v31 = vrot.slane %v4403_v39, 1 }
 0x1bf   : > { %v3431_v7 = vpop.f32.mrf.mxu0  ;;  %3513 = vmatmul.mubr.f32.gmra.mxu1 %v2622_v1  ;;  %v1780_v14 = vadd.f32 %v1679_v36, %v1535_v9  ;;  %v2481_v1 = vrot.slane %v2379_v17, 2  ;;  %v4705_v59 = vmax.f32 %v712_v6, 0.0  ;;  %v2482_v8 = vrot.slane %v4688_v44, 2 }
 0x1c0   : > { %v1121_v37 = vsel %vm1101_vm0, %v1118_v15, %v6123_v31  ;;  %v2238_v3 = vsel %vm1101_vm0, %v2236_v33, %v2237_v16  ;;  %v1680_v7 = vrot.slane %v4467_v54, 1  ;;  %v1822_v45 = vmul.f32 %v4312_v35, %v4443_v34 }
 0x1c1   : > { %v4703_v46 = vpop.f32.mrf.mxu0  ;;  %v1221_v56 = vadd.f32 %v1121_v37, %v975_v38  ;;  %v2025_v39 = vadd.f32 %v1924_v61, %v1780_v14  ;;  %v4716_v15 = vmul.f32 %v4262_v43, %v4705_v59  ;;  %v4720_v9 = vmul.f32 %v4266_v49, %v4705_v59 }
 0x1c2   : > { %v6125_v17 = vrot.slane %v4407_v42, 2  ;;  %v1504_v54 = vmul.f32 %v4283_v13, %v4441_v25  ;;  %v1925_v34 = vrot.slane %v1822_v45, 2  ;;  %v2136_v44 = vmul.f32 %v4346_v24, %v4487_v47 }
 0x1c3   : > { %v4712_v48 = vpop.f32.mrf.mxu0  ;;  %6124 = vst [vmem:[#allocation33_spill] sm:$0xff] %v4716_v15  ;;  %v2094_v38 = vadd.f32 %v2062_v19, %v2025_v39  ;;  %v2483_v61 = vsel %vm1347_vm1, %v2481_v1, %v2482_v8  ;;  %v1681_v31 = vsel %vm1101_vm0, %v1678_v52, %v1680_v7  ;;  %v2381_v42 = vmul.f32 %v4361_v41, %v4487_v47  ;;  %v4744_v7 = vpop.f32.mrf.mxu1 }
 0x1c4   : > { %v1367_v36 = vsel %vm1347_vm1, %v1364_v62, %v6125_v17  ;;  %v4738_v37 = vmul.f32 %v4289_v18, %v4705_v59  ;;  %v1926_v1 = vsel %vm1347_vm1, %v1923_v27, %v1925_v34  ;;  %v2239_v52 = vrot.slane %v2136_v44, 1  ;;  %6126 = vst [vmem:[#allocation34_spill] sm:$0xff] %v4744_v7 }
 0x1c5   : > { %v1467_v33 = vadd.f32 %v1367_v36, %v1221_v56  ;;  %v4729_v6 = vpop.f32.mrf.mxu0  ;;  %v2063_v56 = vmul.f32 %v4340_v26, %v4471_v58  ;;  %v2339_v17 = vadd.f32 %v2238_v3, %v2094_v38  ;;  %v2484_v36 = vrot.slane %v2381_v42, 2 }
 0x1c6   : > { %v726_v62 = vadd.f32 %v4574_v60, %v4259_v40  ;;  %v721_v3 = vadd.f32 %v4259_v40, %v4590_v50  ;;  %v976_v27 = vmul.f32 %v4272_v57, %v4452_v28  ;;  %v1018_v34 = vmul.f32 %v4262_v43, %v4441_v25 }
 0x1c7   : > { %v1536_v14 = vadd.f32 %v1504_v54, %v1467_v33  ;;  %v3437_v45 = vpop.f32.mrf.mxu0  ;;  %v1017_v33 = vmul.f32 %v4262_v43, %v4452_v28  ;;  %v2584_v15 = vadd.f32 %v2483_v61, %v2339_v17  ;;  %v1263_v60 = vmul.f32 %v4266_v49, %v4452_v28  ;;  %v4768_v17 = vpop.f32.mrf.mxu1 }
 0x1c8   : > { %v2240_v50 = vsel %vm1101_vm0, %v2237_v16, %v2239_v52  ;;  %v1578_v45 = vmul.f32 %v4289_v18, %v4510_v0  ;;  %6128 = vst [vmem:[#allocation36_spill] sm:$0xff] %v4768_v17  ;;  %v1579_v28 = vmul.f32 %v4289_v18, %v4471_v58  ;;  %v1823_v52 = vmul.f32 %v4312_v35, %v4510_v0 }
 0x1c9   : > { %v1781_v39 = vadd.f32 %v1681_v31, %v1536_v14  ;;  %v4750_v54 = vpop.f32.mrf.mxu0  ;;  %v1122_v38 = vrot.slane %v1017_v33, 1  ;;  %v1264_v31 = vmul.f32 %v4266_v49, %v4441_v25  ;;  %v2623_v61 = vadd.f32 %v4417_v51, %v2584_v15 }
 0x1ca   : > { %v1123_v14 = vrot.slane %v1018_v34, 1  ;;  %v1368_v33 = vrot.slane %v1263_v60, 2  ;;  %v1682_v16 = vrot.slane %v1578_v45, 1  ;;  %v2485_v17 = vsel %vm1347_vm1, %v2482_v8, %v2484_v36 }
 0x1cb   : > { %v2026_v44 = vadd.f32 %v1926_v1, %v1781_v39  ;;  %v4762_v42 = vpop.f32.mrf.mxu0  ;;  %v4770_v39 = vmax.f32 %v726_v62, 0.0  ;;  %3515 = vmatprep.mubr.f32.mxu1 %v2623_v61  ;;  %v1369_v7 = vrot.slane %v1264_v31, 2  ;;  %v1505_v62 = vmul.f32 %v4283_v13, %v4510_v0  ;;  %v4787_v31 = vpop.f32.mrf.mxu1 }
 0x1cc   : > { %6127 = vst [vmem:[#allocation35_spill] sm:$0xff] %v4762_v42  ;;  %v1124_v15 = vsel %vm1101_vm0, %v1122_v38, %v1123_v14  ;;  %v1683_v42 = vrot.slane %v1579_v28, 1  ;;  %v1824_v61 = vmul.f32 %v4312_v35, %v4471_v58  ;;  %v2137_v38 = vmul.f32 %v4346_v24, %v4559_v22  ;;  %6130 = vst [vmem:[#allocation38_spill] sm:$0xff] %v4787_v31 }
 0x1cd   : > { %v2095_v1 = vadd.f32 %v2063_v56, %v2026_v44  ;;  %v4774_v19 = vpop.f32.mrf.mxu0  ;;  %v1222_v56 = vadd.f32 %v1124_v15, %v976_v27  ;;  %v1370_v60 = vsel %vm1347_vm1, %v1368_v33, %v1369_v7  ;;  %v2138_v36 = vmul.f32 %v4346_v24, %v4550_v23  ;;  %v3473_v15 = vpop.f32.mrf.mxu1 }
 0x1ce   : > { %6129 = vst [vmem:[#allocation37_spill] sm:$0xff] %v4774_v19  ;;  %v1684_v27 = vsel %vm1101_vm0, %v1682_v16, %v1683_v42  ;;  %v2382_v33 = vmul.f32 %v4361_v41, %v4559_v22  ;;  %v4798_v28 = vmul.f32 %v4361_v41, %v4550_v23  ;;  %v2064_v16 = vmul.f32 %v4340_v26, %v4559_v22 }
 0x1cf   : > { %v2340_v34 = vadd.f32 %v2240_v50, %v2095_v1  ;;  %v3443_v44 = vpop.f32.mrf.mxu0  ;;  %v4789_v50 = vmax.f32 %v721_v3, 0.0  ;;  %v1468_v8 = vadd.f32 %v1370_v60, %v1222_v56  ;;  %v1927_v1 = vrot.slane %v1823_v52, 2 }
 0x1d0   : > { %v2241_v3 = vrot.slane %v2137_v38, 1  ;;  %v1928_v56 = vrot.slane %v1824_v61, 2  ;;  %v977_v52 = vmul.f32 %v4272_v57, %v4441_v25  ;;  %v6131_v60 = vrot.slane %v4458_v32, 1 }
 0x1d1   : > { %v2585_v45 = vadd.f32 %v2485_v17, %v2340_v34  ;;  %v1537_v17 = vadd.f32 %v1505_v62, %v1468_v8  ;;  %v731_v34 = vadd.f32 %v4259_v40, %v4612_v20  ;;  %v2242_v19 = vrot.slane %v2138_v36, 1 }
 0x1d2   : > { %v1126_v31 = vsel %vm1101_vm0, %v1123_v14, %v6131_v60  ;;  %v1929_v38 = vsel %vm1347_vm1, %v1927_v1, %v1928_v56  ;;  %v2487_v40 = vrot.slane %v4798_v28, 2  ;;  %v1685_v61 = vrot.slane %v4518_v55, 1  ;;  %v4848_v60 = vld [vmem:[%s6031_s3] ss:$0 sm:$0xff] }
 0x1d3   : > { %v2624_v44 = vadd.f32 %v4417_v51, %v2585_v45  ;;  %v1782_v15 = vadd.f32 %v1684_v27, %v1537_v17  ;;  %v2486_v45 = vrot.slane %v2382_v33, 2  ;;  %v4810_v62 = vmax.f32 %v731_v34, 0.0 }
 0x1d4   : > { %v1223_v20 = vadd.f32 %v1126_v31, %v977_v52  ;;  %v2243_v25 = vsel %vm1101_vm0, %v2241_v3, %v2242_v19  ;;  %v6132_v14 = vrot.slane %v4463_v53, 2  ;;  %v1506_v31 = vmul.f32 %v4283_v13, %v4471_v58 }
 0x1d5   : > { %3516 = vmatmul.mubr.f32.gmra.mxu1 %v2624_v44  ;;  %v2027_v8 = vadd.f32 %v1929_v38, %v1782_v15  ;;  %v4818_v32 = vmul.f32 %v4262_v43, %v4810_v62  ;;  %v4825_v27 = vmul.f32 %v4266_v49, %v4810_v62  ;;  %v1825_v55 = vmul.f32 %v4312_v35, %v4487_v47  ;;  %v6146_v47 = vld [vmem:[#allocation27_spill] sm:$0xff] }
 0x1d6   : > { %v1372_v36 = vsel %vm1347_vm1, %v1369_v7, %v6132_v14  ;;  %v2488_v28 = vsel %vm1347_vm1, %v2486_v45, %v2487_v40  ;;  %v1686_v43 = vsel %vm1101_vm0, %v1683_v42, %v1685_v61  ;;  %v2139_v53 = vmul.f32 %v4346_v24, %v4592_v30 }
 0x1d7   : > { %v1469_v1 = vadd.f32 %v1372_v36, %v1223_v20  ;;  %v2096_v33 = vadd.f32 %v2064_v16, %v2027_v8  ;;  %v4837_v7 = vmul.f32 %v4289_v18, %v4810_v62  ;;  %v1930_v44 = vrot.slane %v1825_v55, 2  ;;  %v4857_v8 = vld [vmem:[#allocation8 + $0x1] ss:$0 sm:$0xff] }
 0x1d8   : > { %v2384_v17 = vmul.f32 %v4361_v41, %v4592_v30  ;;  %v2065_v34 = vmul.f32 %v4340_v26, %v4550_v23  ;;  %v2244_v16 = vrot.slane %v2139_v53, 1  ;;  %v745_v15 = vadd.f32 %v4848_v60, %v4624_v5  ;;  %v4863_v5 = vld [vmem:[#allocation8 + $0x2] ss:$0 sm:$0xff] }
 0x1d9   : > { %v1538_v49 = vadd.f32 %v1506_v31, %v1469_v1  ;;  %v2341_v3 = vadd.f32 %v2243_v25, %v2096_v33  ;;  %v740_v45 = vadd.f32 %v4848_v60, %v4635_v2  ;;  %v1931_v20 = vsel %vm1347_vm1, %v1928_v56, %v1930_v44 }
 0x1da   : > { %v978_v61 = vmul.f32 %v4272_v57, %v4510_v0  ;;  %v1020_v25 = vmul.f32 %v4857_v8, %v4510_v0  ;;  %v2489_v36 = vrot.slane %v2384_v17, 2  ;;  %v1021_v1 = vmul.f32 %v4857_v8, %v4471_v58 }
 0x1db   : > { %v1783_v52 = vadd.f32 %v1686_v43, %v1538_v49  ;;  %v2586_v38 = vadd.f32 %v2488_v28, %v2341_v3  ;;  %v1266_v2 = vmul.f32 %v4863_v5, %v4510_v0  ;;  %v2245_v31 = vsel %vm1101_vm0, %v2242_v19, %v2244_v16 }
 0x1dc   : > { %v1127_v57 = vrot.slane %v1020_v25, 1  ;;  %v1267_v55 = vmul.f32 %v4863_v5, %v4471_v58  ;;  %v1128_v28 = vrot.slane %v1021_v1, 1  ;;  %v1581_v53 = vmul.f32 %v4289_v18, %v4559_v22 }
 0x1dd   : > { %v2028_v14 = vadd.f32 %v1931_v20, %v1783_v52  ;;  %v2625_v56 = vadd.f32 %v4417_v51, %v2586_v38  ;;  %v1373_v43 = vrot.slane %v1266_v2, 2  ;;  %v4873_v49 = vmax.f32 %v745_v15, 0.0 }
 0x1de   : > { %v1374_v44 = vrot.slane %v1267_v55, 2  ;;  %v1582_v0 = vmul.f32 %v4289_v18, %v4550_v23  ;;  %v1826_v19 = vmul.f32 %v4312_v35, %v4559_v22  ;;  %v2490_v3 = vsel %vm1347_vm1, %v2487_v40, %v2489_v36 }
 0x1df   : > { %v2097_v33 = vadd.f32 %v2065_v34, %v2028_v14  ;;  %3518 = vmatprep.mubr.f32.mxu1 %v2625_v56  ;;  %v1129_v34 = vsel %vm1101_vm0, %v1127_v57, %v1128_v28  ;;  %v1687_v16 = vrot.slane %v1581_v53, 1  ;;  %v1507_v15 = vmul.f32 %v4283_v13, %v4559_v22 }
 0x1e0   : > { %v1224_v52 = vadd.f32 %v1129_v34, %v978_v61  ;;  %v1375_v38 = vsel %vm1347_vm1, %v1373_v43, %v1374_v44  ;;  %v1827_v20 = vmul.f32 %v4312_v35, %v4550_v23  ;;  %v1688_v18 = vrot.slane %v1582_v0, 1 }
 0x1e1   : > { %v2342_v17 = vadd.f32 %v2245_v31, %v2097_v33  ;;  %v2140_v14 = vmul.f32 %v4346_v24, %v4690_v4  ;;  %v2141_v40 = vmul.f32 %v4346_v24, %v4681_v21  ;;  %v1932_v1 = vrot.slane %v1826_v19, 2 }
 0x1e2   : > { %v1470_v36 = vadd.f32 %v1375_v38, %v1224_v52  ;;  %v2385_v61 = vmul.f32 %v4361_v41, %v4690_v4  ;;  %v2386_v2 = vmul.f32 %v4361_v41, %v4681_v21  ;;  %v1689_v35 = vsel %vm1101_vm0, %v1687_v16, %v1688_v18 }
 0x1e3   : > { %v2587_v25 = vadd.f32 %v2490_v3, %v2342_v17  ;;  %v2246_v56 = vrot.slane %v2140_v14, 1  ;;  %v2247_v31 = vrot.slane %v2141_v40, 1  ;;  %v4896_v57 = vmax.f32 %v740_v45, 0.0  ;;  %v4901_v17 = vld [vmem:[#allocation8] ss:$0 sm:$0xff] }
 0x1e4   : > { %v1539_v55 = vadd.f32 %v1507_v15, %v1470_v36  ;;  %v2491_v33 = vrot.slane %v2385_v61, 2  ;;  %v2492_v43 = vrot.slane %v2386_v2, 2  ;;  %v1933_v53 = vrot.slane %v1827_v20, 2  ;;  %v4920_v2 = vld [vmem:[#allocation8 + $0x5] ss:$0 sm:$0xff] }
 0x1e5   : > { %v2626_v13 = vadd.f32 %v4417_v51, %v2587_v25  ;;  %v2248_v0 = vsel %vm1101_vm0, %v2246_v56, %v2247_v31  ;;  %v750_v19 = vadd.f32 %v4848_v60, %v4655_v12  ;;  %v979_v3 = vmul.f32 %v4901_v17, %v4471_v58  ;;  %v6134_v58 = vld [vmem:[#allocation24_spill] sm:$0xff] }
 0x1e6   : > { %v1784_v34 = vadd.f32 %v1689_v35, %v1539_v55  ;;  %v2066_v45 = vmul.f32 %v4340_v26, %v4690_v4  ;;  %v2493_v16 = vsel %vm1347_vm1, %v2491_v33, %v2492_v43  ;;  %v6133_v52 = vrot.slane %v4500_v29, 1  ;;  %v4931_v35 = vld [vmem:[#allocation8 + $0x3] ss:$0 sm:$0xff] }
 0x1e7   : > { %3519 = vmatmul.mubr.f32.gmra.mxu1 %v2626_v13  ;;  %v1934_v15 = vsel %vm1347_vm1, %v1932_v1, %v1933_v53  ;;  %v816_v12 = vadd.f32 %v4848_v60, %v4280_v10  ;;  %v4914_v20 = vmax.f32 %v750_v19, 0.0  ;;  %v6135_v40 = vrot.slane %v6134_v58, 2 }
 0x1e8   : > { %v1131_v38 = vsel %vm1101_vm0, %v1128_v28, %v6133_v52  ;;  %v2029_v14 = vadd.f32 %v1934_v15, %v1784_v34  ;;  %v1690_v61 = vrot.slane %v4620_v11, 1  ;;  %v1828_v29 = vmul.f32 %v4920_v2, %v4592_v30  ;;  %v6136_v28 = vld [vmem:[#allocation19_spill] sm:$0xff] }
 0x1e9   : > { %v1225_v25 = vadd.f32 %v1131_v38, %v979_v3  ;;  %v1377_v36 = vsel %vm1347_vm1, %v1374_v44, %v6135_v40  ;;  %v4925_v1 = vmax.f32 %v6136_v28, 0.0  ;;  %v4929_v10 = vmul.f32 %v4857_v8, %v4914_v20  ;;  %v6141_v28 = vld [vmem:[#allocation32_spill] sm:$0xff] }
 0x1ea   : > { %v1508_v44 = vmul.f32 %v4931_v35, %v4550_v23  ;;  %v2098_v56 = vadd.f32 %v2066_v45, %v2029_v14  ;;  %v1691_v11 = vsel %vm1101_vm0, %v1688_v18, %v1690_v61  ;;  %v1935_v55 = vrot.slane %v1828_v29, 2  ;;  %v4948_v45 = vld [vmem:[#allocation8 + $0x4] ss:$0 sm:$0xff] }
 0x1eb   : > { %6137 = vst [vmem:[#allocation24_spill] sm:$0xff] %v4925_v1  ;;  %v1471_v13 = vadd.f32 %v1377_v36, %v1225_v25  ;;  %v2142_v30 = vmul.f32 %v4346_v24, %v4705_v59  ;;  %v4938_v33 = vmax.f32 %v816_v12, 0.0  ;;  %v2067_v3 = vmul.f32 %v4340_v26, %v4681_v21  ;;  %v6139_v25 = vld [vmem:[#allocation20_spill] sm:$0xff] }
 0x1ec   : > { %v2387_v34 = vmul.f32 %v4361_v41, %v4705_v59  ;;  %v2343_v52 = vadd.f32 %v2248_v0, %v2098_v56  ;;  %v4946_v38 = vmul.f32 %v4863_v5, %v4914_v20  ;;  %v4952_v18 = vmul.f32 %v4948_v45, %v4914_v20 }
 0x1ed   : > { %6138 = vst [vmem:[#allocation19_spill] sm:$0xff] %v4938_v33  ;;  %v1540_v19 = vadd.f32 %v1508_v44, %v1471_v13  ;;  %v2249_v24 = vrot.slane %v2142_v30, 1  ;;  %v764_v26 = vadd.f32 %v4848_v60, %v4667_v63  ;;  %v826_v41 = vadd.f32 %v4848_v60, %v6139_v25 }
 0x1ee   : > { %v2494_v12 = vrot.slane %v2387_v34, 2  ;;  %v2588_v0 = vadd.f32 %v2493_v16, %v2343_v52  ;;  %v1936_v58 = vsel %vm1347_vm1, %v1933_v53, %v1935_v55  ;;  %v759_v13 = vadd.f32 %v4848_v60, %v6141_v28 }
 0x1ef   : > { %v1785_v15 = vadd.f32 %v1691_v11, %v1540_v19  ;;  %v2250_v40 = vsel %vm1101_vm0, %v2247_v31, %v2249_v24  ;;  %v4962_v29 = vmax.f32 %v826_v41, 0.0  ;;  %v1023_v44 = vmul.f32 %v4857_v8, %v4559_v22  ;;  %v6145_v31 = vld [vmem:[#allocation21_spill] sm:$0xff] }
 0x1f0   : > { %v2495_v61 = vsel %vm1347_vm1, %v2492_v43, %v2494_v12  ;;  %v2627_v63 = vadd.f32 %v4417_v51, %v2588_v0  ;;  %v1024_v16 = vmul.f32 %v4857_v8, %v4550_v23  ;;  %v1269_v53 = vmul.f32 %v4863_v5, %v4559_v22 }
 0x1f1   : > { %v2030_v36 = vadd.f32 %v1936_v58, %v1785_v15  ;;  %6140 = vst [vmem:[#allocation20_spill] sm:$0xff] %v4962_v29  ;;  %v4974_v43 = vmax.f32 %v764_v26, 0.0  ;;  %v980_v11 = vmul.f32 %v4901_v17, %v4559_v22  ;;  %v1132_v55 = vrot.slane %v1023_v44, 1 }
 0x1f2   : > { %3521 = vmatprep.mubr.f32.mxu1 %v2627_v63  ;;  %v1133_v30 = vrot.slane %v1024_v16, 1  ;;  %v1270_v19 = vmul.f32 %v4863_v5, %v4550_v23  ;;  %v1378_v34 = vrot.slane %v1269_v53, 2  ;;  %v4982_v24 = vmul.f32 %v4857_v8, %v4962_v29 }
 0x1f3   : > { %v2099_v56 = vadd.f32 %v2067_v3, %v2030_v36  ;;  %v4984_v15 = vmax.f32 %v759_v13, 0.0  ;;  %v1509_v3 = vmul.f32 %v4931_v35, %v4690_v4  ;;  %v1584_v26 = vmul.f32 %v4948_v45, %v4690_v4 }
 0x1f4   : > { %6142 = vst [vmem:[#allocation32_spill] sm:$0xff] %v4982_v24  ;;  %v1134_v12 = vsel %vm1101_vm0, %v1132_v55, %v1133_v30  ;;  %v1379_v22 = vrot.slane %v1270_v19, 2  ;;  %v1585_v25 = vmul.f32 %v4948_v45, %v4681_v21  ;;  %v1829_v58 = vmul.f32 %v4920_v2, %v4690_v4 }
 0x1f5   : > { %v2344_v52 = vadd.f32 %v2250_v40, %v2099_v56  ;;  %v1226_v0 = vadd.f32 %v1134_v12, %v980_v11  ;;  %v1830_v40 = vmul.f32 %v4920_v2, %v4681_v21  ;;  %v4999_v36 = vmul.f32 %v4863_v5, %v4962_v29  ;;  %v5004_v11 = vld [vmem:[#allocation8 + $0x7] ss:$0 sm:$0xff] }
 0x1f6   : > { %v1380_v28 = vsel %vm1347_vm1, %v1378_v34, %v1379_v22  ;;  %v1692_v13 = vrot.slane %v1584_v26, 1  ;;  %v1693_v63 = vrot.slane %v1585_v25, 1  ;;  %v1937_v53 = vrot.slane %v1829_v58, 2 }
 0x1f7   : > { %v2589_v41 = vadd.f32 %v2495_v61, %v2344_v52  ;;  %6143 = vst [vmem:[#allocation39_spill] sm:$0xff] %v4999_v36  ;;  %v1472_v16 = vadd.f32 %v1380_v28, %v1226_v0  ;;  %v1938_v61 = vrot.slane %v1830_v40, 2  ;;  %v2143_v55 = vmul.f32 %v5004_v11, %v4789_v50  ;;  %v5010_v52 = vld [vmem:[#allocation8 + $0x8] ss:$0 sm:$0xff] }
 0x1f8   : > { %v1694_v56 = vsel %vm1101_vm0, %v1692_v13, %v1693_v63  ;;  %v2144_v19 = vmul.f32 %v5004_v11, %v4770_v39  ;;  %v2388_v34 = vmul.f32 %v5010_v52, %v4789_v50  ;;  %v2389_v25 = vmul.f32 %v5010_v52, %v4770_v39 }
 0x1f9   : > { %v2628_v44 = vadd.f32 %v4417_v51, %v2589_v41  ;;  %v5016_v51 = vmul.f32 %v4948_v45, %v4962_v29  ;;  %v1541_v12 = vadd.f32 %v1509_v3, %v1472_v16  ;;  %v1939_v26 = vsel %vm1347_vm1, %v1937_v53, %v1938_v61  ;;  %v5021_v41 = vld [vmem:[#allocation8 + $0x6] ss:$0 sm:$0xff]  ;;  %v6158_v29 = vld [vmem:[#allocation26_spill] sm:$0xff] }
 0x1fa   : > { %v2068_v0 = vmul.f32 %v5021_v41, %v4789_v50  ;;  %v2251_v58 = vrot.slane %v2143_v55, 1  ;;  %v2252_v40 = vrot.slane %v2144_v19, 1  ;;  %v2496_v28 = vrot.slane %v2388_v34, 2  ;;  %v6148_v34 = vld [vmem:[#allocation22_spill] sm:$0xff] }
 0x1fb   : > { %3522 = vmatmul.mubr.f32.gmra.mxu1 %v2628_v44  ;;  %6144 = vst [vmem:[#allocation40_spill] sm:$0xff] %v5016_v51  ;;  %v1786_v13 = vadd.f32 %v1694_v56, %v1541_v12  ;;  %v2497_v44 = vrot.slane %v2389_v25, 2  ;;  %v840_v14 = vadd.f32 %v4848_v60, %v6145_v31  ;;  %v769_v3 = vadd.f32 %v4848_v60, %v4703_v46 }
 0x1fc   : > { %v2253_v53 = vsel %vm1101_vm0, %v2251_v58, %v2252_v40  ;;  %v981_v42 = vmul.f32 %v4901_v17, %v4550_v23  ;;  %v6147_v51 = vrot.slane %v6146_v47, 1  ;;  %v835_v31 = vadd.f32 %v4848_v60, %v6148_v34 }
 0x1fd   : > { %v2031_v19 = vadd.f32 %v1939_v26, %v1786_v13  ;;  %v2498_v56 = vsel %vm1347_vm1, %v2496_v28, %v2497_v44  ;;  %v5039_v12 = vmax.f32 %v769_v3, 0.0  ;;  %v1695_v58 = vrot.slane %v4738_v37, 1 }
 0x1fe   : > { %v1136_v55 = vsel %vm1101_vm0, %v1133_v30, %v6147_v51  ;;  %v1831_v23 = vmul.f32 %v4920_v2, %v4705_v59  ;;  %v5045_v47 = vmax.f32 %v840_v14, 0.0  ;;  %v6150_v30 = vld [vmem:[#allocation28_spill] sm:$0xff]  ;;  %v1510_v28 = vmul.f32 %v4931_v35, %v4681_v21 }
 0x1ff   : > { %v1227_v25 = vadd.f32 %v1136_v55, %v981_v42  ;;  %v2100_v16 = vadd.f32 %v2068_v0, %v2031_v19  ;;  %v6151_v51 = vrot.slane %v6150_v30, 2  ;;  %v5054_v13 = vmul.f32 %v4857_v8, %v5039_v12 }
 0x200   : > { %6149 = vst [vmem:[#allocation21_spill] sm:$0xff] %v5045_v47  ;;  %v1696_v37 = vsel %vm1101_vm0, %v1693_v63, %v1695_v58  ;;  %v1940_v3 = vrot.slane %v1831_v23, 2  ;;  %v5057_v59 = vmax.f32 %v835_v31, 0.0  ;;  %v5061_v14 = vmul.f32 %v4863_v5, %v5039_v12 }
 0x201   : > { %v1382_v26 = vsel %vm1347_vm1, %v1379_v22, %v6151_v51  ;;  %v2345_v55 = vadd.f32 %v2253_v53, %v2100_v16  ;;  %v2145_v22 = vmul.f32 %v5004_v11, %v4810_v62  ;;  %v5067_v0 = vmul.f32 %v4948_v45, %v5039_v12 }
 0x202   : > { %v1473_v42 = vadd.f32 %v1382_v26, %v1227_v25  ;;  %6152 = vst [vmem:[#allocation27_spill] sm:$0xff] %v5057_v59  ;;  %v1941_v34 = vsel %vm1347_vm1, %v1938_v61, %v1940_v3  ;;  %v2390_v63 = vmul.f32 %v5010_v52, %v4810_v62  ;;  %v783_v31 = vadd.f32 %v4848_v60, %v4712_v48  ;;  %v6153_v25 = vld [vmem:[#allocation23_spill] sm:$0xff]  ;;  %v5082_v61 = vld [vmem:[%s6033_s5] ss:$0 sm:$0xff] }
 0x203   : > { %v2590_v16 = vadd.f32 %v2498_v56, %v2345_v55  ;;  %v2254_v53 = vrot.slane %v2145_v22, 1  ;;  %v845_v58 = vadd.f32 %v4848_v60, %v6153_v25  ;;  %v2069_v51 = vmul.f32 %v5021_v41, %v4770_v39 }
 0x204   : > { %v1542_v19 = vadd.f32 %v1510_v28, %v1473_v42  ;;  %v2499_v26 = vrot.slane %v2390_v63, 2  ;;  %v778_v42 = vadd.f32 %v4848_v60, %v4729_v6  ;;  %v1026_v55 = vmul.f32 %v4857_v8, %v4690_v4 }
 0x205   : > { %v2629_v56 = vadd.f32 %v5082_v61, %v2590_v16  ;;  %v2255_v48 = vsel %vm1101_vm0, %v2252_v40, %v2254_v53  ;;  %v1027_v22 = vmul.f32 %v4857_v8, %v4681_v21  ;;  %v5096_v63 = vmax.f32 %v845_v58, 0.0 }
 0x206   : > { %v1787_v30 = vadd.f32 %v1696_v37, %v1542_v19  ;;  %v2500_v37 = vsel %vm1347_vm1, %v2497_v44, %v2499_v26  ;;  %v5094_v19 = vmax.f32 %v783_v31, 0.0  ;;  %v982_v40 = vmul.f32 %v4901_v17, %v4690_v4 }
 0x207   : > { %3524 = vmatprep.mubr.f32.mxu1 %v2629_v56  ;;  %6154 = vst [vmem:[#allocation22_spill] sm:$0xff] %v5096_v63  ;;  %v1272_v6 = vmul.f32 %v4863_v5, %v4690_v4  ;;  %v1137_v16 = vrot.slane %v1026_v55, 1  ;;  %v1138_v44 = vrot.slane %v1027_v22, 1  ;;  %v1273_v53 = vmul.f32 %v4863_v5, %v4681_v21 }
 0x208   : > { %v2032_v3 = vadd.f32 %v1941_v34, %v1787_v30  ;;  %v5106_v25 = vmul.f32 %v4857_v8, %v5096_v63  ;;  %v5110_v31 = vmul.f32 %v4863_v5, %v5096_v63  ;;  %v1511_v30 = vmul.f32 %v4931_v35, %v4789_v50 }
 0x209   : > { %v1383_v58 = vrot.slane %v1272_v6, 2  ;;  %v1139_v4 = vsel %vm1101_vm0, %v1137_v16, %v1138_v44  ;;  %v1587_v56 = vmul.f32 %v4948_v45, %v4789_v50  ;;  %v1588_v55 = vmul.f32 %v4948_v45, %v4770_v39 }
 0x20a   : > { %v2101_v34 = vadd.f32 %v2069_v51, %v2032_v3  ;;  %6155 = vst [vmem:[#allocation28_spill] sm:$0xff] %v5106_v25  ;;  %6156 = vst [vmem:[#allocation23_spill] sm:$0xff] %v5110_v31  ;;  %v1384_v51 = vrot.slane %v1273_v53, 2  ;;  %v1228_v3 = vadd.f32 %v1139_v4, %v982_v40  ;;  %v1832_v22 = vmul.f32 %v4920_v2, %v4789_v50 }
 0x20b   : > { %v1833_v6 = vmul.f32 %v4920_v2, %v4770_v39  ;;  %v1698_v53 = vrot.slane %v1588_v55, 1  ;;  %v2146_v36 = vmul.f32 %v5004_v11, %v4896_v57  ;;  %v2147_v24 = vmul.f32 %v5004_v11, %v4873_v49 }
 0x20c   : > { %v2346_v26 = vadd.f32 %v2255_v48, %v2101_v34  ;;  %v1385_v28 = vsel %vm1347_vm1, %v1383_v58, %v1384_v51  ;;  %v1697_v48 = vrot.slane %v1587_v56, 1  ;;  %v2070_v34 = vmul.f32 %v5021_v41, %v4896_v57 }
 0x20d   : > { %v1474_v16 = vadd.f32 %v1385_v28, %v1228_v3  ;;  %v1942_v23 = vrot.slane %v1832_v22, 2  ;;  %v1943_v40 = vrot.slane %v1833_v6, 2  ;;  %v2392_v28 = vmul.f32 %v5010_v52, %v4873_v49  ;;  %v6157_v22 = vld [vmem:[#allocation25_spill] sm:$0xff] }
 0x20e   : > { %v2591_v46 = vadd.f32 %v2500_v37, %v2346_v26  ;;  %v2391_v37 = vmul.f32 %v5010_v52, %v4896_v57  ;;  %v1699_v26 = vsel %vm1101_vm0, %v1697_v48, %v1698_v53  ;;  %v2256_v3 = vrot.slane %v2146_v36, 1 }
 0x20f   : > { %v1543_v58 = vadd.f32 %v1511_v30, %v1474_v16  ;;  %v1944_v56 = vsel %vm1347_vm1, %v1942_v23, %v1943_v40  ;;  %v859_v6 = vadd.f32 %v4848_v60, %v6157_v22  ;;  %v2502_v59 = vrot.slane %v2392_v28, 2 }
 0x210   : > { %v2630_v4 = vadd.f32 %v5082_v61, %v2591_v46  ;;  %v2257_v46 = vrot.slane %v2147_v24, 1  ;;  %v2501_v55 = vrot.slane %v2391_v37, 2  ;;  %v854_v1 = vadd.f32 %v4848_v60, %v6158_v29  ;;  %v6159_v24 = vld [vmem:[#allocation33_spill] sm:$0xff] }
 0x211   : > { %v1788_v47 = vadd.f32 %v1699_v26, %v1543_v58  ;;  %v788_v30 = vadd.f32 %v4848_v60, %v4750_v54  ;;  %v5143_v48 = vmax.f32 %v778_v42, 0.0  ;;  %v983_v36 = vmul.f32 %v4901_v17, %v4681_v21 }
 0x212   : > { %3525 = vmatmul.mubr.f32.gmra.mxu1 %v2630_v4  ;;  %v2258_v23 = vsel %vm1101_vm0, %v2256_v3, %v2257_v46  ;;  %v6160_v16 = vrot.slane %v6159_v24, 1  ;;  %v5153_v37 = vmul.f32 %v4948_v45, %v5096_v63  ;;  %v2503_v29 = vsel %vm1347_vm1, %v2501_v55, %v2502_v59  ;;  %v6172_v63 = vld [vmem:[#allocation31_spill] sm:$0xff] }
 0x213   : > { %v2033_v58 = vadd.f32 %v1944_v56, %v1788_v47  ;;  %v5156_v26 = vmax.f32 %v788_v30, 0.0  ;;  %v6162_v28 = vrot.slane %v4720_v9, 2  ;;  %v1700_v3 = vrot.slane %v4837_v7, 1 }
 0x214   : > { %v1141_v4 = vsel %vm1101_vm0, %v1138_v44, %v6160_v16  ;;  %6161 = vst [vmem:[#allocation25_spill] sm:$0xff] %v5153_v37  ;;  %v5164_v24 = vmax.f32 %v859_v6, 0.0  ;;  %v5166_v16 = vmax.f32 %v854_v1, 0.0  ;;  %v1512_v56 = vmul.f32 %v4931_v35, %v4770_v39 }
 0x215   : > { %v1229_v42 = vadd.f32 %v1141_v4, %v983_v36  ;;  %v1387_v21 = vsel %vm1347_vm1, %v1384_v51, %v6162_v28  ;;  %v2102_v22 = vadd.f32 %v2070_v34, %v2033_v58  ;;  %v1701_v55 = vsel %vm1101_vm0, %v1698_v53, %v1700_v3  ;;  %v6167_v36 = vld [vmem:[#allocation35_spill] sm:$0xff]  ;;  %v6168_v58 = vld [vmem:[#allocation29_spill] sm:$0xff] }
 0x216   : > { %6163 = vst [vmem:[#allocation26_spill] sm:$0xff] %v5164_v24  ;;  %6164 = vst [vmem:[#allocation33_spill] sm:$0xff] %v5166_v16  ;;  %v1834_v9 = vmul.f32 %v4920_v2, %v4810_v62  ;;  %v5175_v7 = vmul.f32 %v4857_v8, %v5156_v26  ;;  %v5179_v51 = vmul.f32 %v4863_v5, %v5156_v26  ;;  %v6169_v28 = vld [vmem:[#allocation37_spill] sm:$0xff] }
 0x217   : > { %v1475_v47 = vadd.f32 %v1387_v21, %v1229_v42  ;;  %v2347_v30 = vadd.f32 %v2258_v23, %v2102_v22  ;;  %v2148_v1 = vmul.f32 %v5004_v11, %v4914_v20  ;;  %v2393_v53 = vmul.f32 %v5010_v52, %v4914_v20 }
 0x218   : > { %6165 = vst [vmem:[#allocation41_spill] sm:$0xff] %v5175_v7  ;;  %6166 = vst [vmem:[#allocation42_spill] sm:$0xff] %v5179_v51  ;;  %v1945_v6 = vrot.slane %v1834_v9, 2  ;;  %v802_v62 = vadd.f32 %v4848_v60, %v6167_v36  ;;  %v864_v42 = vadd.f32 %v4848_v60, %v6168_v58  ;;  %v797_v21 = vadd.f32 %v4848_v60, %v6169_v28 }
 0x219   : > { %v1544_v34 = vadd.f32 %v1512_v56, %v1475_v47  ;;  %v2592_v23 = vadd.f32 %v2503_v29, %v2347_v30  ;;  %v2259_v4 = vrot.slane %v2148_v1, 1  ;;  %v5193_v3 = vmul.f32 %v4948_v45, %v5156_v26 }
 0x21a   : > { %v1946_v47 = vsel %vm1347_vm1, %v1943_v40, %v1945_v6  ;;  %v2504_v56 = vrot.slane %v2393_v53, 2  ;;  %v2071_v29 = vmul.f32 %v5021_v41, %v4873_v49  ;;  %v5205_v40 = vmax.f32 %v802_v62, 0.0 }
 0x21b   : > { %v1789_v22 = vadd.f32 %v1701_v55, %v1544_v34  ;;  %v2631_v9 = vadd.f32 %v5082_v61, %v2592_v23  ;;  %v2260_v30 = vsel %vm1101_vm0, %v2257_v46, %v2259_v4  ;;  %v1029_v55 = vmul.f32 %v4857_v8, %v4789_v50 }
 0x21c   : > { %v2505_v28 = vsel %vm1347_vm1, %v2502_v59, %v2504_v56  ;;  %v5207_v34 = vmax.f32 %v864_v42, 0.0  ;;  %v5209_v6 = vmax.f32 %v797_v21, 0.0  ;;  %v1030_v53 = vmul.f32 %v4857_v8, %v4770_v39 }
 0x21d   : > { %v2034_v58 = vadd.f32 %v1946_v47, %v1789_v22  ;;  %3527 = vmatprep.mubr.f32.mxu1 %v2631_v9  ;;  %v1142_v46 = vrot.slane %v1029_v55, 1  ;;  %v1275_v4 = vmul.f32 %v4863_v5, %v4789_v50  ;;  %v1276_v59 = vmul.f32 %v4863_v5, %v4770_v39 }
 0x21e   : > { %6170 = vst [vmem:[#allocation35_spill] sm:$0xff] %v5207_v34  ;;  %v5219_v22 = vmul.f32 %v4857_v8, %v5207_v34  ;;  %v984_v62 = vmul.f32 %v4901_v17, %v4789_v50  ;;  %v1143_v42 = vrot.slane %v1030_v53, 1  ;;  %v1513_v21 = vmul.f32 %v4931_v35, %v4896_v57 }
 0x21f   : > { %v2103_v23 = vadd.f32 %v2071_v29, %v2034_v58  ;;  %v1388_v56 = vrot.slane %v1275_v4, 2  ;;  %v1389_v9 = vrot.slane %v1276_v59, 2  ;;  %v1590_v29 = vmul.f32 %v4948_v45, %v4896_v57 }
 0x220   : > { %v1144_v58 = vsel %vm1101_vm0, %v1142_v46, %v1143_v42  ;;  %v1591_v55 = vmul.f32 %v4948_v45, %v4873_v49  ;;  %v1835_v44 = vmul.f32 %v4920_v2, %v4896_v57  ;;  %v5234_v50 = vmul.f32 %v4920_v2, %v4873_v49 }
 0x221   : > { %v2348_v47 = vadd.f32 %v2260_v30, %v2103_v23  ;;  %v1230_v54 = vadd.f32 %v1144_v58, %v984_v62  ;;  %v1390_v30 = vsel %vm1347_vm1, %v1388_v56, %v1389_v9  ;;  %v1702_v23 = vrot.slane %v1590_v29, 1  ;;  %v806_v62 = vpop.f32.mrf.mxu0 }
 0x222   : > { %v5239_v4 = vmul.f32 %v4863_v5, %v5207_v34  ;;  %v1703_v46 = vrot.slane %v1591_v55, 1  ;;  %v1947_v59 = vrot.slane %v1835_v44, 2  ;;  %v1948_v1 = vrot.slane %v5234_v50, 2  ;;  %v6171_v50 = vld [vmem:[#allocation30_spill] sm:$0xff] }
 0x223   : > { %v2593_v53 = vadd.f32 %v2505_v28, %v2348_v47  ;;  %v1476_v31 = vadd.f32 %v1390_v30, %v1230_v54  ;;  %v2149_v25 = vmul.f32 %v5004_v11, %v4984_v15  ;;  %v2150_v28 = vmul.f32 %v5004_v11, %v4974_v43 }
 0x224   : > { %v1704_v47 = vsel %vm1101_vm0, %v1702_v23, %v1703_v46  ;;  %v1949_v56 = vsel %vm1347_vm1, %v1947_v59, %v1948_v1  ;;  %v2394_v29 = vmul.f32 %v5010_v52, %v4984_v15  ;;  %v2395_v44 = vmul.f32 %v5010_v52, %v4974_v43 }
 0x225   : > { %v2632_v36 = vadd.f32 %v5082_v61, %v2593_v53  ;;  %v1545_v58 = vadd.f32 %v1513_v21, %v1476_v31  ;;  %v2261_v54 = vrot.slane %v2149_v25, 1  ;;  %v2262_v55 = vrot.slane %v2150_v28, 1 }
 0x226   : > { %v878_v53 = vadd.f32 %v4848_v60, %v6171_v50  ;;  %v2506_v30 = vrot.slane %v2394_v29, 2  ;;  %v2507_v37 = vrot.slane %v2395_v44, 2  ;;  %v873_v23 = vadd.f32 %v4848_v60, %v6172_v63 }
 0x227   : > { %3528 = vmatmul.mubr.f32.gmra.mxu1 %v2632_v36  ;;  %v807_v59 = vadd.f32 %v4848_v60, %v806_v62  ;;  %v1790_v51 = vadd.f32 %v1704_v47, %v1545_v58  ;;  %v2072_v7 = vmul.f32 %v5021_v41, %v4984_v15  ;;  %v2263_v33 = vsel %vm1101_vm0, %v2261_v54, %v2262_v55 }
 0x228   : > { %v985_v25 = vmul.f32 %v4901_v17, %v4770_v39  ;;  %v5265_v31 = vmul.f32 %v4948_v45, %v5207_v34  ;;  %v2508_v36 = vsel %vm1347_vm1, %v2506_v30, %v2507_v37  ;;  %v6174_v63 = vrot.slane %v4818_v32, 1 }
 0x229   : > { %v5268_v21 = vmax.f32 %v807_v59, 0.0  ;;  %v2035_v47 = vadd.f32 %v1949_v56, %v1790_v51  ;;  %v6175_v44 = vrot.slane %v4825_v27, 2  ;;  %v5278_v54 = vmax.f32 %v878_v53, 0.0 }
 0x22a   : > { %6173 = vst [vmem:[#allocation29_spill] sm:$0xff] %v5265_v31  ;;  %v1146_v28 = vsel %vm1101_vm0, %v1143_v42, %v6174_v63  ;;  %v5280_v50 = vmax.f32 %v873_v23, 0.0  ;;  %v1705_v30 = vrot.slane %v4952_v18, 1  ;;  %v1514_v42 = vmul.f32 %v4931_v35, %v4873_v49 }
 0x22b   : > { %v1231_v29 = vadd.f32 %v1146_v28, %v985_v25  ;;  %v1392_v39 = vsel %vm1347_vm1, %v1389_v9, %v6175_v44  ;;  %6176 = vst [vmem:[#allocation37_spill] sm:$0xff] %v5278_v54  ;;  %v2104_v59 = vadd.f32 %v2072_v7, %v2035_v47  ;;  %v1837_v51 = vmul.f32 %v4920_v2, %v4914_v20  ;;  %v6179_v28 = vld [vmem:[#allocation34_spill] sm:$0xff] }
 0x22c   : > { %v5289_v27 = vmul.f32 %v4857_v8, %v5268_v21  ;;  %v5293_v9 = vmul.f32 %v4863_v5, %v5268_v21  ;;  %v1706_v56 = vsel %vm1101_vm0, %v1703_v46, %v1705_v30  ;;  %v2151_v18 = vmul.f32 %v5004_v11, %v5039_v12 }
 0x22d   : > { %v1477_v32 = vadd.f32 %v1392_v39, %v1231_v29  ;;  %v2349_v7 = vadd.f32 %v2263_v33, %v2104_v59  ;;  %v1950_v23 = vrot.slane %v1837_v51, 2  ;;  %v2396_v25 = vmul.f32 %v5010_v52, %v5039_v12 }
 0x22e   : > { %6177 = vst [vmem:[#allocation30_spill] sm:$0xff] %v5289_v27  ;;  %6178 = vst [vmem:[#allocation31_spill] sm:$0xff] %v5293_v9  ;;  %v2073_v20 = vmul.f32 %v5021_v41, %v4974_v43  ;;  %v2264_v63 = vrot.slane %v2151_v18, 1  ;;  %v883_v47 = vadd.f32 %v4848_v60, %v6179_v28  ;;  %v1032_v29 = vmul.f32 %v4857_v8, %v4896_v57 }
 0x22f   : > { %v1546_v53 = vadd.f32 %v1514_v42, %v1477_v32  ;;  %v2594_v46 = vadd.f32 %v2508_v36, %v2349_v7  ;;  %v1951_v39 = vsel %vm1347_vm1, %v1948_v1, %v1950_v23  ;;  %v2509_v33 = vrot.slane %v2396_v25, 2 }
 0x230   : > { %v2265_v30 = vsel %vm1101_vm0, %v2262_v55, %v2264_v63  ;;  %v959_v59 = vmax.f32 %v883_v47, 0.0  ;;  %v5310_v32 = vmul.f32 %v4857_v8, %v4873_v49  ;;  %v1147_v42 = vrot.slane %v1032_v29, 1 }
 0x231   : > { %v1791_v44 = vadd.f32 %v1706_v56, %v1546_v53  ;;  %v2633_v51 = vadd.f32 %v5082_v61, %v2594_v46  ;;  %v2510_v28 = vsel %vm1347_vm1, %v2507_v37, %v2509_v33  ;;  %v1278_v36 = vmul.f32 %v4863_v5, %v4896_v57 }
 0x232   : > { %v5320_v55 = vmul.f32 %v4948_v45, %v5268_v21  ;;  %v5323_v7 = vmul.f32 %v4948_v45, %v959_v59  ;;  %v6063_v23 = vrot.slane %v5310_v32, 1  ;;  %v5328_v37 = vmul.f32 %v4863_v5, %v4873_v49 }
 0x233   : > { %v2036_v18 = vadd.f32 %v1951_v39, %v1791_v44  ;;  %3530 = vmatprep.mubr.f32.mxu1 %v2633_v51  ;;  %v1393_v25 = vrot.slane %v1278_v36, 2  ;;  %v5331_v63 = vmul.f32 %v4920_v2, %v959_v59  ;;  %v5334_v47 = vmul.f32 %v5004_v11, %v959_v59 }
 0x234   : > { %6180 = vst [vmem:[#allocation34_spill] sm:$0xff] %v5320_v55  ;;  %v5337_v29 = vmul.f32 %v5010_v52, %v959_v59  ;;  %v986_v46 = vmul.f32 %v4901_v17, %v4896_v57  ;;  %v1149_v44 = vsel %vm1101_vm0, %v1147_v42, %v6063_v23  ;;  %v6064_v39 = vrot.slane %v5328_v37, 2 }
 0x235   : > { %v2105_v53 = vadd.f32 %v2073_v20, %v2036_v18  ;;  %6181 = vst [vmem:[#allocation43_spill] sm:$0xff] %v5334_v47  ;;  %v1515_v33 = vmul.f32 %v4931_v35, %v4984_v15  ;;  %v1593_v18 = vmul.f32 %v4948_v45, %v4984_v15  ;;  %v5351_v59 = vmul.f32 %v4948_v45, %v4974_v43 }
 0x236   : > { %6182 = vst [vmem:[#allocation44_spill] sm:$0xff] %v5337_v29  ;;  %v1232_v51 = vadd.f32 %v1149_v44, %v986_v46  ;;  %v1838_v57 = vmul.f32 %v4920_v2, %v4984_v15  ;;  %v1740_v36 = vrot.slane %v5323_v7, 1  ;;  %v1395_v42 = vsel %vm1347_vm1, %v1393_v25, %v6064_v39 }
 0x237   : > { %v2350_v20 = vadd.f32 %v2265_v30, %v2105_v53  ;;  %v5361_v53 = vmul.f32 %v4920_v2, %v4974_v43  ;;  %v1707_v44 = vrot.slane %v1593_v18, 1  ;;  %v6065_v1 = vrot.slane %v5351_v59, 1 }
 0x238   : > { %v1478_v46 = vadd.f32 %v1395_v42, %v1232_v51  ;;  %v1952_v56 = vrot.slane %v1838_v57, 2  ;;  %v5370_v7 = vmul.f32 %v5004_v11, %v5094_v19  ;;  %v2397_v51 = vmul.f32 %v5010_v52, %v5143_v48 }
 0x239   : > { %v2595_v30 = vadd.f32 %v2510_v28, %v2350_v20  ;;  %v6066_v58 = vrot.slane %v5361_v53, 2  ;;  %v2152_v28 = vmul.f32 %v5004_v11, %v5143_v48  ;;  %v1709_v20 = vsel %vm1101_vm0, %v1707_v44, %v6065_v1 }
 0x23a   : > { %v1547_v25 = vadd.f32 %v1515_v33, %v1478_v46  ;;  %v5379_v18 = vmul.f32 %v5010_v52, %v5094_v19  ;;  %v6067_v42 = vrot.slane %v5370_v7, 1  ;;  %v6183_v33 = vld [vmem:[#allocation36_spill] sm:$0xff]  ;;  %v2074_v44 = vmul.f32 %v5021_v41, %v5143_v48 }
 0x23b   : > { %v2634_v23 = vadd.f32 %v5082_v61, %v2595_v30  ;;  %v1954_v57 = vsel %vm1347_vm1, %v1952_v56, %v6066_v58  ;;  %v2266_v30 = vrot.slane %v2152_v28, 1  ;;  %v897_v46 = vadd.f32 %v4848_v60, %v6183_v33 }
 0x23c   : > { %v1792_v39 = vadd.f32 %v1709_v20, %v1547_v25  ;;  %v2511_v1 = vrot.slane %v2397_v51, 2  ;;  %v6071_v62 = vrot.slane %v5379_v18, 2  ;;  %v1051_v56 = vmul.f32 %v4857_v8, %v5164_v24 }
 0x23d   : > { %3531 = vmatmul.mubr.f32.gmra.mxu1 %v2634_v23  ;;  %v2268_v23 = vsel %vm1101_vm0, %v2266_v30, %v6067_v42  ;;  %v961_v31 = vmax.f32 %v897_v46, 0.0  ;;  %v1297_v28 = vmul.f32 %v4863_v5, %v5164_v24  ;;  %v999_v20 = vmul.f32 %v4901_v17, %v5164_v24 }
 0x23e   : > { %v2037_v58 = vadd.f32 %v1954_v57, %v1792_v39  ;;  %v2513_v25 = vsel %vm1347_vm1, %v2511_v1, %v6071_v62  ;;  %v1612_v51 = vmul.f32 %v4948_v45, %v5278_v54  ;;  %v1985_v30 = vrot.slane %v5331_v63, 2 }
 0x23f   : > { %v1178_v33 = vrot.slane %v1051_v56, 1  ;;  %v1424_v46 = vrot.slane %v1297_v28, 2  ;;  %v1857_v42 = vmul.f32 %v4920_v2, %v5278_v54  ;;  %v5409_v9 = vmul.f32 %v5004_v11, %v961_v31  ;;  %v6187_v28 = vld [vmem:[#allocation38_spill] sm:$0xff] }
 0x240   : > { %v2106_v39 = vadd.f32 %v2074_v44, %v2037_v58  ;;  %v1738_v57 = vrot.slane %v1612_v51, 1  ;;  %v6185_v62 = vrot.slane %v5219_v22, 1  ;;  %v6186_v63 = vrot.slane %v5239_v4, 2 }
 0x241   : > { %6184 = vst [vmem:[#allocation36_spill] sm:$0xff] %v5409_v9  ;;  %v892_v27 = vadd.f32 %v4848_v60, %v6187_v28  ;;  %v1528_v58 = vmul.f32 %v4931_v35, %v5278_v54  ;;  %v2087_v44 = vmul.f32 %v5021_v41, %v961_v31  ;;  %v1983_v1 = vrot.slane %v1857_v42, 2 }
 0x242   : > { %v1181_v24 = vsel %vm1101_vm0, %v1178_v33, %v6185_v62  ;;  %v1427_v56 = vsel %vm1347_vm1, %v1424_v46, %v6186_v63  ;;  %v2351_v55 = vadd.f32 %v2268_v23, %v2106_v39  ;;  %v1741_v51 = vsel %vm1101_vm0, %v1738_v57, %v1740_v36 }
 0x243   : > { %v1245_v34 = vadd.f32 %v1181_v24, %v999_v20  ;;  %v5426_v62 = vmul.f32 %v5010_v52, %v961_v31  ;;  %v1050_v28 = vmul.f32 %v4857_v8, %v5166_v16  ;;  %v1296_v24 = vmul.f32 %v4863_v5, %v5166_v16 }
 0x244   : > { %v2596_v4 = vadd.f32 %v2513_v25, %v2351_v55  ;;  %v960_v23 = vmax.f32 %v892_v27, 0.0  ;;  %v998_v20 = vmul.f32 %v4901_v17, %v5166_v16  ;;  %v1611_v36 = vmul.f32 %v4948_v45, %v5280_v50 }
 0x245   : > { %v1491_v63 = vadd.f32 %v1427_v56, %v1245_v34  ;;  %v1856_v42 = vmul.f32 %v4920_v2, %v5280_v50  ;;  %v1177_v34 = vrot.slane %v1050_v28, 1  ;;  %v1423_v25 = vrot.slane %v1296_v24, 2 }
 0x246   : > { %v2635_v31 = vadd.f32 %v5082_v61, %v2596_v4  ;;  %v1986_v39 = vsel %vm1347_vm1, %v1983_v1, %v1985_v30  ;;  %v2542_v56 = vrot.slane %v5426_v62, 2  ;;  %v1737_v22 = vrot.slane %v1611_v36, 1  ;;  %v2904_v62 = vld [vmem:[%s4170_s18 + $0x38] sm:$0xff] }
 0x247   : > { %v1560_v55 = vadd.f32 %v1528_v58, %v1491_v63  ;;  %v1982_v27 = vrot.slane %v1856_v42, 2  ;;  %v1179_v47 = vsel %vm1101_vm0, %v1177_v34, %v1178_v33  ;;  %v1425_v9 = vsel %vm1347_vm1, %v1423_v25, %v1424_v46 }
 0x248   : > { %3533 = vmatprep.mubr.f32.mxu1 %v2635_v31  ;;  %v1527_v54 = vmul.f32 %v4931_v35, %v5280_v50  ;;  %v1244_v16 = vadd.f32 %v1179_v47, %v998_v20  ;;  %v5446_v58 = vmul.f32 %v5021_v41, %v960_v23  ;;  %v5449_v4 = vmul.f32 %v5004_v11, %v960_v23 }
 0x249   : > { %v1805_v29 = vadd.f32 %v1741_v51, %v1560_v55  ;;  %v987_v30 = vmul.f32 %v4901_v17, %v4873_v49  ;;  %v1739_v63 = vsel %vm1101_vm0, %v1737_v22, %v1738_v57  ;;  %v5455_v51 = vmul.f32 %v5010_v52, %v960_v23  ;;  %v901_v22 = vpop.f32.mrf.mxu1 }
 0x24a   : > { %v6188_v33 = vrot.slane %v4929_v10, 1  ;;  %v6189_v46 = vrot.slane %v5310_v32, 1  ;;  %v6190_v28 = vrot.slane %v4946_v38, 2  ;;  %v6191_v24 = vrot.slane %v5328_v37, 2 }
 0x24b   : > { %v1490_v36 = vadd.f32 %v1425_v9, %v1244_v16  ;;  %v1984_v49 = vsel %vm1347_vm1, %v1982_v27, %v1983_v1  ;;  %v1710_v57 = vrot.slane %v5067_v0, 1  ;;  %v2050_v23 = vadd.f32 %v1986_v39, %v1805_v29 }
 0x24c   : > { %v1151_v47 = vsel %vm1101_vm0, %v6189_v46, %v6188_v33  ;;  %v1397_v20 = vsel %vm1347_vm1, %v6191_v24, %v6190_v28  ;;  %v1516_v10 = vmul.f32 %v4931_v35, %v4974_v43  ;;  %v1840_v32 = vmul.f32 %v4920_v2, %v5039_v12 }
 0x24d   : > { %v1233_v42 = vadd.f32 %v1151_v47, %v987_v30  ;;  %v2154_v38 = vmul.f32 %v5004_v11, %v5156_v26  ;;  %v1559_v37 = vadd.f32 %v1527_v54, %v1490_v36  ;;  %v6192_v16 = vrot.slane %v5351_v59, 1 }
 0x24e   : > { %v2399_v0 = vmul.f32 %v5010_v52, %v5156_v26  ;;  %v2296_v29 = vrot.slane %v5449_v4, 1  ;;  %v1955_v1 = vrot.slane %v1840_v32, 2  ;;  %v902_v34 = vadd.f32 %v4848_v60, %v901_v22  ;;  %v6233_v4 = vld [vmem:[#allocation44_spill] sm:$0xff] }
 0x24f   : > { %v1479_v31 = vadd.f32 %v1397_v20, %v1233_v42  ;;  %v1711_v9 = vsel %vm1101_vm0, %v6192_v16, %v1710_v57  ;;  %v2269_v55 = vrot.slane %v2154_v38, 1  ;;  %v1804_v25 = vadd.f32 %v1739_v63, %v1559_v37 }
 0x250   : > { %v2514_v39 = vrot.slane %v2399_v0, 2  ;;  %v1035_v54 = vmul.f32 %v4857_v8, %v4984_v15  ;;  %v2541_v27 = vrot.slane %v5455_v51, 2  ;;  %v6193_v59 = vrot.slane %v5361_v53, 2 }
 0x251   : > { %v1548_v12 = vadd.f32 %v1516_v10, %v1479_v31  ;;  %v962_v33 = vmax.f32 %v902_v34, 0.0  ;;  %v1036_v46 = vmul.f32 %v4857_v8, %v4974_v43  ;;  %v5490_v47 = vadd.f32 %v2087_v44, %v2050_v23 }
 0x252   : > { %v1956_v30 = vsel %vm1347_vm1, %v6193_v59, %v1955_v1  ;;  %v2075_v60 = vmul.f32 %v5021_v41, %v5094_v19  ;;  %v1152_v63 = vrot.slane %v1035_v54, 1  ;;  %v6194_v24 = vrot.slane %v5370_v7, 1 }
 0x253   : > { %v1793_v28 = vadd.f32 %v1711_v9, %v1548_v12  ;;  %v988_v53 = vmul.f32 %v4901_v17, %v4984_v15  ;;  %v1153_v36 = vrot.slane %v1036_v46, 1  ;;  %v1281_v42 = vmul.f32 %v4863_v5, %v4984_v15 }
 0x254   : > { %v2270_v20 = vsel %vm1101_vm0, %v6194_v24, %v2269_v55  ;;  %v5501_v57 = vadd.f32 %v1984_v49, %v1804_v25  ;;  %v6195_v44 = vrot.slane %v5379_v18, 2  ;;  %v1282_v23 = vmul.f32 %v4863_v5, %v4974_v43 }
 0x255   : > { %v2038_v8 = vadd.f32 %v1956_v30, %v1793_v28  ;;  %v5509_v7 = vmul.f32 %v5004_v11, %v962_v33  ;;  %v5512_v10 = vmul.f32 %v5010_v52, %v962_v33  ;;  %v1154_v32 = vsel %vm1101_vm0, %v1152_v63, %v1153_v36 }
 0x256   : > { %v2515_v22 = vsel %vm1347_vm1, %v6195_v44, %v2514_v39  ;;  %v1398_v38 = vrot.slane %v1281_v42, 2  ;;  %v1234_v49 = vadd.f32 %v1154_v32, %v988_v53  ;;  %v1399_v37 = vrot.slane %v1282_v23, 2 }
 0x257   : > { %v2107_v15 = vadd.f32 %v2075_v60, %v2038_v8  ;;  %v1596_v18 = vmul.f32 %v4948_v45, %v5143_v48  ;;  %v1517_v31 = vmul.f32 %v4931_v35, %v5143_v48  ;;  %v1597_v5 = vmul.f32 %v4948_v45, %v5094_v19 }
 0x258   : > { %v1841_v16 = vmul.f32 %v4920_v2, %v5143_v48  ;;  %v1842_v9 = vmul.f32 %v4920_v2, %v5094_v19  ;;  %v1400_v1 = vsel %vm1347_vm1, %v1398_v38, %v1399_v37  ;;  %v2076_v34 = vmul.f32 %v5021_v41, %v5209_v6 }
 0x259   : > { %v2352_v0 = vadd.f32 %v2270_v20, %v2107_v15  ;;  %v1712_v55 = vrot.slane %v1596_v18, 1  ;;  %v1480_v25 = vadd.f32 %v1400_v1, %v1234_v49  ;;  %v1713_v12 = vrot.slane %v1597_v5, 1 }
 0x25a   : > { %v1957_v39 = vrot.slane %v1841_v16, 2  ;;  %v1958_v54 = vrot.slane %v1842_v9, 2  ;;  %v2155_v30 = vmul.f32 %v5004_v11, %v5209_v6  ;;  %v2156_v33 = vmul.f32 %v5004_v11, %v5205_v40 }
 0x25b   : > { %v2597_v59 = vadd.f32 %v2515_v22, %v2352_v0  ;;  %v2400_v46 = vmul.f32 %v5010_v52, %v5209_v6  ;;  %v1549_v28 = vadd.f32 %v1517_v31, %v1480_v25  ;;  %v1714_v60 = vsel %vm1101_vm0, %v1712_v55, %v1713_v12 }
 0x25c   : > { %v1959_v63 = vsel %vm1347_vm1, %v1957_v39, %v1958_v54  ;;  %v2401_v24 = vmul.f32 %v5010_v52, %v5205_v40  ;;  %v2271_v53 = vrot.slane %v2155_v30, 1  ;;  %v2272_v42 = vrot.slane %v2156_v33, 1 }
 0x25d   : > { %v2636_v20 = vadd.f32 %v5082_v61, %v2597_v59  ;;  %v2516_v8 = vrot.slane %v2400_v46, 2  ;;  %v1794_v44 = vadd.f32 %v1714_v60, %v1549_v28  ;;  %v989_v23 = vmul.f32 %v4901_v17, %v4974_v43 }
 0x25e   : > { %v2517_v22 = vrot.slane %v2401_v24, 2  ;;  %v6196_v32 = vrot.slane %v5054_v13, 1  ;;  %v2273_v15 = vsel %vm1101_vm0, %v2271_v53, %v2272_v42  ;;  %v6197_v49 = vrot.slane %v5061_v14, 2 }
 0x25f   : > { %3534 = vmatmul.mubr.f32.gmra.mxu1 %v2636_v20  ;;  %v1518_v31 = vmul.f32 %v4931_v35, %v5094_v19  ;;  %v1715_v5 = vrot.slane %v5193_v3, 1  ;;  %v2039_v16 = vadd.f32 %v1959_v63, %v1794_v44  ;;  %v1843_v13 = vmul.f32 %v4920_v2, %v5156_v26  ;;  %v5563_v2 = vld [vmem:[#allocation8 + $0x1] ss:$0 sm:$0xff] }
 0x260   : > { %v1156_v38 = vsel %vm1101_vm0, %v1153_v36, %v6196_v32  ;;  %v1402_v18 = vsel %vm1347_vm1, %v1399_v37, %v6197_v49  ;;  %v2518_v9 = vsel %vm1347_vm1, %v2516_v8, %v2517_v22  ;;  %v2077_v0 = vmul.f32 %v5021_v41, %v5205_v40 }
 0x261   : > { %v1235_v43 = vadd.f32 %v1156_v38, %v989_v23  ;;  %v1716_v36 = vsel %vm1101_vm0, %v1713_v12, %v1715_v5  ;;  %v2157_v14 = vmul.f32 %v5004_v11, %v5268_v21  ;;  %v2402_v37 = vmul.f32 %v5010_v52, %v5268_v21 }
 0x262   : > { %v2108_v1 = vadd.f32 %v2076_v34, %v2039_v16  ;;  %v1960_v55 = vrot.slane %v1843_v13, 2  ;;  %v990_v25 = vmul.f32 %v4901_v17, %v5143_v48  ;;  %v1038_v26 = vmul.f32 %v5563_v2, %v5143_v48  ;;  %v5570_v34 = vld [vmem:[#allocation8 + $0x2] ss:$0 sm:$0xff] }
 0x263   : > { %v1481_v3 = vadd.f32 %v1402_v18, %v1235_v43  ;;  %v2274_v39 = vrot.slane %v2157_v14, 1  ;;  %v2519_v59 = vrot.slane %v2402_v37, 2  ;;  %v1039_v12 = vmul.f32 %v5563_v2, %v5094_v19 }
 0x264   : > { %v2353_v30 = vadd.f32 %v2273_v15, %v2108_v1  ;;  %v1961_v46 = vsel %vm1347_vm1, %v1958_v54, %v1960_v55  ;;  %v1284_v28 = vmul.f32 %v5570_v34, %v5143_v48  ;;  %v1157_v63 = vrot.slane %v1038_v26, 1  ;;  %v6199_v55 = vld [vmem:[#allocation24_spill] sm:$0xff] }
 0x265   : > { %v1550_v33 = vadd.f32 %v1518_v31, %v1481_v3  ;;  %v2275_v17 = vsel %vm1101_vm0, %v2272_v42, %v2274_v39  ;;  %v2520_v60 = vsel %vm1347_vm1, %v2517_v22, %v2519_v59  ;;  %v1158_v24 = vrot.slane %v1039_v12, 1  ;;  %v5586_v31 = vld [vmem:[#allocation8 + $0x5] ss:$0 sm:$0xff] }
 0x266   : > { %v2598_v20 = vadd.f32 %v2518_v9, %v2353_v30  ;;  %v1285_v8 = vmul.f32 %v5570_v34, %v5094_v19  ;;  %v1403_v44 = vrot.slane %v1284_v28, 2  ;;  %v1519_v54 = vmul.f32 %v4931_v35, %v5209_v6  ;;  %v5605_v30 = vld [vmem:[#allocation8] ss:$0 sm:$0xff] }
 0x267   : > { %v1795_v53 = vadd.f32 %v1716_v36, %v1550_v33  ;;  %v1159_v23 = vsel %vm1101_vm0, %v1157_v63, %v1158_v24  ;;  %v1599_v48 = vmul.f32 %v4948_v45, %v5209_v6  ;;  %v1600_v42 = vmul.f32 %v4948_v45, %v5205_v40  ;;  %v6198_v45 = vld [vmem:[#allocation19_spill] sm:$0xff]  ;;  %v6200_v63 = vld [vmem:[#allocation41_spill] sm:$0xff] }
 0x268   : > { %v2637_v22 = vadd.f32 %v5082_v61, %v2598_v20  ;;  %v1236_v38 = vadd.f32 %v1159_v23, %v990_v25  ;;  %v1404_v15 = vrot.slane %v1285_v8, 2  ;;  %v1844_v5 = vmul.f32 %v5586_v31, %v5209_v6 }
 0x269   : > { %v2040_v32 = vadd.f32 %v1961_v46, %v1795_v53  ;;  %v1717_v49 = vrot.slane %v1599_v48, 1  ;;  %v1718_v18 = vrot.slane %v1600_v42, 1  ;;  %v1845_v35 = vmul.f32 %v5586_v31, %v5205_v40 }
 0x26a   : > { %3536 = vmatprep.mubr.f32.mxu1 %v2637_v22  ;;  %v1405_v9 = vsel %vm1347_vm1, %v1403_v44, %v1404_v15  ;;  %v2078_v43 = vmul.f32 %v5021_v41, %v6198_v45  ;;  %v2158_v13 = vmul.f32 %v5004_v11, %v6198_v45  ;;  %v1962_v37 = vrot.slane %v1844_v5, 2 }
 0x26b   : > { %v2109_v16 = vadd.f32 %v2077_v0, %v2040_v32  ;;  %v1482_v36 = vadd.f32 %v1405_v9, %v1236_v38  ;;  %v1719_v14 = vsel %vm1101_vm0, %v1717_v49, %v1718_v18  ;;  %v1963_v1 = vrot.slane %v1845_v35, 2  ;;  %v5617_v38 = vld [vmem:[#allocation8 + $0x3] ss:$0 sm:$0xff] }
 0x26c   : > { %v2159_v25 = vmul.f32 %v5004_v11, %v6199_v55  ;;  %v2276_v39 = vrot.slane %v2158_v13, 1  ;;  %v2403_v0 = vmul.f32 %v5010_v52, %v6198_v45  ;;  %v2404_v12 = vmul.f32 %v5010_v52, %v6199_v55  ;;  %v6205_v13 = vld [vmem:[#allocation20_spill] sm:$0xff] }
 0x26d   : > { %v2354_v3 = vadd.f32 %v2275_v17, %v2109_v16  ;;  %v1551_v59 = vadd.f32 %v1519_v54, %v1482_v36  ;;  %v1964_v26 = vsel %vm1347_vm1, %v1962_v37, %v1963_v1  ;;  %v991_v33 = vmul.f32 %v5605_v30, %v5094_v19  ;;  %v6202_v54 = vld [vmem:[#allocation42_spill] sm:$0xff] }
 0x26e   : > { %v2277_v28 = vrot.slane %v2159_v25, 1  ;;  %v2521_v17 = vrot.slane %v2403_v0, 2  ;;  %v6201_v20 = vrot.slane %v6200_v63, 1  ;;  %v2522_v44 = vrot.slane %v2404_v12, 2 }
 0x26f   : > { %v2599_v46 = vadd.f32 %v2520_v60, %v2354_v3  ;;  %v1796_v8 = vadd.f32 %v1719_v14, %v1551_v59  ;;  %v6203_v48 = vrot.slane %v6202_v54, 2  ;;  %v1520_v19 = vmul.f32 %v5617_v38, %v5205_v40  ;;  %v6204_v60 = vld [vmem:[#allocation34_spill] sm:$0xff] }
 0x270   : > { %v1161_v53 = vsel %vm1101_vm0, %v1158_v24, %v6201_v20  ;;  %v2278_v32 = vsel %vm1101_vm0, %v2276_v39, %v2277_v28  ;;  %v1720_v49 = vrot.slane %v6204_v60, 1  ;;  %v2523_v24 = vsel %vm1347_vm1, %v2521_v17, %v2522_v44 }
 0x271   : > { %v1237_v23 = vadd.f32 %v1161_v53, %v991_v33  ;;  %v1407_v42 = vsel %vm1347_vm1, %v1404_v15, %v6203_v48  ;;  %v2638_v22 = vadd.f32 %v5082_v61, %v2599_v46  ;;  %v2041_v5 = vadd.f32 %v1964_v26, %v1796_v8 }
 0x272   : > { %v1846_v16 = vmul.f32 %v5586_v31, %v5268_v21  ;;  %v1721_v15 = vsel %vm1101_vm0, %v1718_v18, %v1720_v49  ;;  %v2079_v9 = vmul.f32 %v5021_v41, %v6199_v55  ;;  %v2160_v36 = vmul.f32 %v5004_v11, %v6205_v13 }
 0x273   : > { %v1483_v35 = vadd.f32 %v1407_v42, %v1237_v23  ;;  %3537 = vmatmul.mubr.f32.gmra.mxu1 %v2638_v22  ;;  %v2405_v14 = vmul.f32 %v5010_v52, %v6205_v13  ;;  %v2110_v37 = vadd.f32 %v2078_v43, %v2041_v5  ;;  %v992_v39 = vmul.f32 %v5605_v30, %v5209_v6  ;;  %v5648_v23 = vld [vmem:[#allocation8 + $0x4] ss:$0 sm:$0xff] }
 0x274   : > { %v1965_v25 = vrot.slane %v1846_v16, 2  ;;  %v2279_v0 = vrot.slane %v2160_v36, 1  ;;  %v1041_v18 = vmul.f32 %v5563_v2, %v5209_v6  ;;  %v1042_v41 = vmul.f32 %v5563_v2, %v5205_v40 }
 0x275   : > { %v1552_v3 = vadd.f32 %v1520_v19, %v1483_v35  ;;  %v2524_v21 = vrot.slane %v2405_v14, 2  ;;  %v2355_v59 = vadd.f32 %v2278_v32, %v2110_v37  ;;  %v1287_v52 = vmul.f32 %v5570_v34, %v5209_v6  ;;  %v6206_v35 = vld [vmem:[#allocation27_spill] sm:$0xff] }
 0x276   : > { %v1966_v11 = vsel %vm1347_vm1, %v1963_v1, %v1965_v25  ;;  %v2280_v43 = vsel %vm1101_vm0, %v2277_v28, %v2279_v0  ;;  %v1162_v33 = vrot.slane %v1041_v18, 1  ;;  %v1163_v46 = vrot.slane %v1042_v41, 1  ;;  %v5671_v18 = vld [vmem:[#allocation8 + $0x8] ss:$0 sm:$0xff] }
 0x277   : > { %v1797_v26 = vadd.f32 %v1721_v15, %v1552_v3  ;;  %v2525_v12 = vsel %vm1347_vm1, %v2522_v44, %v2524_v21  ;;  %v2600_v17 = vadd.f32 %v2523_v24, %v2355_v59  ;;  %v1288_v20 = vmul.f32 %v5570_v34, %v5205_v40  ;;  %v5660_v24 = vld [vmem:[#allocation8 + $0x6] ss:$0 sm:$0xff]  ;;  %v5664_v15 = vld [vmem:[#allocation8 + $0x7] ss:$0 sm:$0xff] }
 0x278   : > { %v1408_v53 = vrot.slane %v1287_v52, 2  ;;  %v1164_v8 = vsel %vm1101_vm0, %v1162_v33, %v1163_v46  ;;  %v1521_v1 = vmul.f32 %v5617_v38, %v6198_v45  ;;  %v1602_v6 = vmul.f32 %v5648_v23, %v6198_v45 }
 0x279   : > { %v2042_v63 = vadd.f32 %v1966_v11, %v1797_v26  ;;  %v1603_v28 = vmul.f32 %v5648_v23, %v6199_v55  ;;  %v2639_v44 = vadd.f32 %v5082_v61, %v2600_v17  ;;  %v1238_v48 = vadd.f32 %v1164_v8, %v992_v39  ;;  %v6207_v39 = vld [vmem:[#allocation21_spill] sm:$0xff]  ;;  %v6208_v17 = vld [vmem:[#allocation30_spill] sm:$0xff] }
 0x27a   : > { %v1409_v42 = vrot.slane %v1288_v20, 2  ;;  %v1722_v22 = vrot.slane %v1602_v6, 1  ;;  %v1847_v19 = vmul.f32 %v5586_v31, %v6198_v45  ;;  %v1848_v60 = vmul.f32 %v5586_v31, %v6199_v55 }
 0x27b   : > { %v2111_v54 = vadd.f32 %v2079_v9, %v2042_v63  ;;  %v1723_v32 = vrot.slane %v1603_v28, 1  ;;  %3539 = vmatprep.mubr.f32.mxu1 %v2639_v44  ;;  %v2080_v16 = vmul.f32 %v5660_v24, %v6206_v35  ;;  %v2161_v9 = vmul.f32 %v5664_v15, %v6206_v35 }
 0x27c   : > { %v1410_v5 = vsel %vm1347_vm1, %v1408_v53, %v1409_v42  ;;  %v1967_v37 = vrot.slane %v1847_v19, 2  ;;  %v1968_v3 = vrot.slane %v1848_v60, 2  ;;  %v2162_v0 = vmul.f32 %v5664_v15, %v6207_v39 }
 0x27d   : > { %v2356_v49 = vadd.f32 %v2280_v43, %v2111_v54  ;;  %v1484_v36 = vadd.f32 %v1410_v5, %v1238_v48  ;;  %v1724_v14 = vsel %vm1101_vm0, %v1722_v22, %v1723_v32  ;;  %v2281_v21 = vrot.slane %v2161_v9, 1  ;;  %v6213_v9 = vld [vmem:[#allocation22_spill] sm:$0xff] }
 0x27e   : > { %v2406_v41 = vmul.f32 %v5671_v18, %v6206_v35  ;;  %v1969_v26 = vsel %vm1347_vm1, %v1967_v37, %v1968_v3  ;;  %v2407_v11 = vmul.f32 %v5671_v18, %v6207_v39  ;;  %v993_v52 = vmul.f32 %v5605_v30, %v5205_v40 }
 0x27f   : > { %v2601_v25 = vadd.f32 %v2525_v12, %v2356_v49  ;;  %v1553_v59 = vadd.f32 %v1521_v1, %v1484_v36  ;;  %v2282_v12 = vrot.slane %v2162_v0, 1  ;;  %v6209_v63 = vrot.slane %v6208_v17, 1  ;;  %v6210_v1 = vld [vmem:[#allocation31_spill] sm:$0xff] }
 0x280   : > { %v2526_v33 = vrot.slane %v2406_v41, 2  ;;  %v2527_v8 = vrot.slane %v2407_v11, 2  ;;  %v6211_v28 = vrot.slane %v6210_v1, 2  ;;  %v1522_v40 = vmul.f32 %v5617_v38, %v6199_v55 }
 0x281   : > { %v2640_v43 = vadd.f32 %v5082_v61, %v2601_v25  ;;  %v1166_v20 = vsel %vm1101_vm0, %v1163_v46, %v6209_v63  ;;  %v1798_v53 = vadd.f32 %v1724_v14, %v1553_v59  ;;  %v2283_v54 = vsel %vm1101_vm0, %v2281_v21, %v2282_v12  ;;  %v6212_v61 = vld [vmem:[#allocation40_spill] sm:$0xff] }
 0x282   : > { %v1239_v6 = vadd.f32 %v1166_v20, %v993_v52  ;;  %v1412_v44 = vsel %vm1347_vm1, %v1409_v42, %v6211_v28  ;;  %v1725_v48 = vrot.slane %v6212_v61, 1  ;;  %v1849_v22 = vmul.f32 %v5586_v31, %v6205_v13 }
 0x283   : > { %3540 = vmatmul.mubr.f32.gmra.mxu1 %v2640_v43  ;;  %v2043_v19 = vadd.f32 %v1969_v26, %v1798_v53  ;;  %v2528_v46 = vsel %vm1347_vm1, %v2526_v33, %v2527_v8  ;;  %v2081_v49 = vmul.f32 %v5660_v24, %v6207_v39  ;;  %v2163_v36 = vmul.f32 %v5664_v15, %v6213_v9 }
 0x284   : > { %v1485_v60 = vadd.f32 %v1412_v44, %v1239_v6  ;;  %v1726_v42 = vsel %vm1101_vm0, %v1723_v32, %v1725_v48  ;;  %v1970_v5 = vrot.slane %v1849_v22, 2  ;;  %v2408_v14 = vmul.f32 %v5671_v18, %v6213_v9 }
 0x285   : > { %v2112_v37 = vadd.f32 %v2080_v16, %v2043_v19  ;;  %v994_v13 = vmul.f32 %v5605_v30, %v6198_v45  ;;  %v1044_v0 = vmul.f32 %v5563_v2, %v6198_v45  ;;  %v2284_v41 = vrot.slane %v2163_v36, 1  ;;  %v6214_v36 = vld [vmem:[#allocation33_spill] sm:$0xff] }
 0x286   : > { %v1554_v25 = vadd.f32 %v1522_v40, %v1485_v60  ;;  %v1971_v21 = vsel %vm1347_vm1, %v1968_v3, %v1970_v5  ;;  %v2529_v59 = vrot.slane %v2408_v14, 2  ;;  %v1045_v32 = vmul.f32 %v5563_v2, %v6199_v55 }
 0x287   : > { %v2357_v26 = vadd.f32 %v2283_v54, %v2112_v37  ;;  %v1167_v52 = vrot.slane %v1044_v0, 1  ;;  %v1290_v16 = vmul.f32 %v5570_v34, %v6198_v45  ;;  %v2285_v43 = vsel %vm1101_vm0, %v2282_v12, %v2284_v41 }
 0x288   : > { %v1799_v11 = vadd.f32 %v1726_v42, %v1554_v25  ;;  %v2530_v33 = vsel %vm1347_vm1, %v2527_v8, %v2529_v59  ;;  %v1168_v17 = vrot.slane %v1045_v32, 1  ;;  %v1291_v63 = vmul.f32 %v5570_v34, %v6199_v55  ;;  %v5724_v8 = vld [vmem:[%s6033_s5] ss:$0 sm:$0xff] }
 0x289   : > { %v2602_v3 = vadd.f32 %v2528_v46, %v2357_v26  ;;  %v1413_v53 = vrot.slane %v1290_v16, 2  ;;  %v1523_v6 = vmul.f32 %v5617_v38, %v6206_v35  ;;  %v1605_v45 = vmul.f32 %v5648_v23, %v6206_v35 }
 0x28a   : > { %v2044_v20 = vadd.f32 %v1971_v21, %v1799_v11  ;;  %v1169_v1 = vsel %vm1101_vm0, %v1167_v52, %v1168_v17  ;;  %v1414_v28 = vrot.slane %v1291_v63, 2  ;;  %v1606_v12 = vmul.f32 %v5648_v23, %v6207_v39 }
 0x28b   : > { %v2641_v44 = vadd.f32 %v5724_v8, %v2602_v3  ;;  %v1240_v40 = vadd.f32 %v1169_v1, %v994_v13  ;;  %v1850_v61 = vmul.f32 %v5586_v31, %v6206_v35  ;;  %v1727_v22 = vrot.slane %v1605_v45, 1  ;;  %v6215_v13 = vld [vmem:[#allocation26_spill] sm:$0xff]  ;;  %v6216_v1 = vld [vmem:[#allocation32_spill] sm:$0xff] }
 0x28c   : > { %v2113_v54 = vadd.f32 %v2081_v49, %v2044_v20  ;;  %v1415_v48 = vsel %vm1347_vm1, %v1413_v53, %v1414_v28  ;;  %v1728_v19 = vrot.slane %v1606_v12, 1  ;;  %v1851_v46 = vmul.f32 %v5586_v31, %v6207_v39 }
 0x28d   : > { %3542 = vmatprep.mubr.f32.mxu1 %v2641_v44  ;;  %v1486_v42 = vadd.f32 %v1415_v48, %v1240_v40  ;;  %v1972_v5 = vrot.slane %v1850_v61, 2  ;;  %v2082_v14 = vmul.f32 %v5660_v24, %v6214_v36  ;;  %v2164_v25 = vmul.f32 %v5664_v15, %v6214_v36  ;;  %v6218_v44 = vld [vmem:[#allocation39_spill] sm:$0xff] }
 0x28e   : > { %v2358_v60 = vadd.f32 %v2285_v43, %v2113_v54  ;;  %v1729_v49 = vsel %vm1101_vm0, %v1727_v22, %v1728_v19  ;;  %v1973_v37 = vrot.slane %v1851_v46, 2  ;;  %v2165_v0 = vmul.f32 %v5664_v15, %v6215_v13  ;;  %v6220_v22 = vld [vmem:[#allocation25_spill] sm:$0xff] }
 0x28f   : > { %v1555_v41 = vadd.f32 %v1523_v6, %v1486_v42  ;;  %v2409_v59 = vmul.f32 %v5671_v18, %v6214_v36  ;;  %v2410_v32 = vmul.f32 %v5671_v18, %v6215_v13  ;;  %v2286_v11 = vrot.slane %v2164_v25, 1 }
 0x290   : > { %v2603_v21 = vadd.f32 %v2530_v33, %v2358_v60  ;;  %v1974_v26 = vsel %vm1347_vm1, %v1972_v5, %v1973_v37  ;;  %v2287_v52 = vrot.slane %v2165_v0, 1  ;;  %v995_v16 = vmul.f32 %v5605_v30, %v6199_v55  ;;  %v5747_v33 = vpop.f32.mrf.mxu1  ;;  %v6221_v5 = vld [vmem:[#allocation35_spill] sm:$0xff] }
 0x291   : > { %v1800_v63 = vadd.f32 %v1729_v49, %v1555_v41  ;;  %v2531_v3 = vrot.slane %v2409_v59, 2  ;;  %v2532_v20 = vrot.slane %v2410_v32, 2  ;;  %v2299_v53 = vrot.slane %v5509_v7, 1 }
 0x292   : > { %v2642_v43 = vadd.f32 %v5724_v8, %v2603_v21  ;;  %v2288_v6 = vsel %vm1101_vm0, %v2286_v11, %v2287_v52  ;;  %v6217_v45 = vrot.slane %v6216_v1, 1  ;;  %v6219_v54 = vrot.slane %v6218_v44, 2  ;;  %v5770_v41 = vpop.f32.mrf.mxu1 }
 0x293   : > { %v2045_v55 = vadd.f32 %v1974_v26, %v1800_v63  ;;  %v1524_v48 = vmul.f32 %v5617_v38, %v6207_v39  ;;  %v1730_v46 = vrot.slane %v6220_v22, 1  ;;  %v2533_v60 = vsel %vm1347_vm1, %v2531_v3, %v2532_v20 }
 0x294   : > { %v1171_v12 = vsel %vm1101_vm0, %v1168_v17, %v6217_v45  ;;  %v1417_v40 = vsel %vm1347_vm1, %v1414_v28, %v6219_v54  ;;  %3543 = vmatmul.mubr.f32.gmra.mxu1 %v2642_v43  ;;  %v1852_v42 = vmul.f32 %v5586_v31, %v6213_v9  ;;  %v2166_v17 = vmul.f32 %v5664_v15, %v6221_v5  ;;  %v5780_v43 = vpop.f32.mrf.mxu1 }
 0x295   : > { %v1241_v61 = vadd.f32 %v1171_v12, %v995_v16  ;;  %v2411_v49 = vmul.f32 %v5671_v18, %v6221_v5  ;;  %v2114_v28 = vadd.f32 %v2082_v14, %v2045_v55  ;;  %v1731_v0 = vsel %vm1101_vm0, %v1728_v19, %v1730_v46 }
 0x296   : > { %v2083_v21 = vmul.f32 %v5660_v24, %v6215_v13  ;;  %v1975_v59 = vrot.slane %v1852_v42, 2  ;;  %v2289_v32 = vrot.slane %v2166_v17, 1  ;;  %v996_v9 = vmul.f32 %v5605_v30, %v6206_v35  ;;  %v5794_v22 = vpop.f32.mrf.mxu1 }
 0x297   : > { %v1487_v25 = vadd.f32 %v1417_v40, %v1241_v61  ;;  %v1047_v26 = vmul.f32 %v5563_v2, %v6206_v35  ;;  %v2359_v11 = vadd.f32 %v2288_v6, %v2114_v28  ;;  %v1048_v14 = vmul.f32 %v5563_v2, %v6207_v39 }
 0x298   : > { %v1293_v19 = vmul.f32 %v5570_v34, %v6206_v35  ;;  %v1976_v63 = vsel %vm1347_vm1, %v1973_v37, %v1975_v59  ;;  %v2290_v3 = vsel %vm1101_vm0, %v2287_v52, %v2289_v32  ;;  %v2534_v1 = vrot.slane %v2411_v49, 2 }
 0x299   : > { %v1556_v16 = vadd.f32 %v1524_v48, %v1487_v25  ;;  %v1172_v45 = vrot.slane %v1047_v26, 1  ;;  %v2604_v12 = vadd.f32 %v2533_v60, %v2359_v11  ;;  %v1173_v54 = vrot.slane %v1048_v14, 1  ;;  %v5802_v25 = vpop.f32.mrf.mxu1  ;;  %v6222_v11 = vld [vmem:[#allocation37_spill] sm:$0xff] }
 0x29a   : > { %v1294_v6 = vmul.f32 %v5570_v34, %v6207_v39  ;;  %v1418_v40 = vrot.slane %v1293_v19, 2  ;;  %v1525_v2 = vmul.f32 %v5617_v38, %v6214_v36  ;;  %v1608_v35 = vmul.f32 %v5648_v23, %v6214_v36 }
 0x29b   : > { %v1801_v44 = vadd.f32 %v1731_v0, %v1556_v16  ;;  %v1609_v37 = vmul.f32 %v5648_v23, %v6215_v13  ;;  %v2643_v52 = vadd.f32 %v5724_v8, %v2604_v12  ;;  %v1174_v61 = vsel %vm1101_vm0, %v1172_v45, %v1173_v54 }
 0x29c   : > { %v1419_v48 = vrot.slane %v1294_v6, 2  ;;  %v1242_v46 = vadd.f32 %v1174_v61, %v996_v9  ;;  %v1732_v34 = vrot.slane %v1608_v35, 1  ;;  %v1853_v42 = vmul.f32 %v5586_v31, %v6214_v36 }
 0x29d   : > { %v2046_v55 = vadd.f32 %v1976_v63, %v1801_v44  ;;  %v1733_v60 = vrot.slane %v1609_v37, 1  ;;  %3545 = vmatprep.mubr.f32.mxu1 %v2643_v52  ;;  %v2535_v49 = vsel %vm1347_vm1, %v2532_v20, %v2534_v1  ;;  %v1854_v28 = vmul.f32 %v5586_v31, %v6215_v13  ;;  %v2758_v44 = vpop.f32.mrf.mxu1  ;;  %v6225_v37 = vld [vmem:[#allocation23_spill] sm:$0xff] }
 0x29e   : > { %v1420_v23 = vsel %vm1347_vm1, %v1418_v40, %v1419_v48  ;;  %v1977_v32 = vrot.slane %v1853_v42, 2  ;;  %v2167_v9 = vmul.f32 %v5664_v15, %v5280_v50  ;;  %v2412_v20 = vmul.f32 %v5671_v18, %v5280_v50  ;;  %v6223_v40 = vld [vmem:[#allocation28_spill] sm:$0xff]  ;;  %v6227_v42 = vld [vmem:[#allocation29_spill] sm:$0xff] }
 0x29f   : > { %v2115_v17 = vadd.f32 %v2083_v21, %v2046_v55  ;;  %v1488_v0 = vadd.f32 %v1420_v23, %v1242_v46  ;;  %v1734_v59 = vsel %vm1101_vm0, %v1732_v34, %v1733_v60  ;;  %v1978_v36 = vrot.slane %v1854_v28, 2  ;;  %v3517_v61 = vpop.f32.mrf.mxu1 }
 0x2a0   : > { %v2168_v21 = vmul.f32 %v5664_v15, %v6222_v11  ;;  %v2084_v14 = vmul.f32 %v5660_v24, %v5280_v50  ;;  %v2413_v19 = vmul.f32 %v5671_v18, %v6222_v11  ;;  %v997_v63 = vmul.f32 %v5605_v30, %v6207_v39 }
 0x2a1   : > { %v2360_v26 = vadd.f32 %v2290_v3, %v2115_v17  ;;  %v1557_v16 = vadd.f32 %v1525_v2, %v1488_v0  ;;  %v1979_v3 = vsel %vm1347_vm1, %v1977_v32, %v1978_v36  ;;  %v2291_v45 = vrot.slane %v2167_v9, 1  ;;  %v6231_v32 = vld [vmem:[#allocation43_spill] sm:$0xff] }
 0x2a2   : > { %v2292_v12 = vrot.slane %v2168_v21, 1  ;;  %v2536_v6 = vrot.slane %v2412_v20, 2  ;;  %v6224_v35 = vrot.slane %v6223_v40, 1  ;;  %v6226_v50 = vrot.slane %v6225_v37, 2  ;;  %v2768_v21 = vpop.f32.mrf.mxu1 }
 0x2a3   : > { %v2605_v1 = vadd.f32 %v2535_v49, %v2360_v26  ;;  %v1802_v15 = vadd.f32 %v1734_v59, %v1557_v16  ;;  %v2537_v55 = vrot.slane %v2413_v19, 2  ;;  %v1526_v39 = vmul.f32 %v5617_v38, %v6215_v13 }
 0x2a4   : > { %v1176_v2 = vsel %vm1101_vm0, %v1173_v54, %v6224_v35  ;;  %v1422_v52 = vsel %vm1347_vm1, %v1419_v48, %v6226_v50  ;;  %v2118_v46 = vadd.f32 %v5446_v58, %v5501_v57  ;;  %v1735_v17 = vrot.slane %v6227_v42, 1  ;;  %v6228_v48 = vld [vmem:[#allocation36_spill] sm:$0xff]  ;;  %v5842_v58 = vld [vmem:[%s6035_s7] ss:$0 sm:$0xff] }
 0x2a5   : > { %v2644_v18 = vadd.f32 %v5724_v8, %v2605_v1  ;;  %v1243_v30 = vadd.f32 %v1176_v2, %v997_v63  ;;  %v2047_v34 = vadd.f32 %v1979_v3, %v1802_v15  ;;  %v1855_v54 = vmul.f32 %v5586_v31, %v6221_v5  ;;  %v2897_v63 = vld [vmem:[%s4170_s18] sm:$0xff] }
 0x2a6   : > { %v6229_v49 = vrot.slane %v6228_v48, 1  ;;  %v2544_v28 = vrot.slane %v5512_v10, 2  ;;  %v2293_v38 = vsel %vm1101_vm0, %v2291_v45, %v2292_v12  ;;  %v1736_v31 = vsel %vm1101_vm0, %v1733_v60, %v1735_v17  ;;  %v2898_v60 = vld [vmem:[%s4170_s18 + $0x8] sm:$0xff]  ;;  %v2899_v45 = vld [vmem:[%s4170_s18 + $0x10] sm:$0xff] }
 0x2a7   : > { %3546 = vmatmul.mubr.f32.gmra.mxu1 %v2644_v18  ;;  %v1489_v13 = vadd.f32 %v1422_v52, %v1243_v30  ;;  %v2116_v57 = vadd.f32 %v2084_v14, %v2047_v34  ;;  %v1980_v7 = vrot.slane %v1855_v54, 2  ;;  %v2085_v59 = vmul.f32 %v5660_v24, %v6222_v11  ;;  %v2901_v18 = vld [vmem:[%s4170_s18 + $0x20] sm:$0xff] }
 0x2a8   : > { %v2300_v23 = vsel %vm1101_vm0, %v6229_v49, %v2299_v53  ;;  %v6230_v5 = vmov %v6229_v49  ;;  %v2538_v53 = vsel %vm1347_vm1, %v2536_v6, %v2537_v55  ;;  %v6232_v9 = vrot.slane %v6231_v32, 1 }
 0x2a9   : > { %v2298_v10 = vsel %vm1101_vm0, %v2296_v29, %v6230_v5  ;;  %v1558_v0 = vadd.f32 %v1526_v39, %v1489_v13  ;;  %v2361_v20 = vadd.f32 %v2293_v38, %v2116_v57  ;;  %v1981_v16 = vsel %vm1347_vm1, %v1978_v36, %v1980_v7  ;;  %v2900_v36 = vld [vmem:[%s4170_s18 + $0x18] sm:$0xff] }
 0x2aa   : > { %v2295_v26 = vsel %vm1101_vm0, %v2292_v12, %v6232_v9  ;;  %v6234_v14 = vrot.slane %v6233_v4, 2  ;;  %v2744_v19 = vadd.f32 %v5747_v33, %v5842_v58  ;;  %v2363_v3 = vadd.f32 %v2298_v10, %v2118_v46  ;;  %v3520_v12 = vpop.f32.mrf.mxu1 }
 0x2ab   : > { %v1803_v1 = vadd.f32 %v1736_v31, %v1558_v0  ;;  %v2543_v24 = vsel %vm1347_vm1, %v2541_v27, %v2542_v56  ;;  %v2739_v11 = vadd.f32 %v5842_v58, %v5770_v41  ;;  %v2606_v15 = vadd.f32 %v2538_v53, %v2361_v20 }
 0x2ac   : > { %v2540_v29 = vsel %vm1347_vm1, %v2537_v55, %v6234_v14  ;;  %v2930_v6 = vadd.f32 %v2898_v60, %v2744_v19  ;;  %v2754_v33 = vadd.f32 %v5780_v43, %v5842_v58  ;;  %v2749_v40 = vadd.f32 %v5842_v58, %v5794_v22  ;;  %v2902_v43 = vld [vmem:[%s4170_s18 + $0x28] sm:$0xff]  ;;  %v2778_v39 = vpop.f32.mrf.mxu1 }
 0x2ad   : > { %v2048_v51 = vadd.f32 %v1981_v16, %v1803_v1  ;;  %v2364_v27 = vadd.f32 %v2300_v23, %v5490_v47  ;;  %v2545_v41 = vsel %vm1347_vm1, %v2542_v56, %v2544_v28  ;;  %v2929_v35 = vadd.f32 %v2897_v63, %v2739_v11  ;;  %v2903_v56 = vld [vmem:[%s4170_s18 + $0x30] sm:$0xff]  ;;  %v2905_v23 = vld [vmem:[%s4170_s18 + $0x40] sm:$0xff]  ;;  %v2908_v16 = vld [vmem:[%s4170_s18 + $0x58] sm:$0xff] }
 0x2ae   : > { %v2645_v2 = vadd.f32 %v5724_v8, %v2606_v15  ;;  %v2962_v37 = vmax.f32 %v2930_v6, 0.0  ;;  %v2932_v50 = vadd.f32 %v2900_v36, %v2754_v33  ;;  %v2931_v52 = vadd.f32 %v2899_v45, %v2749_v40  ;;  %v2910_v11 = vld [vmem:[%s4170_s18 + $0x68] sm:$0xff] }
 0x2af   : > { %v2117_v55 = vadd.f32 %v2085_v59, %v2048_v51  ;;  %v2961_v22 = vmax.f32 %v2929_v35, 0.0  ;;  %v2764_v30 = vadd.f32 %v5802_v25, %v5842_v58  ;;  %v2759_v47 = vadd.f32 %v5842_v58, %v2758_v44  ;;  %v2906_v44 = vld [vmem:[%s4170_s18 + $0x48] sm:$0xff] }
 0x2b0   : > { %3548 = vmatprep.mubr.f32.mxu1 %v2645_v2  ;;  %2994 = vst [vmem:[%s5891_s22 + $0x8] sm:$0xff] %v2962_v37  ;;  %v2964_v46 = vmax.f32 %v2932_v50, 0.0  ;;  %v2963_v34 = vmax.f32 %v2931_v52, 0.0  ;;  %v2774_v42 = vadd.f32 %v3517_v61, %v5842_v58  ;;  %v2769_v25 = vadd.f32 %v5842_v58, %v2768_v21  ;;  %v2911_v37 = vld [vmem:[%s4170_s18 + $0x70] sm:$0xff] }
 0x2b1   : > { %v2362_v17 = vadd.f32 %v2295_v26, %v2117_v55  ;;  %2993 = vst [vmem:[%s5891_s22] sm:$0xff] %v2961_v22  ;;  %v2934_v54 = vadd.f32 %v2902_v43, %v2764_v30  ;;  %v2933_v48 = vadd.f32 %v2901_v18, %v2759_v47  ;;  %v2784_v49 = vadd.f32 %v3520_v12, %v5842_v58  ;;  %v2909_v12 = vld [vmem:[%s4170_s18 + $0x60] sm:$0xff]  ;;  %v2914_v30 = vld [vmem:[%s4170_s18 + $0x88] sm:$0xff] }
 0x2b2   : > { %v2608_v28 = vadd.f32 %v2543_v24, %v2363_v3  ;;  %2996 = vst [vmem:[%s5891_s22 + $0x18] sm:$0xff] %v2964_v46  ;;  %2995 = vst [vmem:[%s5891_s22 + $0x10] sm:$0xff] %v2963_v34  ;;  %v2936_v38 = vadd.f32 %v2904_v62, %v2774_v42  ;;  %v2935_v13 = vadd.f32 %v2903_v56, %v2769_v25  ;;  %v2913_v56 = vld [vmem:[%s4170_s18 + $0x80] sm:$0xff] }
 0x2b3   : > { %v2779_v61 = vadd.f32 %v5842_v58, %v2778_v39  ;;  %v2607_v57 = vadd.f32 %v2540_v29, %v2362_v17  ;;  %v2966_v31 = vmax.f32 %v2934_v54, 0.0  ;;  %v2965_v7 = vmax.f32 %v2933_v48, 0.0  ;;  %v2907_v29 = vld [vmem:[%s4170_s18 + $0x50] sm:$0xff]  ;;  %v2916_v17 = vld [vmem:[%s4170_s18 + $0x98] sm:$0xff] }
 0x2b4   : > { %v2938_v5 = vadd.f32 %v2906_v44, %v2784_v49  ;;  %v2968_v10 = vmax.f32 %v2936_v38, 0.0  ;;  %v2967_v53 = vmax.f32 %v2935_v13, 0.0  ;;  %v2609_v32 = vadd.f32 %v2545_v41, %v2364_v27  ;;  %v2912_v41 = vld [vmem:[%s4170_s18 + $0x78] sm:$0xff]  ;;  %v2915_v49 = vld [vmem:[%s4170_s18 + $0x90] sm:$0xff] }
 0x2b5   : > { %v2937_v0 = vadd.f32 %v2905_v23, %v2779_v61  ;;  %v2646_v59 = vadd.f32 %v5724_v8, %v2607_v57  ;;  %2998 = vst [vmem:[%s5891_s22 + $0x28] sm:$0xff] %v2966_v31  ;;  %2997 = vst [vmem:[%s5891_s22 + $0x20] sm:$0xff] %v2965_v7  ;;  %v2647_v26 = vadd.f32 %v5724_v8, %v2608_v28  ;;  %v2918_v31 = vld [vmem:[%s4170_s18 + $0xa8] sm:$0xff] }
 0x2b6   : > { %v2970_v9 = vmax.f32 %v2938_v5, 0.0  ;;  %3000 = vst [vmem:[%s5891_s22 + $0x38] sm:$0xff] %v2968_v10  ;;  %2999 = vst [vmem:[%s5891_s22 + $0x30] sm:$0xff] %v2967_v53  ;;  %v2648_v21 = vadd.f32 %v5724_v8, %v2609_v32  ;;  %v2917_v10 = vld [vmem:[%s4170_s18 + $0xa0] sm:$0xff] }
 0x2b7   : > { %v2969_v60 = vmax.f32 %v2937_v0, 0.0  ;;  %3549 = vmatmul.mubr.f32.gmra.mxu1 %v2646_v59 }
 0x2b8   : > { %3002 = vst [vmem:[%s5891_s22 + $0x48] sm:$0xff] %v2970_v9  ;;  %3551 = vmatprep.mubr.f32.mxu1 %v2647_v26 }
 0x2b9   : > { %3001 = vst [vmem:[%s5891_s22 + $0x40] sm:$0xff] %v2969_v60  ;;  %v2920_v60 = vld [vmem:[%s4170_s18 + $0xb8] sm:$0xff] }
 0x2bb   : > { %3552 = vmatmul.mubr.f32.gmra.mxu1 %v2648_v21  ;;  %v3523_v20 = vpop.f32.mrf.mxu1 }
 0x2bc   : > { %v2794_v4 = vadd.f32 %v3523_v20, %v5842_v58 }
 0x2bd   : > { %v2788_v14 = vpop.f32.mrf.mxu1 }
 0x2be   : > { %v2940_v19 = vadd.f32 %v2908_v16, %v2794_v4  ;;  %v2789_v63 = vadd.f32 %v5842_v58, %v2788_v14  ;;  %v2919_v16 = vld [vmem:[%s4170_s18 + $0xb0] sm:$0xff] }
 0x2c0   : > { %v2972_v1 = vmax.f32 %v2940_v19, 0.0  ;;  %v2939_v3 = vadd.f32 %v2907_v29, %v2789_v63 }
 0x2c2   : > { %3004 = vst [vmem:[%s5891_s22 + $0x58] sm:$0xff] %v2972_v1  ;;  %v2971_v24 = vmax.f32 %v2939_v3, 0.0  ;;  %v2922_v3 = vld [vmem:[%s4170_s18 + $0xc8] sm:$0xff] }
 0x2c4   : > { %3003 = vst [vmem:[%s5891_s22 + $0x50] sm:$0xff] %v2971_v24 }
 0x2d2   : > { %v3526_v8 = vpop.f32.mrf.mxu1 }
 0x2d3   : > { %v2804_v36 = vadd.f32 %v3526_v8, %v5842_v58 }
 0x2d4   : > { %v2798_v45 = vpop.f32.mrf.mxu1 }
 0x2d5   : > { %v2942_v15 = vadd.f32 %v2910_v11, %v2804_v36  ;;  %v2799_v6 = vadd.f32 %v5842_v58, %v2798_v45  ;;  %v2921_v11 = vld [vmem:[%s4170_s18 + $0xc0] sm:$0xff] }
 0x2d7   : > { %v2974_v33 = vmax.f32 %v2942_v15, 0.0  ;;  %v2941_v40 = vadd.f32 %v2909_v12, %v2799_v6 }
 0x2d9   : > { %3006 = vst [vmem:[%s5891_s22 + $0x68] sm:$0xff] %v2974_v33  ;;  %v2973_v51 = vmax.f32 %v2941_v40, 0.0  ;;  %v2924_v40 = vld [vmem:[%s4170_s18 + $0xd8] sm:$0xff] }
 0x2db   : > { %3005 = vst [vmem:[%s5891_s22 + $0x60] sm:$0xff] %v2973_v51 }
 0x2e7   : > { %v3529_v27 = vpop.f32.mrf.mxu1 }
 0x2e8   : > { %v2814_v35 = vadd.f32 %v3529_v27, %v5842_v58 }
 0x2e9   : > { %v2808_v2 = vpop.f32.mrf.mxu1 }
 0x2ea   : > { %v2944_v50 = vadd.f32 %v2912_v41, %v2814_v35  ;;  %v2809_v52 = vadd.f32 %v5842_v58, %v2808_v2  ;;  %v2923_v41 = vld [vmem:[%s4170_s18 + $0xd0] sm:$0xff] }
 0x2ec   : > { %v2976_v43 = vmax.f32 %v2944_v50, 0.0  ;;  %v2943_v18 = vadd.f32 %v2911_v37, %v2809_v52 }
 0x2ee   : > { %3008 = vst [vmem:[%s5891_s22 + $0x78] sm:$0xff] %v2976_v43  ;;  %v2975_v55 = vmax.f32 %v2943_v18, 0.0  ;;  %v2926_v18 = vld [vmem:[%s4170_s18 + $0xe8] sm:$0xff] }
 0x2f0   : > { %3007 = vst [vmem:[%s5891_s22 + $0x70] sm:$0xff] %v2975_v55 }
 0x2fd   : > { %v3532_v22 = vpop.f32.mrf.mxu1 }
 0x2fe   : > { %v2824_v47 = vadd.f32 %v3532_v22, %v5842_v58 }
 0x2ff   : > { %v2818_v62 = vpop.f32.mrf.mxu1 }
 0x300   : > { %v2946_v39 = vadd.f32 %v2914_v30, %v2824_v47  ;;  %v2819_v46 = vadd.f32 %v5842_v58, %v2818_v62  ;;  %v2925_v30 = vld [vmem:[%s4170_s18 + $0xe0] sm:$0xff] }
 0x302   : > { %v2978_v34 = vmax.f32 %v2946_v39, 0.0  ;;  %v2945_v42 = vadd.f32 %v2913_v56, %v2819_v46  ;;  %v2928_v39 = vld [vmem:[%s4170_s18 + $0xf8] sm:$0xff] }
 0x304   : > { %3010 = vst [vmem:[%s5891_s22 + $0x88] sm:$0xff] %v2978_v34  ;;  %v2977_v25 = vmax.f32 %v2945_v42, 0.0 }
 0x306   : > { %3009 = vst [vmem:[%s5891_s22 + $0x80] sm:$0xff] %v2977_v25 }
 0x31f   : > { %v3535_v44 = vpop.f32.mrf.mxu1 }
 0x320   : > { %v2834_v54 = vadd.f32 %v3535_v44, %v5842_v58  ;;  %v2927_v44 = vld [vmem:[%s4170_s18 + $0xf0] sm:$0xff]  ;;  %s3026_s18 = scalar_lea.sflag [#allocation4], %s4156_s29 }
 0x321   : > { %v2828_v48 = vpop.f32.mrf.mxu1 }
 0x322   : > { %v2948_v23 = vadd.f32 %v2916_v17, %v2834_v54  ;;  %v2829_v28 = vadd.f32 %v5842_v58, %v2828_v48 }
 0x324   : > { %v2980_v38 = vmax.f32 %v2948_v23, 0.0  ;;  %v2947_v13 = vadd.f32 %v2915_v49, %v2829_v28 }
 0x326   : > { %3012 = vst [vmem:[%s5891_s22 + $0x98] sm:$0xff] %v2980_v38  ;;  %v2979_v61 = vmax.f32 %v2947_v13, 0.0 }
 0x328   : > { %3011 = vst [vmem:[%s5891_s22 + $0x90] sm:$0xff] %v2979_v61 }
 0x333   : > { %v3538_v57 = vpop.f32.mrf.mxu1 }
 0x334   : > { %v2844_v7 = vadd.f32 %v3538_v57, %v5842_v58 }
 0x335   : > { %v2838_v5 = vpop.f32.mrf.mxu1 }
 0x336   : > { %v2950_v53 = vadd.f32 %v2918_v31, %v2844_v7  ;;  %v2839_v0 = vadd.f32 %v5842_v58, %v2838_v5 }
 0x338   : > { %v2982_v59 = vmax.f32 %v2950_v53, 0.0  ;;  %v2949_v32 = vadd.f32 %v2917_v10, %v2839_v0 }
 0x33a   : > { %3014 = vst [vmem:[%s5891_s22 + $0xa8] sm:$0xff] %v2982_v59  ;;  %v2981_v9 = vmax.f32 %v2949_v32, 0.0 }
 0x33c   : > { %3013 = vst [vmem:[%s5891_s22 + $0xa0] sm:$0xff] %v2981_v9 }
 0x343   : > { %v3541_v26 = vpop.f32.mrf.mxu1 }
 0x344   : > { %v2854_v21 = vadd.f32 %v3541_v26, %v5842_v58 }
 0x345   : > { %v2848_v20 = vpop.f32.mrf.mxu1 }
 0x346   : > { %v2952_v4 = vadd.f32 %v2920_v60, %v2854_v21  ;;  %v2849_v14 = vadd.f32 %v5842_v58, %v2848_v20 }
 0x348   : > { %v2984_v29 = vmax.f32 %v2952_v4, 0.0  ;;  %v2951_v19 = vadd.f32 %v2919_v16, %v2849_v14 }
 0x34a   : > { %3016 = vst [vmem:[%s5891_s22 + $0xb8] sm:$0xff] %v2984_v29  ;;  %v2983_v63 = vmax.f32 %v2951_v19, 0.0 }
 0x34c   : > { %3015 = vst [vmem:[%s5891_s22 + $0xb0] sm:$0xff] %v2983_v63 }
 0x354   : > { %v3544_v1 = vpop.f32.mrf.mxu1 }
 0x355   : > { %v2864_v24 = vadd.f32 %v3544_v1, %v5842_v58 }
 0x356   : > { %v2858_v8 = vpop.f32.mrf.mxu1 }
 0x357   : > { %v2954_v36 = vadd.f32 %v2922_v3, %v2864_v24  ;;  %v2859_v45 = vadd.f32 %v5842_v58, %v2858_v8 }
 0x359   : > { %v2986_v12 = vmax.f32 %v2954_v36, 0.0  ;;  %v2953_v15 = vadd.f32 %v2921_v11, %v2859_v45 }
 0x35b   : > { %3018 = vst [vmem:[%s5891_s22 + $0xc8] sm:$0xff] %v2986_v12  ;;  %v2985_v6 = vmax.f32 %v2953_v15, 0.0 }
 0x35d   : > { %3017 = vst [vmem:[%s5891_s22 + $0xc0] sm:$0xff] %v2985_v6 }
 0x367   : > { %v3547_v33 = vpop.f32.mrf.mxu1 }
 0x368   : > { %v2874_v51 = vadd.f32 %v3547_v33, %v5842_v58 }
 0x369   : > { %v2868_v27 = vpop.f32.mrf.mxu1 }
 0x36a   : > { %v2956_v35 = vadd.f32 %v2924_v40, %v2874_v51  ;;  %v2869_v2 = vadd.f32 %v5842_v58, %v2868_v27 }
 0x36c   : > { %v2988_v37 = vmax.f32 %v2956_v35, 0.0  ;;  %v2955_v50 = vadd.f32 %v2923_v41, %v2869_v2 }
 0x36e   : > { %3020 = vst [vmem:[%s5891_s22 + $0xd8] sm:$0xff] %v2988_v37  ;;  %v2987_v52 = vmax.f32 %v2955_v50, 0.0 }
 0x370   : > { %3019 = vst [vmem:[%s5891_s22 + $0xd0] sm:$0xff] %v2987_v52 }
 0x377   : > { %v3550_v43 = vpop.f32.mrf.mxu1 }
 0x378   : > { %v2884_v55 = vadd.f32 %v3550_v43, %v5842_v58 }
 0x379   : > { %v2878_v22 = vpop.f32.mrf.mxu1 }
 0x37a   : > { %v2958_v47 = vadd.f32 %v2926_v18, %v2884_v55  ;;  %v2879_v62 = vadd.f32 %v5842_v58, %v2878_v22 }
 0x37b   : > { %v3553_v56 = vpop.f32.mrf.mxu1 }
 0x37c   : > { %v2990_v46 = vmax.f32 %v2958_v47, 0.0  ;;  %v2957_v34 = vadd.f32 %v2925_v30, %v2879_v62  ;;  %v2894_v42 = vadd.f32 %v3553_v56, %v5842_v58 }
 0x37d   : > { %v2888_v25 = vpop.f32.mrf.mxu1 }
 0x37e   : > { %3022 = vst [vmem:[%s5891_s22 + $0xe8] sm:$0xff] %v2990_v46  ;;  %v2989_v17 = vmax.f32 %v2957_v34, 0.0  ;;  %v2960_v54 = vadd.f32 %v2928_v39, %v2894_v42  ;;  %v2889_v48 = vadd.f32 %v5842_v58, %v2888_v25 }
 0x380   : > { %3021 = vst [vmem:[%s5891_s22 + $0xe0] sm:$0xff] %v2989_v17  ;;  %v2992_v49 = vmax.f32 %v2960_v54, 0.0  ;;  %v2959_v23 = vadd.f32 %v2927_v44, %v2889_v48 }
 0x382   : > { %3024 = vst [vmem:[%s5891_s22 + $0xf8] sm:$0xff] %v2992_v49  ;;  %v2991_v28 = vmax.f32 %v2959_v23, 0.0 }
 0x384   : > { %3023 = vst [vmem:[%s5891_s22 + $0xf0] sm:$0xff] %v2991_v28 }
 0x385   : > { %3843 = shalt.err (!%p3840_p6)
}
 0x386   : > { %s3844_s26 = scalar_lea.hbm %s5981_s11, 4096  ;;  %s3848_s0 = scalar_lea.hbm %s6036_s8, 8192 }
 0x387   : > { %p3845_p7 = scmp.ne.s32.totalorder %s5981_s11, %s3844_s26  ;;  %p3849_p11 = scmp.lt.s32.totalorder %s5981_s11, %s6036_s8 }
 0x388   : > { %p3850_p3 = scmp.lt.s32.totalorder %s3848_s0, %s3844_s26 }
 0x389   : > { %p3846_p5 = pnand %p3845_p7, %p6235_p13 }
 0x38a   : > { %p3851_p12 = por %p3850_p3, %p3849_p11 }
 0x38b   : > { %p3847_p8 = pneg %p3846_p5 }
 0x38d   : > { %p3852_p9 = pnand %p3851_p12, %p3847_p8 }
 0x38f   : > { %3855 = shalt.err (!%p3852_p9)
}
 0x390   : > { %s3916_s21 = smov 128   ;;  %s3917_s14 = smov 8  }
 0x391   : > { %3605 = dma.vmem_to_hbm [thread:$0]  (%p6235_p13), %s5983_s13, 4096, %s5981_s11, %s3026_s18, %s3916_s21, %s3916_s21, %s3917_s14  }
 0x392 PF: > { %s3054_s22 = sand.u32 1, %s3894_s27   ;;  %p6236_p0 = scmp.ne.s32.totalorder %s6089_s12, 0 }
 0x393   : > { %p6237_p2 = scmp.ge.s32.totalorder %s3906_s30, 2  ;;  %s3055_s23 = scalar_lea.sflag [#allocation4], %s3054_s22 }
 0x395   : > { %p3625_p10 = pnand %p6237_p2, %p6236_p0 }
 0x397   : > { %p3626_p1 = pneg %p3625_p10 }
 0x399   : > { %3889 = dma.done.wait (%p3626_p1), %s3055_s23, 4096  }
 0x39a   : > { %3891 = vsyncadd (%p3626_p1), %s3055_s23, 4294963200  ;;  %s6238_s24 = sld [smem:[#allocation17_spill]]  ;;  %p25_p4 = scmp.ge.s32.totalorder %s4052_s16, 4  }
 0x39b   : > { %s6239_s29 = sld [smem:[#allocation18_spill]]  ;;  %s6240_s27 = smov %s3898_s28 }
 0x39c   : > { %s6242_s30 = smov %s4052_s16  ;;  %27 = sbr.rel (!%p25_p4) target bundleno = 13 (0xd), region = 122 }
 0x3a0   : > { %s6241_s28 = smov %s6238_s24 }
 0x3a1   :  { %3060 = vsyncpa [#allocation3], 1 }
 0x3a2   :  { %3062 = vsyncpa [#allocation3 + $0x1], 1 }
 0x3a3   :  { %3063 = vsyncpa [#allocation6], 1 }
 0x3a4   :  { %3065 = vsyncpa [#allocation6 + $0x1], 1 }
 0x3a5   :  { %3066 = vsyncpa [#allocation9], 1 }
 0x3a6   :  { %3067 = vsyncpa [#allocation4], 1 }
 0x3a7   :  { %3069 = vsyncpa [#allocation4 + $0x1], 1 }

</bundles_post_ra>
